<compile_context>
chip_gen: v7x
topology: tpu7x:2x2x1
jax: 0.10.0
libtpu: 0.0.40
codegen_flags: <defaults>
</compile_context>

<pallas_src>
from functools import partial

import numpy as np
import jax
import jax.numpy as jnp
from jax.experimental import pallas as pl
from jax.experimental.pallas import tpu as pltpu

EPS = 1e-5  # nn.BatchNorm2d default eps


# ----------------------------- Pallas kernels ------------------------------

def _bn_relu(y, g, b):
    # training-mode BatchNorm forward (biased batch variance over N*H*W per
    # channel) + ReLU, on a (Cout, M) lane-dense tile.
    mean = jnp.mean(y, axis=1, keepdims=True)
    var = jnp.mean(jnp.square(y - mean), axis=1, keepdims=True)
    return jnp.maximum((y - mean) * jax.lax.rsqrt(var + EPS) * g + b, 0.0)


def _conv_bn_relu_kernel(cols_ref, w_ref, g_ref, b_ref, o_ref):
    y = jnp.dot(w_ref[...], cols_ref[...], preferred_element_type=jnp.float32)
    o_ref[...] = _bn_relu(y, g_ref[...], b_ref[...])


def _conv_bn_relu_resize_kernel(cols_ref, w_ref, g_ref, b_ref, rt_ref, o_ref):
    # conv + BN + ReLU, then bilinear upsample as a single right-matmul with a
    # precomputed (M_in, M_out) interpolation operator (block-diag over batch).
    y = jnp.dot(w_ref[...], cols_ref[...], preferred_element_type=jnp.float32)
    y = _bn_relu(y, g_ref[...], b_ref[...])
    o_ref[...] = jnp.dot(y, rt_ref[...], preferred_element_type=jnp.float32)


def _conv_bias_kernel(cols_ref, w_ref, b_ref, o_ref):
    o_ref[...] = (
        jnp.dot(w_ref[...], cols_ref[...], preferred_element_type=jnp.float32)
        + b_ref[...]
    )


def _conv_bn_relu_head_kernel(cols_ref, w_ref, g_ref, b_ref, wc_ref, bc_ref,
                              o_ref):
    # last decoder conv + BN + ReLU, then the final 1x1 conv (+bias) fused so
    # the out_channels=2 tensor is still written lane-dense (M=1152 lanes).
    y = jnp.dot(w_ref[...], cols_ref[...], preferred_element_type=jnp.float32)
    y = _bn_relu(y, g_ref[...], b_ref[...])
    o_ref[...] = (
        jnp.dot(wc_ref[...], y, preferred_element_type=jnp.float32)
        + bc_ref[...]
    )


def _vmem_specs(n):
    return [pl.BlockSpec(memory_space=pltpu.MemorySpace.VMEM) for _ in range(n)]


def _vmem_out():
    return pl.BlockSpec(memory_space=pltpu.MemorySpace.VMEM)


def pallas_conv_bn_relu(cols, w, g, b):
    return pl.pallas_call(
        _conv_bn_relu_kernel,
        out_shape=jax.ShapeDtypeStruct((w.shape[0], cols.shape[1]), jnp.float32),
        in_specs=_vmem_specs(4),
        out_specs=_vmem_out(),
    )(cols, w, g, b)


def pallas_conv_bn_relu_resize(cols, w, g, b, rt):
    return pl.pallas_call(
        _conv_bn_relu_resize_kernel,
        out_shape=jax.ShapeDtypeStruct((w.shape[0], rt.shape[1]), jnp.float32),
        in_specs=_vmem_specs(5),
        out_specs=_vmem_out(),
    )(cols, w, g, b, rt)


def pallas_conv_bias(cols, w, b):
    return pl.pallas_call(
        _conv_bias_kernel,
        out_shape=jax.ShapeDtypeStruct((w.shape[0], cols.shape[1]), jnp.float32),
        in_specs=_vmem_specs(3),
        out_specs=_vmem_out(),
    )(cols, w, b)


def pallas_conv_bn_relu_head(cols, w, g, b, wc, bc):
    return pl.pallas_call(
        _conv_bn_relu_head_kernel,
        out_shape=jax.ShapeDtypeStruct((wc.shape[0], cols.shape[1]), jnp.float32),
        in_specs=_vmem_specs(6),
        out_specs=_vmem_out(),
    )(cols, w, g, b, wc, bc)


# ------------------------------- glue (JAX) ---------------------------------
# Activations live as (C, N, H, W) between kernels; cols are built channel-
# major so kernel outputs land as (Cout, N*H*W) with the long axis on lanes.

def _pad_w_circ(x, p):
    # CustomPad2dTransp: circular pad of p on each side of W only.
    if p == 0:
        return x
    return jnp.concatenate([x[..., -p:], x, x[..., :p]], axis=-1)


def _im2col_T(xp, k):
    # xp: (C, N, Hp, Wp) -> cols (k*k*C, N*Ho*Wo); row order (i, j, c),
    # column order (n, h, w) -- matches the packed weight layout.
    c, n, hp, wp = xp.shape
    ho, wo = hp - k + 1, wp - k + 1
    taps = [xp[:, :, i:i + ho, j:j + wo] for i in range(k) for j in range(k)]
    cols = jnp.stack(taps, axis=0).reshape(k * k * c, n * ho * wo)
    return cols, (n, ho, wo)


def _cols_down(x_sp, k):
    # CustomPad (circular W) + valid Conv2d -> im2col of the padded input.
    return _im2col_T(_pad_w_circ(x_sp, (k - 1) // 2), k)


def _cols_up(x_sp, k):
    # CustomPad + ConvTranspose2d(k, padding=(0, k-1), stride=1) is a valid
    # conv (flipped, channel-swapped kernel) over the circularly-W-padded
    # input additionally zero-padded in H by (k-1) on both sides.
    xp = _pad_w_circ(x_sp, (k - 1) // 2)
    xp = jnp.pad(xp, ((0, 0), (0, 0), (k - 1, k - 1), (0, 0)))
    return _im2col_T(xp, k)


def _maxpool2(x_sp):
    # 2x2/2 max pool on (C, N, H, W); one small XLA fusion, no Pallas launch.
    c, n, h, w = x_sp.shape
    return jnp.max(x_sp.reshape(c, n, h // 2, 2, w // 2, 2), axis=(3, 5))


# -------------------- bilinear upsample operators (host) --------------------

def bilinear_matrix(in_size, out_size):
    # PyTorch nn.Upsample(mode='bilinear', align_corners=False) index math.
    scale = (in_size / out_size) if out_size > 1 else 0.0
    m = np.zeros((out_size, in_size), dtype=np.float64)
    for o in range(out_size):
        src = max(scale * (o + 0.5) - 0.5, 0.0)
        i0 = min(int(np.floor(src)), in_size - 1)
        i1 = min(i0 + 1, in_size - 1)
        lam = src - i0
        m[o, i0] += 1.0 - lam
        m[o, i1] += lam
    return m


def resize_rt(batch, hi, wi, ho, wo):
    # Combined flat-spatial interpolation operator R^T (N*hi*wi, N*ho*wo) so
    # that  Y_up (C, M_out) = Y (C, M_in) @ R^T  inside a kernel.
    my = bilinear_matrix(hi, ho)                       # (ho, hi)
    mx = bilinear_matrix(wi, wo)                       # (wo, wi)
    blk = np.einsum('ai,bj->abij', my, mx).reshape(ho * wo, hi * wi)
    rt = np.kron(np.eye(batch), blk.T)                 # block-diag over batch
    return jnp.asarray(rt, dtype=jnp.float32)


# ------------------------------ forward pass --------------------------------

def unet_forward(x_nchw, p, k=3):
    nb, _, ydim, xdim = x_nchw.shape
    # channel-major internal layout: (C, N, H, W) / flattened (C, N*H*W)
    x = jnp.transpose(x_nchw.astype(jnp.float32), (1, 0, 2, 3))

    def conv_layer(x_sp, name, transposed=False):
        cols, (n_, h, w) = (_cols_up if transposed else _cols_down)(x_sp, k)
        wm = p[name + '_w']
        y = pallas_conv_bn_relu(cols, wm, p[name + '_g'], p[name + '_b'])
        return y.reshape(wm.shape[0], n_, h, w)

    # ---------------- encoder ----------------
    e1 = conv_layer(x, 'enc1c1')
    e1 = conv_layer(e1, 'enc1c2')                       # (f, N, 32, 16)  skip
    t = _maxpool2(e1)
    t = conv_layer(t, 'enc2c1')
    e2 = conv_layer(t, 'enc2c2')                        # (2f, N, 12, 8)  skip
    t = _maxpool2(e2)

    # ------------- bottleneck (conv2 fused with upsample2) -------------
    t = conv_layer(t, 'botc1')
    cols, _ = _cols_down(t, k)
    h_up2, w_up2 = int(ydim / 2 - (k - 1) * 2), int(xdim / 2)
    t = pallas_conv_bn_relu_resize(cols, p['botc2_w'], p['botc2_g'],
                                   p['botc2_b'], p['up2_rt'])
    t = t.reshape(p['botc2_w'].shape[0], nb, h_up2, w_up2)      # (4f, N, 14, 8)

    # ---------------- decoder 2 ----------------
    cols, (_, h, w) = _cols_down(t, k)                  # CustomPad + upconv2
    t = pallas_conv_bias(cols, p['upconv2_w'], p['upconv2_b'])
    t = t.reshape(p['upconv2_w'].shape[0], nb, h, w)             # (2f, N, 12, 8)
    t = jnp.concatenate([t, e2], axis=0)                # channel skip concat
    t = conv_layer(t, 'dec2c1', transposed=True)                 # (2f, N, 14, 8)
    cols, _ = _cols_up(t, k)                            # dec2 conv2 + upsample1
    h_up1, w_up1 = int(ydim - (k - 1)), int(xdim)
    t = pallas_conv_bn_relu_resize(cols, p['dec2c2_w'], p['dec2c2_g'],
                                   p['dec2c2_b'], p['up1_rt'])
    t = t.reshape(p['dec2c2_w'].shape[0], nb, h_up1, w_up1)      # (2f, N, 34, 16)

    # ---------------- decoder 1 ----------------
    cols, (_, h, w) = _cols_down(t, k)                  # CustomPad + upconv1
    t = pallas_conv_bias(cols, p['upconv1_w'], p['upconv1_b'])
    t = t.reshape(p['upconv1_w'].shape[0], nb, h, w)             # (f, N, 32, 16)
    t = jnp.concatenate([t, e1], axis=0)
    t = conv_layer(t, 'dec1c1', transposed=True)                 # (f, N, 34, 16)
    cols, (_, h, w) = _cols_up(t, k)                    # dec1 conv2 + final 1x1
    out = pallas_conv_bn_relu_head(cols, p['dec1c2_w'], p['dec1c2_g'],
                                   p['dec1c2_b'], p['conv_w'], p['conv_b'])
    out = out.reshape(p['conv_w'].shape[0], nb, h, w)            # (out_ch, N, 36, 16)
    return jnp.transpose(out, (1, 0, 2, 3))                      # back to NCHW


# ------------------------------ parameters ----------------------------------

def init_raw_params(key, in_ch=4, out_ch=2, k=3):
    # PyTorch-layout parameters (same shapes/names as the nn.Module).
    f = 2 ** (in_ch - 1).bit_length()
    spec = [
        ('enc1_w1', (f, in_ch, k, k), 'w'), ('enc1_g1', (f,), 'g'), ('enc1_b1', (f,), 'b'),
        ('enc1_w2', (f, f, k, k), 'w'), ('enc1_g2', (f,), 'g'), ('enc1_b2', (f,), 'b'),
        ('enc2_w1', (2 * f, f, k, k), 'w'), ('enc2_g1', (2 * f,), 'g'), ('enc2_b1', (2 * f,), 'b'),
        ('enc2_w2', (2 * f, 2 * f, k, k), 'w'), ('enc2_g2', (2 * f,), 'g'), ('enc2_b2', (2 * f,), 'b'),
        ('bot_w1', (4 * f, 2 * f, k, k), 'w'), ('bot_g1', (4 * f,), 'g'), ('bot_b1', (4 * f,), 'b'),
        ('bot_w2', (4 * f, 4 * f, k, k), 'w'), ('bot_g2', (4 * f,), 'g'), ('bot_b2', (4 * f,), 'b'),
        ('upconv2_w', (2 * f, 4 * f, k, k), 'w'), ('upconv2_b', (2 * f,), 'b'),
        # ConvTranspose2d weights are (in, out, kH, kW)
        ('dec2_w1', (4 * f, 2 * f, k, k), 'w'), ('dec2_g1', (2 * f,), 'g'), ('dec2_b1', (2 * f,), 'b'),
        ('dec2_w2', (2 * f, 2 * f, k, k), 'w'), ('dec2_g2', (2 * f,), 'g'), ('dec2_b2', (2 * f,), 'b'),
        ('upconv1_w', (f, 2 * f, k, k), 'w'), ('upconv1_b', (f,), 'b'),
        ('dec1_w1', (2 * f, f, k, k), 'w'), ('dec1_g1', (f,), 'g'), ('dec1_b1', (f,), 'b'),
        ('dec1_w2', (f, f, k, k), 'w'), ('dec1_g2', (f,), 'g'), ('dec1_b2', (f,), 'b'),
        ('conv_w', (out_ch, f, 1, 1), 'w'), ('conv_b', (out_ch,), 'b'),
    ]
    params = {}
    keys = jax.random.split(key, len(spec))
    for (name, shape, kind), kk in zip(spec, keys):
        if kind == 'g':
            params[name] = 1.0 + 0.1 * jax.random.normal(kk, shape, jnp.float32)
        else:
            params[name] = 0.1 * jax.random.normal(kk, shape, jnp.float32)
    return params


def pack_params(raw, batch, ydim, xdim, k=3):
    # One-time packing into matmul-ready form (done outside the forward jit).
    def pack_conv(w):        # nn.Conv2d (Cout, Cin, kh, kw) -> (Cout, kh*kw*Cin)
        co, ci, kh, kw = w.shape
        return jnp.transpose(w, (0, 2, 3, 1)).reshape(co, kh * kw * ci)

    def pack_convT(wt):      # nn.ConvTranspose2d (Cin, Cout, kh, kw)
        ci, co, kh, kw = wt.shape
        wf = wt[:, :, ::-1, ::-1]                 # spatial flip
        return jnp.transpose(wf, (1, 2, 3, 0)).reshape(co, kh * kw * ci)

    def col(v):
        return v.reshape(-1, 1)

    p = {}

    def add_bn_conv(dst, wsrc, gsrc, bsrc, packer):
        p[dst + '_w'] = packer(raw[wsrc])
        p[dst + '_g'] = col(raw[gsrc])
        p[dst + '_b'] = col(raw[bsrc])

    add_bn_conv('enc1c1', 'enc1_w1', 'enc1_g1', 'enc1_b1', pack_conv)
    add_bn_conv('enc1c2', 'enc1_w2', 'enc1_g2', 'enc1_b2', pack_conv)
    add_bn_conv('enc2c1', 'enc2_w1', 'enc2_g1', 'enc2_b1', pack_conv)
    add_bn_conv('enc2c2', 'enc2_w2', 'enc2_g2', 'enc2_b2', pack_conv)
    add_bn_conv('botc1', 'bot_w1', 'bot_g1', 'bot_b1', pack_conv)
    add_bn_conv('botc2', 'bot_w2', 'bot_g2', 'bot_b2', pack_conv)
    add_bn_conv('dec2c1', 'dec2_w1', 'dec2_g1', 'dec2_b1', pack_convT)
    add_bn_conv('dec2c2', 'dec2_w2', 'dec2_g2', 'dec2_b2', pack_convT)
    add_bn_conv('dec1c1', 'dec1_w1', 'dec1_g1', 'dec1_b1', pack_convT)
    add_bn_conv('dec1c2', 'dec1_w2', 'dec1_g2', 'dec1_b2', pack_convT)
    p['upconv2_w'] = pack_conv(raw['upconv2_w'])
    p['upconv2_b'] = col(raw['upconv2_b'])
    p['upconv1_w'] = pack_conv(raw['upconv1_w'])
    p['upconv1_b'] = col(raw['upconv1_b'])
    oc, f = raw['conv_w'].shape[0], raw['conv_w'].shape[1]
    p['conv_w'] = raw['conv_w'].reshape(oc, f)
    p['conv_b'] = col(raw['conv_b'])

    # Bilinear upsample operators, folded into the producing conv kernels.
    h_e1 = ydim - 2 * (k - 1)
    h_e2 = h_e1 // 2 - 2 * (k - 1)
    w_e2 = xdim // 2
    h_bot = h_e2 // 2 - 2 * (k - 1)                 # bottleneck conv output H
    w_bot = w_e2 // 2
    h_up2, w_up2 = int(ydim / 2 - (k - 1) * 2), int(xdim / 2)
    h_d2 = h_up2 + (k - 1)                          # dec2 conv2 output H
    w_d2 = w_up2
    h_up1, w_up1 = int(ydim - (k - 1)), int(xdim)
    p['up2_rt'] = resize_rt(batch, h_bot, w_bot, h_up2, w_up2)   # (16, 224)
    p['up1_rt'] = resize_rt(batch, h_d2, w_d2, h_up1, w_up1)     # (256, 1088)
    return p


# --------------------------------- main --------------------------------------

if __name__ == "__main__":
    key = jax.random.PRNGKey(0)
    kx, kp = jax.random.split(key)

    in_channels, out_channels, kern_size = 4, 2, 3
    batch, ydim, xdim = 2, 36, 16   # sizes chosen so all pools/upsamples divide

    x = jax.random.normal(kx, (batch, in_channels, ydim, xdim), jnp.float32)
    raw = init_raw_params(kp, in_channels, out_channels, kern_size)
    params = pack_params(raw, batch, ydim, xdim, kern_size)

    fwd = jax.jit(partial(unet_forward, k=kern_size))
    out = jax.block_until_ready(fwd(x, params))

    assert out.shape == (batch, out_channels, ydim, xdim), out.shape
    assert bool(jnp.all(jnp.isfinite(out)))
    print("KERNEL_OK")
</pallas_src>

<mosaic_0001>
module attributes {stable_mosaic.version = 11 : i64} {
  func.func @_conv_bn_relu_kernel(%arg0: memref<36x1088xf32, #tpu.memory_space<vmem>>, %arg1: memref<4x36xf32, #tpu.memory_space<vmem>>, %arg2: memref<4x1xf32, #tpu.memory_space<vmem>>, %arg3: memref<4x1xf32, #tpu.memory_space<vmem>>, %arg4: memref<4x1088xf32, #tpu.memory_space<vmem>>) attributes {dimension_semantics = [], scalar_prefetch = 0 : i64, scratch_operands = 0 : i64, tpu.core_type = #tpu.core_type<tc>} {
    %c0 = arith.constant 0 : index
    %c0_0 = arith.constant 0 : index
    %0 = vector.load %arg1[%c0, %c0_0] : memref<4x36xf32, #tpu.memory_space<vmem>>, vector<4x36xf32>
    %c0_1 = arith.constant 0 : index
    %c0_2 = arith.constant 0 : index
    %1 = vector.load %arg0[%c0_1, %c0_2] : memref<36x1088xf32, #tpu.memory_space<vmem>>, vector<36x1088xf32>
    %cst = arith.constant dense<0.000000e+00> : vector<4x1088xf32>
    %2 = tpu.matmul %0, %1, %cst {dimension_numbers = #tpu.dot_dimension_numbers<[1], [0], [0], [1], [0, 0, 1, 1], [], []>} : vector<4x36xf32>, vector<36x1088xf32>, vector<4x1088xf32> -> vector<4x1088xf32>
    %c0_3 = arith.constant 0 : index
    %c0_4 = arith.constant 0 : index
    %3 = vector.load %arg2[%c0_3, %c0_4] : memref<4x1xf32, #tpu.memory_space<vmem>>, vector<4x1xf32>
    %c0_5 = arith.constant 0 : index
    %c0_6 = arith.constant 0 : index
    %4 = vector.load %arg3[%c0_5, %c0_6] : memref<4x1xf32, #tpu.memory_space<vmem>>, vector<4x1xf32>
    %cst_7 = arith.constant dense<0.000000e+00> : vector<4xf32>
    %5 = vector.multi_reduction <add>, %2, %cst_7 [1] : vector<4x1088xf32> to vector<4xf32>
    %6 = vector.shape_cast %5 : vector<4xf32> to vector<4x1xf32>
    %cst_8 = arith.constant 1.088000e+03 : f32
    %7 = vector.broadcast %cst_8 : f32 to vector<4x1xf32>
    %8 = arith.divf %6, %7 : vector<4x1xf32>
    %9 = vector.broadcast %8 : vector<4x1xf32> to vector<4x1088xf32>
    %10 = arith.subf %2, %9 : vector<4x1088xf32>
    %11 = arith.mulf %10, %10 : vector<4x1088xf32>
    %cst_9 = arith.constant dense<0.000000e+00> : vector<4xf32>
    %12 = vector.multi_reduction <add>, %11, %cst_9 [1] : vector<4x1088xf32> to vector<4xf32>
    %13 = vector.shape_cast %12 : vector<4xf32> to vector<4x1xf32>
    %cst_10 = arith.constant 1.088000e+03 : f32
    %14 = vector.broadcast %cst_10 : f32 to vector<4x1xf32>
    %15 = arith.divf %13, %14 : vector<4x1xf32>
    %16 = vector.broadcast %8 : vector<4x1xf32> to vector<4x1088xf32>
    %17 = arith.subf %2, %16 : vector<4x1088xf32>
    %cst_11 = arith.constant 9.99999974E-6 : f32
    %18 = vector.broadcast %cst_11 : f32 to vector<4x1xf32>
    %19 = arith.addf %15, %18 : vector<4x1xf32>
    %20 = math.rsqrt %19 : vector<4x1xf32>
    %21 = vector.broadcast %20 : vector<4x1xf32> to vector<4x1088xf32>
    %22 = arith.mulf %17, %21 : vector<4x1088xf32>
    %23 = vector.broadcast %3 : vector<4x1xf32> to vector<4x1088xf32>
    %24 = arith.mulf %22, %23 : vector<4x1088xf32>
    %25 = vector.broadcast %4 : vector<4x1xf32> to vector<4x1088xf32>
    %26 = arith.addf %24, %25 : vector<4x1088xf32>
    %cst_12 = arith.constant 0.000000e+00 : f32
    %27 = vector.broadcast %cst_12 : f32 to vector<4x1088xf32>
    %28 = arith.maximumf %26, %27 : vector<4x1088xf32>
    %c0_13 = arith.constant 0 : index
    %c0_14 = arith.constant 0 : index
    %29 = vector.load %arg4[%c0_13, %c0_14] : memref<4x1088xf32, #tpu.memory_space<vmem>>, vector<4x1088xf32>
    tpu.vector_store %arg4[%c0_13, %c0_14], %28 {strides = array<i32>} : memref<4x1088xf32, #tpu.memory_space<vmem>>, vector<4x1088xf32>,
    return
  }
}

module attributes {stable_mosaic.version = 11 : i64} {
  func.func @_conv_bn_relu_kernel(%arg0: memref<36x1024xf32, #tpu.memory_space<vmem>>, %arg1: memref<4x36xf32, #tpu.memory_space<vmem>>, %arg2: memref<4x1xf32, #tpu.memory_space<vmem>>, %arg3: memref<4x1xf32, #tpu.memory_space<vmem>>, %arg4: memref<4x1024xf32, #tpu.memory_space<vmem>>) attributes {dimension_semantics = [], scalar_prefetch = 0 : i64, scratch_operands = 0 : i64, tpu.core_type = #tpu.core_type<tc>} {
    %c0 = arith.constant 0 : index
    %c0_0 = arith.constant 0 : index
    %0 = vector.load %arg1[%c0, %c0_0] : memref<4x36xf32, #tpu.memory_space<vmem>>, vector<4x36xf32>
    %c0_1 = arith.constant 0 : index
    %c0_2 = arith.constant 0 : index
    %1 = vector.load %arg0[%c0_1, %c0_2] : memref<36x1024xf32, #tpu.memory_space<vmem>>, vector<36x1024xf32>
    %cst = arith.constant dense<0.000000e+00> : vector<4x1024xf32>
    %2 = tpu.matmul %0, %1, %cst {dimension_numbers = #tpu.dot_dimension_numbers<[1], [0], [0], [1], [0, 0, 1, 1], [], []>} : vector<4x36xf32>, vector<36x1024xf32>, vector<4x1024xf32> -> vector<4x1024xf32>
    %c0_3 = arith.constant 0 : index
    %c0_4 = arith.constant 0 : index
    %3 = vector.load %arg2[%c0_3, %c0_4] : memref<4x1xf32, #tpu.memory_space<vmem>>, vector<4x1xf32>
    %c0_5 = arith.constant 0 : index
    %c0_6 = arith.constant 0 : index
    %4 = vector.load %arg3[%c0_5, %c0_6] : memref<4x1xf32, #tpu.memory_space<vmem>>, vector<4x1xf32>
    %cst_7 = arith.constant dense<0.000000e+00> : vector<4xf32>
    %5 = vector.multi_reduction <add>, %2, %cst_7 [1] : vector<4x1024xf32> to vector<4xf32>
    %6 = vector.shape_cast %5 : vector<4xf32> to vector<4x1xf32>
    %cst_8 = arith.constant 1.024000e+03 : f32
    %7 = vector.broadcast %cst_8 : f32 to vector<4x1xf32>
    %8 = arith.divf %6, %7 : vector<4x1xf32>
    %9 = vector.broadcast %8 : vector<4x1xf32> to vector<4x1024xf32>
    %10 = arith.subf %2, %9 : vector<4x1024xf32>
    %11 = arith.mulf %10, %10 : vector<4x1024xf32>
    %cst_9 = arith.constant dense<0.000000e+00> : vector<4xf32>
    %12 = vector.multi_reduction <add>, %11, %cst_9 [1] : vector<4x1024xf32> to vector<4xf32>
    %13 = vector.shape_cast %12 : vector<4xf32> to vector<4x1xf32>
    %cst_10 = arith.constant 1.024000e+03 : f32
    %14 = vector.broadcast %cst_10 : f32 to vector<4x1xf32>
    %15 = arith.divf %13, %14 : vector<4x1xf32>
    %16 = vector.broadcast %8 : vector<4x1xf32> to vector<4x1024xf32>
    %17 = arith.subf %2, %16 : vector<4x1024xf32>
    %cst_11 = arith.constant 9.99999974E-6 : f32
    %18 = vector.broadcast %cst_11 : f32 to vector<4x1xf32>
    %19 = arith.addf %15, %18 : vector<4x1xf32>
    %20 = math.rsqrt %19 : vector<4x1xf32>
    %21 = vector.broadcast %20 : vector<4x1xf32> to vector<4x1024xf32>
    %22 = arith.mulf %17, %21 : vector<4x1024xf32>
    %23 = vector.broadcast %3 : vector<4x1xf32> to vector<4x1024xf32>
    %24 = arith.mulf %22, %23 : vector<4x1024xf32>
    %25 = vector.broadcast %4 : vector<4x1xf32> to vector<4x1024xf32>
    %26 = arith.addf %24, %25 : vector<4x1024xf32>
    %cst_12 = arith.constant 0.000000e+00 : f32
    %27 = vector.broadcast %cst_12 : f32 to vector<4x1024xf32>
    %28 = arith.maximumf %26, %27 : vector<4x1024xf32>
    %c0_13 = arith.constant 0 : index
    %c0_14 = arith.constant 0 : index
    %29 = vector.load %arg4[%c0_13, %c0_14] : memref<4x1024xf32, #tpu.memory_space<vmem>>, vector<4x1024xf32>
    tpu.vector_store %arg4[%c0_13, %c0_14], %28 {strides = array<i32>} : memref<4x1024xf32, #tpu.memory_space<vmem>>, vector<4x1024xf32>,
    return
  }
}

module attributes {stable_mosaic.version = 11 : i64} {
  func.func @_conv_bn_relu_kernel(%arg0: memref<36x224xf32, #tpu.memory_space<vmem>>, %arg1: memref<8x36xf32, #tpu.memory_space<vmem>>, %arg2: memref<8x1xf32, #tpu.memory_space<vmem>>, %arg3: memref<8x1xf32, #tpu.memory_space<vmem>>, %arg4: memref<8x224xf32, #tpu.memory_space<vmem>>) attributes {dimension_semantics = [], scalar_prefetch = 0 : i64, scratch_operands = 0 : i64, tpu.core_type = #tpu.core_type<tc>} {
    %c0 = arith.constant 0 : index
    %c0_0 = arith.constant 0 : index
    %0 = vector.load %arg1[%c0, %c0_0] : memref<8x36xf32, #tpu.memory_space<vmem>>, vector<8x36xf32>
    %c0_1 = arith.constant 0 : index
    %c0_2 = arith.constant 0 : index
    %1 = vector.load %arg0[%c0_1, %c0_2] : memref<36x224xf32, #tpu.memory_space<vmem>>, vector<36x224xf32>
    %cst = arith.constant dense<0.000000e+00> : vector<8x224xf32>
    %2 = tpu.matmul %0, %1, %cst {dimension_numbers = #tpu.dot_dimension_numbers<[1], [0], [0], [1], [0, 0, 1, 1], [], []>} : vector<8x36xf32>, vector<36x224xf32>, vector<8x224xf32> -> vector<8x224xf32>
    %c0_3 = arith.constant 0 : index
    %c0_4 = arith.constant 0 : index
    %3 = vector.load %arg2[%c0_3, %c0_4] : memref<8x1xf32, #tpu.memory_space<vmem>>, vector<8x1xf32>
    %c0_5 = arith.constant 0 : index
    %c0_6 = arith.constant 0 : index
    %4 = vector.load %arg3[%c0_5, %c0_6] : memref<8x1xf32, #tpu.memory_space<vmem>>, vector<8x1xf32>
    %cst_7 = arith.constant dense<0.000000e+00> : vector<8xf32>
    %5 = vector.multi_reduction <add>, %2, %cst_7 [1] : vector<8x224xf32> to vector<8xf32>
    %6 = vector.shape_cast %5 : vector<8xf32> to vector<8x1xf32>
    %cst_8 = arith.constant 2.240000e+02 : f32
    %7 = vector.broadcast %cst_8 : f32 to vector<8x1xf32>
    %8 = arith.divf %6, %7 : vector<8x1xf32>
    %9 = vector.broadcast %8 : vector<8x1xf32> to vector<8x224xf32>
    %10 = arith.subf %2, %9 : vector<8x224xf32>
    %11 = arith.mulf %10, %10 : vector<8x224xf32>
    %cst_9 = arith.constant dense<0.000000e+00> : vector<8xf32>
    %12 = vector.multi_reduction <add>, %11, %cst_9 [1] : vector<8x224xf32> to vector<8xf32>
    %13 = vector.shape_cast %12 : vector<8xf32> to vector<8x1xf32>
    %cst_10 = arith.constant 2.240000e+02 : f32
    %14 = vector.broadcast %cst_10 : f32 to vector<8x1xf32>
    %15 = arith.divf %13, %14 : vector<8x1xf32>
    %16 = vector.broadcast %8 : vector<8x1xf32> to vector<8x224xf32>
    %17 = arith.subf %2, %16 : vector<8x224xf32>
    %cst_11 = arith.constant 9.99999974E-6 : f32
    %18 = vector.broadcast %cst_11 : f32 to vector<8x1xf32>
    %19 = arith.addf %15, %18 : vector<8x1xf32>
    %20 = math.rsqrt %19 : vector<8x1xf32>
    %21 = vector.broadcast %20 : vector<8x1xf32> to vector<8x224xf32>
    %22 = arith.mulf %17, %21 : vector<8x224xf32>
    %23 = vector.broadcast %3 : vector<8x1xf32> to vector<8x224xf32>
    %24 = arith.mulf %22, %23 : vector<8x224xf32>
    %25 = vector.broadcast %4 : vector<8x1xf32> to vector<8x224xf32>
    %26 = arith.addf %24, %25 : vector<8x224xf32>
    %cst_12 = arith.constant 0.000000e+00 : f32
    %27 = vector.broadcast %cst_12 : f32 to vector<8x224xf32>
    %28 = arith.maximumf %26, %27 : vector<8x224xf32>
    %c0_13 = arith.constant 0 : index
    %c0_14 = arith.constant 0 : index
    %29 = vector.load %arg4[%c0_13, %c0_14] : memref<8x224xf32, #tpu.memory_space<vmem>>, vector<8x224xf32>
    tpu.vector_store %arg4[%c0_13, %c0_14], %28 {strides = array<i32>} : memref<8x224xf32, #tpu.memory_space<vmem>>, vector<8x224xf32>,
    return
  }
}

module attributes {stable_mosaic.version = 11 : i64} {
  func.func @_conv_bn_relu_kernel(%arg0: memref<72x192xf32, #tpu.memory_space<vmem>>, %arg1: memref<8x72xf32, #tpu.memory_space<vmem>>, %arg2: memref<8x1xf32, #tpu.memory_space<vmem>>, %arg3: memref<8x1xf32, #tpu.memory_space<vmem>>, %arg4: memref<8x192xf32, #tpu.memory_space<vmem>>) attributes {dimension_semantics = [], scalar_prefetch = 0 : i64, scratch_operands = 0 : i64, tpu.core_type = #tpu.core_type<tc>} {
    %c0 = arith.constant 0 : index
    %c0_0 = arith.constant 0 : index
    %0 = vector.load %arg1[%c0, %c0_0] : memref<8x72xf32, #tpu.memory_space<vmem>>, vector<8x72xf32>
    %c0_1 = arith.constant 0 : index
    %c0_2 = arith.constant 0 : index
    %1 = vector.load %arg0[%c0_1, %c0_2] : memref<72x192xf32, #tpu.memory_space<vmem>>, vector<72x192xf32>
    %cst = arith.constant dense<0.000000e+00> : vector<8x192xf32>
    %2 = tpu.matmul %0, %1, %cst {dimension_numbers = #tpu.dot_dimension_numbers<[1], [0], [0], [1], [0, 0, 1, 1], [], []>} : vector<8x72xf32>, vector<72x192xf32>, vector<8x192xf32> -> vector<8x192xf32>
    %c0_3 = arith.constant 0 : index
    %c0_4 = arith.constant 0 : index
    %3 = vector.load %arg2[%c0_3, %c0_4] : memref<8x1xf32, #tpu.memory_space<vmem>>, vector<8x1xf32>
    %c0_5 = arith.constant 0 : index
    %c0_6 = arith.constant 0 : index
    %4 = vector.load %arg3[%c0_5, %c0_6] : memref<8x1xf32, #tpu.memory_space<vmem>>, vector<8x1xf32>
    %cst_7 = arith.constant dense<0.000000e+00> : vector<8xf32>
    %5 = vector.multi_reduction <add>, %2, %cst_7 [1] : vector<8x192xf32> to vector<8xf32>
    %6 = vector.shape_cast %5 : vector<8xf32> to vector<8x1xf32>
    %cst_8 = arith.constant 1.920000e+02 : f32
    %7 = vector.broadcast %cst_8 : f32 to vector<8x1xf32>
    %8 = arith.divf %6, %7 : vector<8x1xf32>
    %9 = vector.broadcast %8 : vector<8x1xf32> to vector<8x192xf32>
    %10 = arith.subf %2, %9 : vector<8x192xf32>
    %11 = arith.mulf %10, %10 : vector<8x192xf32>
    %cst_9 = arith.constant dense<0.000000e+00> : vector<8xf32>
    %12 = vector.multi_reduction <add>, %11, %cst_9 [1] : vector<8x192xf32> to vector<8xf32>
    %13 = vector.shape_cast %12 : vector<8xf32> to vector<8x1xf32>
    %cst_10 = arith.constant 1.920000e+02 : f32
    %14 = vector.broadcast %cst_10 : f32 to vector<8x1xf32>
    %15 = arith.divf %13, %14 : vector<8x1xf32>
    %16 = vector.broadcast %8 : vector<8x1xf32> to vector<8x192xf32>
    %17 = arith.subf %2, %16 : vector<8x192xf32>
    %cst_11 = arith.constant 9.99999974E-6 : f32
    %18 = vector.broadcast %cst_11 : f32 to vector<8x1xf32>
    %19 = arith.addf %15, %18 : vector<8x1xf32>
    %20 = math.rsqrt %19 : vector<8x1xf32>
    %21 = vector.broadcast %20 : vector<8x1xf32> to vector<8x192xf32>
    %22 = arith.mulf %17, %21 : vector<8x192xf32>
    %23 = vector.broadcast %3 : vector<8x1xf32> to vector<8x192xf32>
    %24 = arith.mulf %22, %23 : vector<8x192xf32>
    %25 = vector.broadcast %4 : vector<8x1xf32> to vector<8x192xf32>
    %26 = arith.addf %24, %25 : vector<8x192xf32>
    %cst_12 = arith.constant 0.000000e+00 : f32
    %27 = vector.broadcast %cst_12 : f32 to vector<8x192xf32>
    %28 = arith.maximumf %26, %27 : vector<8x192xf32>
    %c0_13 = arith.constant 0 : index
    %c0_14 = arith.constant 0 : index
    %29 = vector.load %arg4[%c0_13, %c0_14] : memref<8x192xf32, #tpu.memory_space<vmem>>, vector<8x192xf32>
    tpu.vector_store %arg4[%c0_13, %c0_14], %28 {strides = array<i32>} : memref<8x192xf32, #tpu.memory_space<vmem>>, vector<8x192xf32>,
    return
  }
}

module attributes {stable_mosaic.version = 11 : i64} {
  func.func @_conv_bn_relu_kernel(%arg0: memref<72x32xf32, #tpu.memory_space<vmem>>, %arg1: memref<16x72xf32, #tpu.memory_space<vmem>>, %arg2: memref<16x1xf32, #tpu.memory_space<vmem>>, %arg3: memref<16x1xf32, #tpu.memory_space<vmem>>, %arg4: memref<16x32xf32, #tpu.memory_space<vmem>>) attributes {dimension_semantics = [], scalar_prefetch = 0 : i64, scratch_operands = 0 : i64, tpu.core_type = #tpu.core_type<tc>} {
    %c0 = arith.constant 0 : index
    %c0_0 = arith.constant 0 : index
    %0 = vector.load %arg1[%c0, %c0_0] : memref<16x72xf32, #tpu.memory_space<vmem>>, vector<16x72xf32>
    %c0_1 = arith.constant 0 : index
    %c0_2 = arith.constant 0 : index
    %1 = vector.load %arg0[%c0_1, %c0_2] : memref<72x32xf32, #tpu.memory_space<vmem>>, vector<72x32xf32>
    %cst = arith.constant dense<0.000000e+00> : vector<16x32xf32>
    %2 = tpu.matmul %0, %1, %cst {dimension_numbers = #tpu.dot_dimension_numbers<[1], [0], [0], [1], [0, 0, 1, 1], [], []>} : vector<16x72xf32>, vector<72x32xf32>, vector<16x32xf32> -> vector<16x32xf32>
    %c0_3 = arith.constant 0 : index
    %c0_4 = arith.constant 0 : index
    %3 = vector.load %arg2[%c0_3, %c0_4] : memref<16x1xf32, #tpu.memory_space<vmem>>, vector<16x1xf32>
    %c0_5 = arith.constant 0 : index
    %c0_6 = arith.constant 0 : index
    %4 = vector.load %arg3[%c0_5, %c0_6] : memref<16x1xf32, #tpu.memory_space<vmem>>, vector<16x1xf32>
    %cst_7 = arith.constant dense<0.000000e+00> : vector<16xf32>
    %5 = vector.multi_reduction <add>, %2, %cst_7 [1] : vector<16x32xf32> to vector<16xf32>
    %6 = vector.shape_cast %5 : vector<16xf32> to vector<16x1xf32>
    %cst_8 = arith.constant 3.200000e+01 : f32
    %7 = vector.broadcast %cst_8 : f32 to vector<16x1xf32>
    %8 = arith.divf %6, %7 : vector<16x1xf32>
    %9 = vector.broadcast %8 : vector<16x1xf32> to vector<16x32xf32>
    %10 = arith.subf %2, %9 : vector<16x32xf32>
    %11 = arith.mulf %10, %10 : vector<16x32xf32>
    %cst_9 = arith.constant dense<0.000000e+00> : vector<16xf32>
    %12 = vector.multi_reduction <add>, %11, %cst_9 [1] : vector<16x32xf32> to vector<16xf32>
    %13 = vector.shape_cast %12 : vector<16xf32> to vector<16x1xf32>
    %cst_10 = arith.constant 3.200000e+01 : f32
    %14 = vector.broadcast %cst_10 : f32 to vector<16x1xf32>
    %15 = arith.divf %13, %14 : vector<16x1xf32>
    %16 = vector.broadcast %8 : vector<16x1xf32> to vector<16x32xf32>
    %17 = arith.subf %2, %16 : vector<16x32xf32>
    %cst_11 = arith.constant 9.99999974E-6 : f32
    %18 = vector.broadcast %cst_11 : f32 to vector<16x1xf32>
    %19 = arith.addf %15, %18 : vector<16x1xf32>
    %20 = math.rsqrt %19 : vector<16x1xf32>
    %21 = vector.broadcast %20 : vector<16x1xf32> to vector<16x32xf32>
    %22 = arith.mulf %17, %21 : vector<16x32xf32>
    %23 = vector.broadcast %3 : vector<16x1xf32> to vector<16x32xf32>
    %24 = arith.mulf %22, %23 : vector<16x32xf32>
    %25 = vector.broadcast %4 : vector<16x1xf32> to vector<16x32xf32>
    %26 = arith.addf %24, %25 : vector<16x32xf32>
    %cst_12 = arith.constant 0.000000e+00 : f32
    %27 = vector.broadcast %cst_12 : f32 to vector<16x32xf32>
    %28 = arith.maximumf %26, %27 : vector<16x32xf32>
    %c0_13 = arith.constant 0 : index
    %c0_14 = arith.constant 0 : index
    %29 = vector.load %arg4[%c0_13, %c0_14] : memref<16x32xf32, #tpu.memory_space<vmem>>, vector<16x32xf32>
    tpu.vector_store %arg4[%c0_13, %c0_14], %28 {strides = array<i32>} : memref<16x32xf32, #tpu.memory_space<vmem>>, vector<16x32xf32>,
    return
  }
}

module attributes {stable_mosaic.version = 11 : i64} {
  func.func @_conv_bn_relu_resize_kernel(%arg0: memref<144x16xf32, #tpu.memory_space<vmem>>, %arg1: memref<16x144xf32, #tpu.memory_space<vmem>>, %arg2: memref<16x1xf32, #tpu.memory_space<vmem>>, %arg3: memref<16x1xf32, #tpu.memory_space<vmem>>, %arg4: memref<16x224xf32, #tpu.memory_space<vmem>>, %arg5: memref<16x224xf32, #tpu.memory_space<vmem>>) attributes {dimension_semantics = [], scalar_prefetch = 0 : i64, scratch_operands = 0 : i64, tpu.core_type = #tpu.core_type<tc>} {
    %c0 = arith.constant 0 : index
    %c0_0 = arith.constant 0 : index
    %0 = vector.load %arg1[%c0, %c0_0] : memref<16x144xf32, #tpu.memory_space<vmem>>, vector<16x144xf32>
    %c0_1 = arith.constant 0 : index
    %c0_2 = arith.constant 0 : index
    %1 = vector.load %arg0[%c0_1, %c0_2] : memref<144x16xf32, #tpu.memory_space<vmem>>, vector<144x16xf32>
    %cst = arith.constant dense<0.000000e+00> : vector<16x16xf32>
    %2 = tpu.matmul %0, %1, %cst {dimension_numbers = #tpu.dot_dimension_numbers<[1], [0], [0], [1], [0, 0, 1, 1], [], []>} : vector<16x144xf32>, vector<144x16xf32>, vector<16x16xf32> -> vector<16x16xf32>
    %c0_3 = arith.constant 0 : index
    %c0_4 = arith.constant 0 : index
    %3 = vector.load %arg2[%c0_3, %c0_4] : memref<16x1xf32, #tpu.memory_space<vmem>>, vector<16x1xf32>
    %c0_5 = arith.constant 0 : index
    %c0_6 = arith.constant 0 : index
    %4 = vector.load %arg3[%c0_5, %c0_6] : memref<16x1xf32, #tpu.memory_space<vmem>>, vector<16x1xf32>
    %cst_7 = arith.constant dense<0.000000e+00> : vector<16xf32>
    %5 = vector.multi_reduction <add>, %2, %cst_7 [1] : vector<16x16xf32> to vector<16xf32>
    %6 = vector.shape_cast %5 : vector<16xf32> to vector<16x1xf32>
    %cst_8 = arith.constant 1.600000e+01 : f32
    %7 = vector.broadcast %cst_8 : f32 to vector<16x1xf32>
    %8 = arith.divf %6, %7 : vector<16x1xf32>
    %9 = vector.broadcast %8 : vector<16x1xf32> to vector<16x16xf32>
    %10 = arith.subf %2, %9 : vector<16x16xf32>
    %11 = arith.mulf %10, %10 : vector<16x16xf32>
    %cst_9 = arith.constant dense<0.000000e+00> : vector<16xf32>
    %12 = vector.multi_reduction <add>, %11, %cst_9 [1] : vector<16x16xf32> to vector<16xf32>
    %13 = vector.shape_cast %12 : vector<16xf32> to vector<16x1xf32>
    %cst_10 = arith.constant 1.600000e+01 : f32
    %14 = vector.broadcast %cst_10 : f32 to vector<16x1xf32>
    %15 = arith.divf %13, %14 : vector<16x1xf32>
    %16 = vector.broadcast %8 : vector<16x1xf32> to vector<16x16xf32>
    %17 = arith.subf %2, %16 : vector<16x16xf32>
    %cst_11 = arith.constant 9.99999974E-6 : f32
    %18 = vector.broadcast %cst_11 : f32 to vector<16x1xf32>
    %19 = arith.addf %15, %18 : vector<16x1xf32>
    %20 = math.rsqrt %19 : vector<16x1xf32>
    %21 = vector.broadcast %20 : vector<16x1xf32> to vector<16x16xf32>
    %22 = arith.mulf %17, %21 : vector<16x16xf32>
    %23 = vector.broadcast %3 : vector<16x1xf32> to vector<16x16xf32>
    %24 = arith.mulf %22, %23 : vector<16x16xf32>
    %25 = vector.broadcast %4 : vector<16x1xf32> to vector<16x16xf32>
    %26 = arith.addf %24, %25 : vector<16x16xf32>
    %cst_12 = arith.constant 0.000000e+00 : f32
    %27 = vector.broadcast %cst_12 : f32 to vector<16x16xf32>
    %28 = arith.maximumf %26, %27 : vector<16x16xf32>
    %c0_13 = arith.constant 0 : index
    %c0_14 = arith.constant 0 : index
    %29 = vector.load %arg4[%c0_13, %c0_14] : memref<16x224xf32, #tpu.memory_space<vmem>>, vector<16x224xf32>
    %cst_15 = arith.constant dense<0.000000e+00> : vector<16x224xf32>
    %30 = tpu.matmul %28, %29, %cst_15 {dimension_numbers = #tpu.dot_dimension_numbers<[1], [0], [0], [1], [0, 0, 1, 1], [], []>} : vector<16x16xf32>, vector<16x224xf32>, vector<16x224xf32> -> vector<16x224xf32>
    %c0_16 = arith.constant 0 : index
    %c0_17 = arith.constant 0 : index
    %31 = vector.load %arg5[%c0_16, %c0_17] : memref<16x224xf32, #tpu.memory_space<vmem>>, vector<16x224xf32>
    tpu.vector_store %arg5[%c0_16, %c0_17], %30 {strides = array<i32>} : memref<16x224xf32, #tpu.memory_space<vmem>>, vector<16x224xf32>,
    return
  }
}

module attributes {stable_mosaic.version = 11 : i64} {
  func.func @_conv_bias_kernel(%arg0: memref<144x192xf32, #tpu.memory_space<vmem>>, %arg1: memref<8x144xf32, #tpu.memory_space<vmem>>, %arg2: memref<8x1xf32, #tpu.memory_space<vmem>>, %arg3: memref<8x192xf32, #tpu.memory_space<vmem>>) attributes {dimension_semantics = [], scalar_prefetch = 0 : i64, scratch_operands = 0 : i64, tpu.core_type = #tpu.core_type<tc>} {
    %c0 = arith.constant 0 : index
    %c0_0 = arith.constant 0 : index
    %0 = vector.load %arg1[%c0, %c0_0] : memref<8x144xf32, #tpu.memory_space<vmem>>, vector<8x144xf32>
    %c0_1 = arith.constant 0 : index
    %c0_2 = arith.constant 0 : index
    %1 = vector.load %arg0[%c0_1, %c0_2] : memref<144x192xf32, #tpu.memory_space<vmem>>, vector<144x192xf32>
    %cst = arith.constant dense<0.000000e+00> : vector<8x192xf32>
    %2 = tpu.matmul %0, %1, %cst {dimension_numbers = #tpu.dot_dimension_numbers<[1], [0], [0], [1], [0, 0, 1, 1], [], []>} : vector<8x144xf32>, vector<144x192xf32>, vector<8x192xf32> -> vector<8x192xf32>
    %c0_3 = arith.constant 0 : index
    %c0_4 = arith.constant 0 : index
    %3 = vector.load %arg2[%c0_3, %c0_4] : memref<8x1xf32, #tpu.memory_space<vmem>>, vector<8x1xf32>
    %4 = vector.broadcast %3 : vector<8x1xf32> to vector<8x192xf32>
    %5 = arith.addf %2, %4 : vector<8x192xf32>
    %c0_5 = arith.constant 0 : index
    %c0_6 = arith.constant 0 : index
    %6 = vector.load %arg3[%c0_5, %c0_6] : memref<8x192xf32, #tpu.memory_space<vmem>>, vector<8x192xf32>
    tpu.vector_store %arg3[%c0_5, %c0_6], %5 {strides = array<i32>} : memref<8x192xf32, #tpu.memory_space<vmem>>, vector<8x192xf32>,
    return
  }
}

module attributes {stable_mosaic.version = 11 : i64} {
  func.func @_conv_bn_relu_kernel(%arg0: memref<144x224xf32, #tpu.memory_space<vmem>>, %arg1: memref<8x144xf32, #tpu.memory_space<vmem>>, %arg2: memref<8x1xf32, #tpu.memory_space<vmem>>, %arg3: memref<8x1xf32, #tpu.memory_space<vmem>>, %arg4: memref<8x224xf32, #tpu.memory_space<vmem>>) attributes {dimension_semantics = [], scalar_prefetch = 0 : i64, scratch_operands = 0 : i64, tpu.core_type = #tpu.core_type<tc>} {
    %c0 = arith.constant 0 : index
    %c0_0 = arith.constant 0 : index
    %0 = vector.load %arg1[%c0, %c0_0] : memref<8x144xf32, #tpu.memory_space<vmem>>, vector<8x144xf32>
    %c0_1 = arith.constant 0 : index
    %c0_2 = arith.constant 0 : index
    %1 = vector.load %arg0[%c0_1, %c0_2] : memref<144x224xf32, #tpu.memory_space<vmem>>, vector<144x224xf32>
    %cst = arith.constant dense<0.000000e+00> : vector<8x224xf32>
    %2 = tpu.matmul %0, %1, %cst {dimension_numbers = #tpu.dot_dimension_numbers<[1], [0], [0], [1], [0, 0, 1, 1], [], []>} : vector<8x144xf32>, vector<144x224xf32>, vector<8x224xf32> -> vector<8x224xf32>
    %c0_3 = arith.constant 0 : index
    %c0_4 = arith.constant 0 : index
    %3 = vector.load %arg2[%c0_3, %c0_4] : memref<8x1xf32, #tpu.memory_space<vmem>>, vector<8x1xf32>
    %c0_5 = arith.constant 0 : index
    %c0_6 = arith.constant 0 : index
    %4 = vector.load %arg3[%c0_5, %c0_6] : memref<8x1xf32, #tpu.memory_space<vmem>>, vector<8x1xf32>
    %cst_7 = arith.constant dense<0.000000e+00> : vector<8xf32>
    %5 = vector.multi_reduction <add>, %2, %cst_7 [1] : vector<8x224xf32> to vector<8xf32>
    %6 = vector.shape_cast %5 : vector<8xf32> to vector<8x1xf32>
    %cst_8 = arith.constant 2.240000e+02 : f32
    %7 = vector.broadcast %cst_8 : f32 to vector<8x1xf32>
    %8 = arith.divf %6, %7 : vector<8x1xf32>
    %9 = vector.broadcast %8 : vector<8x1xf32> to vector<8x224xf32>
    %10 = arith.subf %2, %9 : vector<8x224xf32>
    %11 = arith.mulf %10, %10 : vector<8x224xf32>
    %cst_9 = arith.constant dense<0.000000e+00> : vector<8xf32>
    %12 = vector.multi_reduction <add>, %11, %cst_9 [1] : vector<8x224xf32> to vector<8xf32>
    %13 = vector.shape_cast %12 : vector<8xf32> to vector<8x1xf32>
    %cst_10 = arith.constant 2.240000e+02 : f32
    %14 = vector.broadcast %cst_10 : f32 to vector<8x1xf32>
    %15 = arith.divf %13, %14 : vector<8x1xf32>
    %16 = vector.broadcast %8 : vector<8x1xf32> to vector<8x224xf32>
    %17 = arith.subf %2, %16 : vector<8x224xf32>
    %cst_11 = arith.constant 9.99999974E-6 : f32
    %18 = vector.broadcast %cst_11 : f32 to vector<8x1xf32>
    %19 = arith.addf %15, %18 : vector<8x1xf32>
    %20 = math.rsqrt %19 : vector<8x1xf32>
    %21 = vector.broadcast %20 : vector<8x1xf32> to vector<8x224xf32>
    %22 = arith.mulf %17, %21 : vector<8x224xf32>
    %23 = vector.broadcast %3 : vector<8x1xf32> to vector<8x224xf32>
    %24 = arith.mulf %22, %23 : vector<8x224xf32>
    %25 = vector.broadcast %4 : vector<8x1xf32> to vector<8x224xf32>
    %26 = arith.addf %24, %25 : vector<8x224xf32>
    %cst_12 = arith.constant 0.000000e+00 : f32
    %27 = vector.broadcast %cst_12 : f32 to vector<8x224xf32>
    %28 = arith.maximumf %26, %27 : vector<8x224xf32>
    %c0_13 = arith.constant 0 : index
    %c0_14 = arith.constant 0 : index
    %29 = vector.load %arg4[%c0_13, %c0_14] : memref<8x224xf32, #tpu.memory_space<vmem>>, vector<8x224xf32>
    tpu.vector_store %arg4[%c0_13, %c0_14], %28 {strides = array<i32>} : memref<8x224xf32, #tpu.memory_space<vmem>>, vector<8x224xf32>,
    return
  }
}

module attributes {stable_mosaic.version = 11 : i64} {
  func.func @_conv_bn_relu_resize_kernel(%arg0: memref<72x256xf32, #tpu.memory_space<vmem>>, %arg1: memref<8x72xf32, #tpu.memory_space<vmem>>, %arg2: memref<8x1xf32, #tpu.memory_space<vmem>>, %arg3: memref<8x1xf32, #tpu.memory_space<vmem>>, %arg4: memref<256x1088xf32, #tpu.memory_space<vmem>>, %arg5: memref<8x1088xf32, #tpu.memory_space<vmem>>) attributes {dimension_semantics = [], scalar_prefetch = 0 : i64, scratch_operands = 0 : i64, tpu.core_type = #tpu.core_type<tc>} {
    %c0 = arith.constant 0 : index
    %c0_0 = arith.constant 0 : index
    %0 = vector.load %arg1[%c0, %c0_0] : memref<8x72xf32, #tpu.memory_space<vmem>>, vector<8x72xf32>
    %c0_1 = arith.constant 0 : index
    %c0_2 = arith.constant 0 : index
    %1 = vector.load %arg0[%c0_1, %c0_2] : memref<72x256xf32, #tpu.memory_space<vmem>>, vector<72x256xf32>
    %cst = arith.constant dense<0.000000e+00> : vector<8x256xf32>
    %2 = tpu.matmul %0, %1, %cst {dimension_numbers = #tpu.dot_dimension_numbers<[1], [0], [0], [1], [0, 0, 1, 1], [], []>} : vector<8x72xf32>, vector<72x256xf32>, vector<8x256xf32> -> vector<8x256xf32>
    %c0_3 = arith.constant 0 : index
    %c0_4 = arith.constant 0 : index
    %3 = vector.load %arg2[%c0_3, %c0_4] : memref<8x1xf32, #tpu.memory_space<vmem>>, vector<8x1xf32>
    %c0_5 = arith.constant 0 : index
    %c0_6 = arith.constant 0 : index
    %4 = vector.load %arg3[%c0_5, %c0_6] : memref<8x1xf32, #tpu.memory_space<vmem>>, vector<8x1xf32>
    %cst_7 = arith.constant dense<0.000000e+00> : vector<8xf32>
    %5 = vector.multi_reduction <add>, %2, %cst_7 [1] : vector<8x256xf32> to vector<8xf32>
    %6 = vector.shape_cast %5 : vector<8xf32> to vector<8x1xf32>
    %cst_8 = arith.constant 2.560000e+02 : f32
    %7 = vector.broadcast %cst_8 : f32 to vector<8x1xf32>
    %8 = arith.divf %6, %7 : vector<8x1xf32>
    %9 = vector.broadcast %8 : vector<8x1xf32> to vector<8x256xf32>
    %10 = arith.subf %2, %9 : vector<8x256xf32>
    %11 = arith.mulf %10, %10 : vector<8x256xf32>
    %cst_9 = arith.constant dense<0.000000e+00> : vector<8xf32>
    %12 = vector.multi_reduction <add>, %11, %cst_9 [1] : vector<8x256xf32> to vector<8xf32>
    %13 = vector.shape_cast %12 : vector<8xf32> to vector<8x1xf32>
    %cst_10 = arith.constant 2.560000e+02 : f32
    %14 = vector.broadcast %cst_10 : f32 to vector<8x1xf32>
    %15 = arith.divf %13, %14 : vector<8x1xf32>
    %16 = vector.broadcast %8 : vector<8x1xf32> to vector<8x256xf32>
    %17 = arith.subf %2, %16 : vector<8x256xf32>
    %cst_11 = arith.constant 9.99999974E-6 : f32
    %18 = vector.broadcast %cst_11 : f32 to vector<8x1xf32>
    %19 = arith.addf %15, %18 : vector<8x1xf32>
    %20 = math.rsqrt %19 : vector<8x1xf32>
    %21 = vector.broadcast %20 : vector<8x1xf32> to vector<8x256xf32>
    %22 = arith.mulf %17, %21 : vector<8x256xf32>
    %23 = vector.broadcast %3 : vector<8x1xf32> to vector<8x256xf32>
    %24 = arith.mulf %22, %23 : vector<8x256xf32>
    %25 = vector.broadcast %4 : vector<8x1xf32> to vector<8x256xf32>
    %26 = arith.addf %24, %25 : vector<8x256xf32>
    %cst_12 = arith.constant 0.000000e+00 : f32
    %27 = vector.broadcast %cst_12 : f32 to vector<8x256xf32>
    %28 = arith.maximumf %26, %27 : vector<8x256xf32>
    %c0_13 = arith.constant 0 : index
    %c0_14 = arith.constant 0 : index
    %29 = vector.load %arg4[%c0_13, %c0_14] : memref<256x1088xf32, #tpu.memory_space<vmem>>, vector<256x1088xf32>
    %cst_15 = arith.constant dense<0.000000e+00> : vector<8x1088xf32>
    %30 = tpu.matmul %28, %29, %cst_15 {dimension_numbers = #tpu.dot_dimension_numbers<[1], [0], [0], [1], [0, 0, 1, 1], [], []>} : vector<8x256xf32>, vector<256x1088xf32>, vector<8x1088xf32> -> vector<8x1088xf32>
    %c0_16 = arith.constant 0 : index
    %c0_17 = arith.constant 0 : index
    %31 = vector.load %arg5[%c0_16, %c0_17] : memref<8x1088xf32, #tpu.memory_space<vmem>>, vector<8x1088xf32>
    tpu.vector_store %arg5[%c0_16, %c0_17], %30 {strides = array<i32>} : memref<8x1088xf32, #tpu.memory_space<vmem>>, vector<8x1088xf32>,
    return
  }
}

module attributes {stable_mosaic.version = 11 : i64} {
  func.func @_conv_bias_kernel(%arg0: memref<72x1024xf32, #tpu.memory_space<vmem>>, %arg1: memref<4x72xf32, #tpu.memory_space<vmem>>, %arg2: memref<4x1xf32, #tpu.memory_space<vmem>>, %arg3: memref<4x1024xf32, #tpu.memory_space<vmem>>) attributes {dimension_semantics = [], scalar_prefetch = 0 : i64, scratch_operands = 0 : i64, tpu.core_type = #tpu.core_type<tc>} {
    %c0 = arith.constant 0 : index
    %c0_0 = arith.constant 0 : index
    %0 = vector.load %arg1[%c0, %c0_0] : memref<4x72xf32, #tpu.memory_space<vmem>>, vector<4x72xf32>
    %c0_1 = arith.constant 0 : index
    %c0_2 = arith.constant 0 : index
    %1 = vector.load %arg0[%c0_1, %c0_2] : memref<72x1024xf32, #tpu.memory_space<vmem>>, vector<72x1024xf32>
    %cst = arith.constant dense<0.000000e+00> : vector<4x1024xf32>
    %2 = tpu.matmul %0, %1, %cst {dimension_numbers = #tpu.dot_dimension_numbers<[1], [0], [0], [1], [0, 0, 1, 1], [], []>} : vector<4x72xf32>, vector<72x1024xf32>, vector<4x1024xf32> -> vector<4x1024xf32>
    %c0_3 = arith.constant 0 : index
    %c0_4 = arith.constant 0 : index
    %3 = vector.load %arg2[%c0_3, %c0_4] : memref<4x1xf32, #tpu.memory_space<vmem>>, vector<4x1xf32>
    %4 = vector.broadcast %3 : vector<4x1xf32> to vector<4x1024xf32>
    %5 = arith.addf %2, %4 : vector<4x1024xf32>
    %c0_5 = arith.constant 0 : index
    %c0_6 = arith.constant 0 : index
    %6 = vector.load %arg3[%c0_5, %c0_6] : memref<4x1024xf32, #tpu.memory_space<vmem>>, vector<4x1024xf32>
    tpu.vector_store %arg3[%c0_5, %c0_6], %5 {strides = array<i32>} : memref<4x1024xf32, #tpu.memory_space<vmem>>, vector<4x1024xf32>,
    return
  }
}

module attributes {stable_mosaic.version = 11 : i64} {
  func.func @_conv_bn_relu_kernel(%arg0: memref<72x1088xf32, #tpu.memory_space<vmem>>, %arg1: memref<4x72xf32, #tpu.memory_space<vmem>>, %arg2: memref<4x1xf32, #tpu.memory_space<vmem>>, %arg3: memref<4x1xf32, #tpu.memory_space<vmem>>, %arg4: memref<4x1088xf32, #tpu.memory_space<vmem>>) attributes {dimension_semantics = [], scalar_prefetch = 0 : i64, scratch_operands = 0 : i64, tpu.core_type = #tpu.core_type<tc>} {
    %c0 = arith.constant 0 : index
    %c0_0 = arith.constant 0 : index
    %0 = vector.load %arg1[%c0, %c0_0] : memref<4x72xf32, #tpu.memory_space<vmem>>, vector<4x72xf32>
    %c0_1 = arith.constant 0 : index
    %c0_2 = arith.constant 0 : index
    %1 = vector.load %arg0[%c0_1, %c0_2] : memref<72x1088xf32, #tpu.memory_space<vmem>>, vector<72x1088xf32>
    %cst = arith.constant dense<0.000000e+00> : vector<4x1088xf32>
    %2 = tpu.matmul %0, %1, %cst {dimension_numbers = #tpu.dot_dimension_numbers<[1], [0], [0], [1], [0, 0, 1, 1], [], []>} : vector<4x72xf32>, vector<72x1088xf32>, vector<4x1088xf32> -> vector<4x1088xf32>
    %c0_3 = arith.constant 0 : index
    %c0_4 = arith.constant 0 : index
    %3 = vector.load %arg2[%c0_3, %c0_4] : memref<4x1xf32, #tpu.memory_space<vmem>>, vector<4x1xf32>
    %c0_5 = arith.constant 0 : index
    %c0_6 = arith.constant 0 : index
    %4 = vector.load %arg3[%c0_5, %c0_6] : memref<4x1xf32, #tpu.memory_space<vmem>>, vector<4x1xf32>
    %cst_7 = arith.constant dense<0.000000e+00> : vector<4xf32>
    %5 = vector.multi_reduction <add>, %2, %cst_7 [1] : vector<4x1088xf32> to vector<4xf32>
    %6 = vector.shape_cast %5 : vector<4xf32> to vector<4x1xf32>
    %cst_8 = arith.constant 1.088000e+03 : f32
    %7 = vector.broadcast %cst_8 : f32 to vector<4x1xf32>
    %8 = arith.divf %6, %7 : vector<4x1xf32>
    %9 = vector.broadcast %8 : vector<4x1xf32> to vector<4x1088xf32>
    %10 = arith.subf %2, %9 : vector<4x1088xf32>
    %11 = arith.mulf %10, %10 : vector<4x1088xf32>
    %cst_9 = arith.constant dense<0.000000e+00> : vector<4xf32>
    %12 = vector.multi_reduction <add>, %11, %cst_9 [1] : vector<4x1088xf32> to vector<4xf32>
    %13 = vector.shape_cast %12 : vector<4xf32> to vector<4x1xf32>
    %cst_10 = arith.constant 1.088000e+03 : f32
    %14 = vector.broadcast %cst_10 : f32 to vector<4x1xf32>
    %15 = arith.divf %13, %14 : vector<4x1xf32>
    %16 = vector.broadcast %8 : vector<4x1xf32> to vector<4x1088xf32>
    %17 = arith.subf %2, %16 : vector<4x1088xf32>
    %cst_11 = arith.constant 9.99999974E-6 : f32
    %18 = vector.broadcast %cst_11 : f32 to vector<4x1xf32>
    %19 = arith.addf %15, %18 : vector<4x1xf32>
    %20 = math.rsqrt %19 : vector<4x1xf32>
    %21 = vector.broadcast %20 : vector<4x1xf32> to vector<4x1088xf32>
    %22 = arith.mulf %17, %21 : vector<4x1088xf32>
    %23 = vector.broadcast %3 : vector<4x1xf32> to vector<4x1088xf32>
    %24 = arith.mulf %22, %23 : vector<4x1088xf32>
    %25 = vector.broadcast %4 : vector<4x1xf32> to vector<4x1088xf32>
    %26 = arith.addf %24, %25 : vector<4x1088xf32>
    %cst_12 = arith.constant 0.000000e+00 : f32
    %27 = vector.broadcast %cst_12 : f32 to vector<4x1088xf32>
    %28 = arith.maximumf %26, %27 : vector<4x1088xf32>
    %c0_13 = arith.constant 0 : index
    %c0_14 = arith.constant 0 : index
    %29 = vector.load %arg4[%c0_13, %c0_14] : memref<4x1088xf32, #tpu.memory_space<vmem>>, vector<4x1088xf32>
    tpu.vector_store %arg4[%c0_13, %c0_14], %28 {strides = array<i32>} : memref<4x1088xf32, #tpu.memory_space<vmem>>, vector<4x1088xf32>,
    return
  }
}

module attributes {stable_mosaic.version = 11 : i64} {
  func.func @_conv_bn_relu_head_kernel(%arg0: memref<36x1152xf32, #tpu.memory_space<vmem>>, %arg1: memref<4x36xf32, #tpu.memory_space<vmem>>, %arg2: memref<4x1xf32, #tpu.memory_space<vmem>>, %arg3: memref<4x1xf32, #tpu.memory_space<vmem>>, %arg4: memref<2x4xf32, #tpu.memory_space<vmem>>, %arg5: memref<2x1xf32, #tpu.memory_space<vmem>>, %arg6: memref<2x1152xf32, #tpu.memory_space<vmem>>) attributes {dimension_semantics = [], scalar_prefetch = 0 : i64, scratch_operands = 0 : i64, tpu.core_type = #tpu.core_type<tc>} {
    %c0 = arith.constant 0 : index
    %c0_0 = arith.constant 0 : index
    %0 = vector.load %arg1[%c0, %c0_0] : memref<4x36xf32, #tpu.memory_space<vmem>>, vector<4x36xf32>
    %c0_1 = arith.constant 0 : index
    %c0_2 = arith.constant 0 : index
    %1 = vector.load %arg0[%c0_1, %c0_2] : memref<36x1152xf32, #tpu.memory_space<vmem>>, vector<36x1152xf32>
    %cst = arith.constant dense<0.000000e+00> : vector<4x1152xf32>
    %2 = tpu.matmul %0, %1, %cst {dimension_numbers = #tpu.dot_dimension_numbers<[1], [0], [0], [1], [0, 0, 1, 1], [], []>} : vector<4x36xf32>, vector<36x1152xf32>, vector<4x1152xf32> -> vector<4x1152xf32>
    %c0_3 = arith.constant 0 : index
    %c0_4 = arith.constant 0 : index
    %3 = vector.load %arg2[%c0_3, %c0_4] : memref<4x1xf32, #tpu.memory_space<vmem>>, vector<4x1xf32>
    %c0_5 = arith.constant 0 : index
    %c0_6 = arith.constant 0 : index
    %4 = vector.load %arg3[%c0_5, %c0_6] : memref<4x1xf32, #tpu.memory_space<vmem>>, vector<4x1xf32>
    %cst_7 = arith.constant dense<0.000000e+00> : vector<4xf32>
    %5 = vector.multi_reduction <add>, %2, %cst_7 [1] : vector<4x1152xf32> to vector<4xf32>
    %6 = vector.shape_cast %5 : vector<4xf32> to vector<4x1xf32>
    %cst_8 = arith.constant 1.152000e+03 : f32
    %7 = vector.broadcast %cst_8 : f32 to vector<4x1xf32>
    %8 = arith.divf %6, %7 : vector<4x1xf32>
    %9 = vector.broadcast %8 : vector<4x1xf32> to vector<4x1152xf32>
    %10 = arith.subf %2, %9 : vector<4x1152xf32>
    %11 = arith.mulf %10, %10 : vector<4x1152xf32>
    %cst_9 = arith.constant dense<0.000000e+00> : vector<4xf32>
    %12 = vector.multi_reduction <add>, %11, %cst_9 [1] : vector<4x1152xf32> to vector<4xf32>
    %13 = vector.shape_cast %12 : vector<4xf32> to vector<4x1xf32>
    %cst_10 = arith.constant 1.152000e+03 : f32
    %14 = vector.broadcast %cst_10 : f32 to vector<4x1xf32>
    %15 = arith.divf %13, %14 : vector<4x1xf32>
    %16 = vector.broadcast %8 : vector<4x1xf32> to vector<4x1152xf32>
    %17 = arith.subf %2, %16 : vector<4x1152xf32>
    %cst_11 = arith.constant 9.99999974E-6 : f32
    %18 = vector.broadcast %cst_11 : f32 to vector<4x1xf32>
    %19 = arith.addf %15, %18 : vector<4x1xf32>
    %20 = math.rsqrt %19 : vector<4x1xf32>
    %21 = vector.broadcast %20 : vector<4x1xf32> to vector<4x1152xf32>
    %22 = arith.mulf %17, %21 : vector<4x1152xf32>
    %23 = vector.broadcast %3 : vector<4x1xf32> to vector<4x1152xf32>
    %24 = arith.mulf %22, %23 : vector<4x1152xf32>
    %25 = vector.broadcast %4 : vector<4x1xf32> to vector<4x1152xf32>
    %26 = arith.addf %24, %25 : vector<4x1152xf32>
    %cst_12 = arith.constant 0.000000e+00 : f32
    %27 = vector.broadcast %cst_12 : f32 to vector<4x1152xf32>
    %28 = arith.maximumf %26, %27 : vector<4x1152xf32>
    %c0_13 = arith.constant 0 : index
    %c0_14 = arith.constant 0 : index
    %29 = vector.load %arg4[%c0_13, %c0_14] : memref<2x4xf32, #tpu.memory_space<vmem>>, vector<2x4xf32>
    %cst_15 = arith.constant dense<0.000000e+00> : vector<2x1152xf32>
    %30 = tpu.matmul %29, %28, %cst_15 {dimension_numbers = #tpu.dot_dimension_numbers<[1], [0], [0], [1], [0, 0, 1, 1], [], []>} : vector<2x4xf32>, vector<4x1152xf32>, vector<2x1152xf32> -> vector<2x1152xf32>
    %c0_16 = arith.constant 0 : index
    %c0_17 = arith.constant 0 : index
    %31 = vector.load %arg5[%c0_16, %c0_17] : memref<2x1xf32, #tpu.memory_space<vmem>>, vector<2x1xf32>
    %32 = vector.broadcast %31 : vector<2x1xf32> to vector<2x1152xf32>
    %33 = arith.addf %30, %32 : vector<2x1152xf32>
    %c0_18 = arith.constant 0 : index
    %c0_19 = arith.constant 0 : index
    %34 = vector.load %arg6[%c0_18, %c0_19] : memref<2x1152xf32, #tpu.memory_space<vmem>>, vector<2x1152xf32>
    tpu.vector_store %arg6[%c0_18, %c0_19], %33 {strides = array<i32>} : memref<2x1152xf32, #tpu.memory_space<vmem>>, vector<2x1152xf32>,
    return
  }
}

</mosaic_0001>

<bundles_post_ra>
// kernel: unet_forward.12
= control target key start
LH: loop header
LB: loop body
LE: loop exit
PB: predicated region body
PF: predicated region fallthrough
CT: control target
= control target key end

     0   :  { %v663_v3 = vmov 0.0   ;;  %vm67_vm0 = vcmask 1043456   ;;  %vm63_vm1 = vcmask 293888   ;;  %v664_v63 = vmov 0.0|0.0   ;;  %s897_s0 = inlined_call_operand.vmem [shape: f32[36,1088], index: 0, kind: input, shape index: {}]   ;;  %s898_s1 = inlined_call_operand.vmem [shape: f32[4,36], index: 1, kind: input, shape index: {}]   ;;  %s899_s2 = inlined_call_operand.vmem [shape: f32[4,1], index: 2, kind: input, shape index: {}]   ;;  %s900_s3 = inlined_call_operand.vmem [shape: f32[4,1], index: 3, kind: input, shape index: {}]   ;;  %s901_s4 = inlined_call_operand.vmem [shape: f32[4,1088], index: 4, kind: output, shape index: {}]  }
   0x1   :  { %v19_v0 = vld [vmem:[%s897_s0 + $0x8] sm:$0xff]  ;;  %v28_v1 = vld [vmem:[%s897_s0 + $0x50] sm:$0xff]  ;;  %v18_v2 = vld [vmem:[%s897_s0] sm:$0xff]  ;;  %159 = vmatprep.mubr.f32.mxu0 %v663_v3  ;;  %230 = vmatprep.mubr.f32.mxu1 %v663_v3  ;;  %vm665_vm2 = vmmov 0   ;;  %vm466_vm3 = vcmask 519168  }
   0x2   :  { %v617_v4 = vpack.c.bf16 %v28_v1, %v19_v0  ;;  %v27_v5 = vld [vmem:[%s897_s0 + $0x48] sm:$0xff]  ;;  %v21_v6 = vld [vmem:[%s897_s0 + $0x18] sm:$0xff]  ;;  %v30_v7 = vld [vmem:[%s897_s0 + $0x60] sm:$0xff] }
   0x3   :  { %v619_v8 = vpack.c.bf16 %v27_v5, %v18_v2  ;;  %v625_v9 = vpack.c.bf16 %v30_v7, %v21_v6  ;;  %v37_v10 = vld [vmem:[%s897_s0 + $0x98] sm:$0xff]  ;;  %v46_v11 = vld [vmem:[%s897_s0 + $0xe0] sm:$0xff]  ;;  %v20_v12 = vld [vmem:[%s897_s0 + $0x10] sm:$0xff] }
   0x4   :  { %618 = vmatprep.subr.bf16.mxu0 %v617_v4  ;;  %v621_v13 = vpack.c.bf16 %v46_v11, %v37_v10  ;;  %v29_v14 = vld [vmem:[%s897_s0 + $0x58] sm:$0xff]  ;;  %v36_v15 = vld [vmem:[%s897_s0 + $0x90] sm:$0xff]  ;;  %v39_v19 = vld [vmem:[%s897_s0 + $0xa8] sm:$0xff] }
   0x5   :  { %v45_v16 = vld [vmem:[%s897_s0 + $0xd8] sm:$0xff]  ;;  %620 = vmatpush1.bf16.msra.mxu0 %v619_v8  ;;  %626 = vmatprep.subr.bf16.mxu1 %v625_v9  ;;  %v627_v17 = vpack.c.bf16 %v29_v14, %v20_v12  ;;  %v48_v20 = vld [vmem:[%s897_s0 + $0xf0] sm:$0xff]  ;;  %v38_v22 = vld [vmem:[%s897_s0 + $0xa0] sm:$0xff] }
   0x6   :  { %v623_v18 = vpack.c.bf16 %v45_v16, %v36_v15  ;;  %622 = vmatprep.subr.bf16.mxu0 %v621_v13  ;;  %v629_v21 = vpack.c.bf16 %v48_v20, %v39_v19  ;;  %v47_v23 = vld [vmem:[%s897_s0 + $0xe8] sm:$0xff]  ;;  %v32_v27 = vld [vmem:[%s897_s0 + $0x70] sm:$0xff]  ;;  %v54_v28 = vld [vmem:[%s897_s0 + $0x120] sm:$0xf] }
   0x7   :  { %628 = vmatpush1.bf16.msra.mxu1 %v627_v17  ;;  %v55_v24 = vld [vmem:[%s897_s0 + $0x128] sm:$0xf]  ;;  %v631_v25 = vpack.c.bf16 %v47_v23, %v38_v22  ;;  %v22_v29 = vld [vmem:[%s897_s0 + $0x20] sm:$0xff]  ;;  %v57_v32 = vld [vmem:[%s897_s0 + $0x138] sm:$0xf] }
   0x8   :  { %v23_v26 = vld [vmem:[%s897_s0 + $0x28] sm:$0xff]  ;;  %630 = vmatprep.subr.bf16.mxu1 %v629_v21  ;;  %v763_v31 = vld [vmem:[%s898_s1] sm:$0xf]  ;;  %v41_v33 = vld [vmem:[%s897_s0 + $0xb8] sm:$0xff] }
   0x9   :  { %v31_v30 = vld [vmem:[%s897_s0 + $0x68] sm:$0xff]  ;;  %624 = vmatpush1.bf16.msra.mxu0 %v623_v18  ;;  %v50_v34 = vld [vmem:[%s897_s0 + $0x100] sm:$0xff]  ;;  %v633_v35 = vpack.c.bf16 %v32_v27, %v23_v26  ;;  %v56_v36 = vld [vmem:[%s897_s0 + $0x130] sm:$0xf] }
   0xa   :  { %584 = vmatprep.subr.msk.mxu0 %vm67_vm0, %v55_v24  ;;  %v25_v37 = vld [vmem:[%s897_s0 + $0x38] sm:$0xff]  ;;  %v34_v38 = vld [vmem:[%s897_s0 + $0x80] sm:$0xff]  ;;  %v635_v39 = vpack.c.bf16 %v31_v30, %v22_v29  ;;  %v40_v40 = vld [vmem:[%s897_s0 + $0xb0] sm:$0xff]  ;;  %v637_v43 = vpack.c.bf16 %v50_v34, %v41_v33  ;;  %v666_v29 = vmov 0  }
   0xb   :  { %632 = vmatpush1.bf16.msra.mxu1 %v631_v25  ;;  %v24_v41 = vld [vmem:[%s897_s0 + $0x30] sm:$0xff]  ;;  %v33_v42 = vld [vmem:[%s897_s0 + $0x78] sm:$0xff]  ;;  %v43_v45 = vld [vmem:[%s897_s0 + $0xc8] sm:$0xff]  ;;  %v641_v47 = vpack.c.bf16 %v34_v38, %v25_v37  ;;  %659 = vset.pattern.permute.xlu1 %v666_v29 }
   0xc   :  { %587 = vmatprep.subr.msk.mxu1 %vm67_vm0, %v57_v32  ;;  %v49_v44 = vld [vmem:[%s897_s0 + $0xf8] sm:$0xff]  ;;  %v52_v46 = vld [vmem:[%s897_s0 + $0x110] sm:$0xff]  ;;  %v643_v48 = vpack.c.bf16 %v33_v42, %v24_v41  ;;  %v42_v51 = vld [vmem:[%s897_s0 + $0xc0] sm:$0xff]  ;;  %660 = vset.pattern.permute.xlu0 %v666_v29 }
   0xd   :  { %585 = vmatpush1.msk.msra.mxu0 %vm67_vm0, %v54_v28  ;;  %v639_v49 = vpack.c.bf16 %v49_v44, %v40_v40  ;;  %v645_v50 = vpack.c.bf16 %v52_v46, %v43_v45  ;;  %v51_v52 = vld [vmem:[%s897_s0 + $0x108] sm:$0xff]  ;;  %v26_v55 = vld [vmem:[%s897_s0 + $0x40] sm:$0xff]  ;;  %v61_v58 = vld [vmem:[%s897_s0 + $0x158] sm:$0xf] }
   0xe   :  { %586 = vmatmul.mubr.msk.f32.vlgmr.msra.gmra.mrb[0].mxu0 %vm63_vm1, %v763_v31  ;;  %634 = vmatprep.subr.bf16.mxu0 %v633_v35  ;;  %v59_v53 = vld [vmem:[%s897_s0 + $0x148] sm:$0xf]  ;;  %v647_v54 = vpack.c.bf16 %v51_v52, %v42_v51  ;;  %v58_v57 = vld [vmem:[%s897_s0 + $0x140] sm:$0xf]  ;;  %v44_v60 = vld [vmem:[%s897_s0 + $0xd0] sm:$0xff] }
   0xf   :  { %636 = vmatpush1.bf16.msra.mxu0 %v635_v39  ;;  %588 = vmatpush1.msk.msra.mxu1 %vm67_vm0, %v56_v36  ;;  %v35_v56 = vld [vmem:[%s897_s0 + $0x88] sm:$0xff]  ;;  %v53_v61 = vld [vmem:[%s897_s0 + $0x118] sm:$0xff]  ;;  %v60_v62 = vld [vmem:[%s897_s0 + $0x150] sm:$0xf] }
  0x10   :  { %589 = vmatmul.mubr.msk.f32.vlgmr.msra.gmra.mrb[0].mxu1 %vm63_vm1, %v763_v31  ;;  %638 = vmatprep.subr.bf16.mxu0 %v637_v43  ;;  %v650_v59 = vpack.c.bf16 %v35_v56, %v26_v55  ;;  %v653_v0 = vpack.c.bf16 %v53_v61, %v44_v60  ;;  %v62_v1 = vld [vmem:[%s897_s0 + $0x160] sm:$0xf] }
  0x11   :  { %642 = vmatprep.subr.bf16.mxu1 %v641_v47  ;;  %301 = vmatprep.mubr.f32.mxu0 %v663_v3  ;;  %v449_v30 = vld [vmem:[%s899_s2] sm:$0xf] }
  0x12   :  { %644 = vmatpush1.bf16.msra.mxu1 %v643_v48  ;;  %372 = vmatprep.mubr.f32.mxu1 %v663_v3 }
  0x13   :  { %640 = vmatpush1.bf16.msra.mxu0 %v639_v49  ;;  %646 = vmatprep.subr.bf16.mxu1 %v645_v50 }
  0x14   :  { %590 = vmatprep.subr.msk.mxu0 %vm67_vm0, %v59_v53  ;;  %524 = vperm.xlu1 %659, %v449_v30  }
  0x16   :  { %648 = vmatpush1.bf16.msra.mxu1 %v647_v54 }
  0x17   :  { %591 = vmatpush1.msk.msra.mxu0 %vm67_vm0, %v58_v57  ;;  %593 = vmatprep.subr.msk.mxu1 %vm67_vm0, %v61_v58 }
  0x18   :  { %592 = vmatmul.mubr.msk.f32.vlgmr.msra.gmra.mrb[2].mxu0 %vm63_vm1, %v763_v31  ;;  %649 = vmatprep.subr.bf16.mxu0 %v664_v63 }
  0x19   :  { %651 = vmatpush3.bf16.msra.mxu0 %v650_v59  ;;  %614 = vmatprep.mubr.msk.f32.mxu0 %vm665_vm2, %v663_v3 }
  0x1a   :  { %594 = vmatpush1.msk.msra.mxu1 %vm67_vm0, %v60_v62  ;;  %652 = vmatprep.subr.bf16.mxu0 %v664_v63 }
  0x1b   :  { %595 = vmatmul.mubr.msk.f32.vlgmr.msra.gmra.mrb[2].mxu1 %vm63_vm1, %v763_v31 }
  0x1d   :  { %654 = vmatpush3.bf16.msra.mxu0 %v653_v0 }
  0x1e   :  { %612 = vmatprep.subr.mxu0 %v663_v3 }
  0x21   :  { %613 = vmatpush3.msk.msra.mxu0 %vm67_vm0, %v62_v1 }
  0x22   :  { %615 = vmatmul.mubr.msk.f32.vlgmr.msra.gmra.mrb[4].mxu0 %vm63_vm1, %v763_v31  ;;  %v450_v31 = vld [vmem:[%s900_s3] sm:$0xf] }
  0x23   :  { %538 = vperm.xlu1 %659, %v450_v31  }
  0xe1   :  { %v161_v2 = vpop.f32.mrb[0].mxu0 }
  0xe2   :  { %v451_v4 = vsel %vm67_vm0, %v161_v2, 0.0  ;;  %v163_v5 = vpop.f32.mrb[1].mxu0 }
  0xe3   :  { %v452_v6 = vsel %vm67_vm0, %v163_v5, 0.0  ;;  %v232_v7 = vpop.f32.mrb[0].mxu1 }
  0xe4   :  { %v453_v8 = vadd.f32 %v452_v6, %v451_v4  ;;  %v454_v9 = vsel %vm67_vm0, %v232_v7, 0.0  ;;  %v234_v3 = vpop.f32.mrb[1].mxu1 }
  0xe5   :  { %v456_v10 = vsel %vm67_vm0, %v234_v3, 0.0 }
  0xe6   :  { %v455_v11 = vadd.f32 %v454_v9, %v453_v8  ;;  %v525_v9 = vpop.permute.xlu1 %524 }
  0xe8   :  { %v457_v12 = vadd.f32 %v456_v10, %v455_v11 }
  0xeb   :  { %v303_v13 = vpop.f32.mrb[2].mxu0 }
  0xec   :  { %v458_v14 = vsel %vm67_vm0, %v303_v13, 0.0  ;;  %v305_v15 = vpop.f32.mrb[3].mxu0 }
  0xed   :  { %v459_v16 = vadd.f32 %v458_v14, %v457_v12  ;;  %v460_v17 = vsel %vm67_vm0, %v305_v15, 0.0 }
  0xee   :  { %v374_v18 = vpop.f32.mrb[2].mxu1 }
  0xef   :  { %v461_v19 = vadd.f32 %v460_v17, %v459_v16  ;;  %v462_v20 = vsel %vm67_vm0, %v374_v18, 0.0  ;;  %v376_v21 = vpop.f32.mrb[3].mxu1 }
  0xf0   :  { %v464_v22 = vsel %vm67_vm0, %v376_v21, 0.0 }
  0xf1   :  { %v463_v23 = vadd.f32 %v462_v20, %v461_v19 }
  0xf3   :  { %v465_v24 = vadd.f32 %v464_v22, %v463_v23  ;;  %v539_v22 = vpop.permute.xlu1 %538 }
  0xf5   :  { %v445_v25 = vpop.f32.mrb[4].mxu0 }
  0xf6   :  { %v616_v26 = vpop.f32.mrb[5].mxu0  ;;  %v467_v27 = vsel %vm466_vm3, %v445_v25, 0.0 }
  0xf7   :  { %v468_v28 = vadd.f32 %v467_v27, %v465_v24 }
  0xf9   :  { %469 = vadd.xlane.f32.xlu0 %v468_v28 }
 0x186   :  { %v470_v32 = vpop.xlane.xlu0 %469 }
 0x187   :  { %v472_v33 = vmul.f32 0.00091911765, %v470_v32 }
 0x189   :  { %v473_v34 = vsub.f32 %v161_v2, %v472_v33  ;;  %v474_v35 = vsub.f32 %v163_v5, %v472_v33  ;;  %v475_v36 = vsub.f32 %v232_v7, %v472_v33  ;;  %v476_v37 = vsub.f32 %v234_v3, %v472_v33 }
 0x18a   :  { %v477_v38 = vsub.f32 %v303_v13, %v472_v33  ;;  %v478_v42 = vsub.f32 %v305_v15, %v472_v33  ;;  %v479_v47 = vsub.f32 %v374_v18, %v472_v33  ;;  %v480_v51 = vsub.f32 %v376_v21, %v472_v33 }
 0x18b   :  { %v482_v39 = vmul.f32 %v473_v34, %v473_v34  ;;  %v483_v40 = vmul.f32 %v474_v35, %v474_v35  ;;  %v484_v41 = vmul.f32 %v475_v36, %v475_v36  ;;  %v485_v43 = vmul.f32 %v476_v37, %v476_v37 }
 0x18c   :  { %v486_v48 = vmul.f32 %v477_v38, %v477_v38  ;;  %v487_v52 = vmul.f32 %v478_v42, %v478_v42  ;;  %v481_v55 = vsub.f32 %v445_v25, %v472_v33  ;;  %v488_v56 = vmul.f32 %v479_v47, %v479_v47 }
 0x18d   :  { %v491_v44 = vsel %vm67_vm0, %v482_v39, 0.0  ;;  %v492_v45 = vsel %vm67_vm0, %v483_v40, 0.0  ;;  %v494_v49 = vsel %vm67_vm0, %v484_v41, 0.0  ;;  %v496_v53 = vsel %vm67_vm0, %v485_v43, 0.0 }
 0x18e   :  { %v493_v46 = vadd.f32 %v492_v45, %v491_v44  ;;  %v498_v57 = vsel %vm67_vm0, %v486_v48, 0.0  ;;  %v489_v59 = vmul.f32 %v480_v51, %v480_v51  ;;  %v500_v60 = vsel %vm67_vm0, %v487_v52, 0.0 }
 0x18f   :  { %v490_v62 = vmul.f32 %v481_v55, %v481_v55  ;;  %v502_v63 = vsel %vm67_vm0, %v488_v56, 0.0 }
 0x190   :  { %v495_v50 = vadd.f32 %v494_v49, %v493_v46  ;;  %v504_v1 = vsel %vm67_vm0, %v489_v59, 0.0 }
 0x191   :  { %v506_v4 = vsel %vm466_vm3, %v490_v62, 0.0 }
 0x192   :  { %v497_v54 = vadd.f32 %v496_v53, %v495_v50 }
 0x194   :  { %v499_v58 = vadd.f32 %v498_v57, %v497_v54 }
 0x196   :  { %v501_v61 = vadd.f32 %v500_v60, %v499_v58 }
 0x198   :  { %v503_v0 = vadd.f32 %v502_v63, %v501_v61 }
 0x19a   :  { %v505_v2 = vadd.f32 %v504_v1, %v503_v0 }
 0x19c   :  { %v507_v5 = vadd.f32 %v506_v4, %v505_v2 }
 0x19e   :  { %508 = vadd.xlane.f32.xlu0 %v507_v5 }
 0x22b   :  { %v509_v6 = vpop.xlane.xlu0 %508 }
 0x22c   :  { %v510_v7 = vmul.f32 0.00091911765, %v509_v6 }
 0x22e   :  { %v511_v8 = vadd.f32 1e-05, %v510_v7 }
 0x230   :  { %661 = vrsqrt.f32 %v511_v8 }
 0x23a   :  { %v662_v3 = vpop.eup %661 }
 0x23b   :  { %v513_v10 = vmul.f32 %v662_v3, %v473_v34  ;;  %v514_v11 = vmul.f32 %v662_v3, %v474_v35  ;;  %v515_v12 = vmul.f32 %v662_v3, %v475_v36  ;;  %v516_v13 = vmul.f32 %v662_v3, %v476_v37 }
 0x23c   :  { %v517_v14 = vmul.f32 %v662_v3, %v477_v38  ;;  %v518_v15 = vmul.f32 %v662_v3, %v478_v42  ;;  %v519_v16 = vmul.f32 %v662_v3, %v479_v47  ;;  %v520_v17 = vmul.f32 %v662_v3, %v480_v51 }
 0x23d   :  { %v521_v18 = vmul.f32 %v662_v3, %v481_v55  ;;  %v527_v19 = vmul.f32 %v525_v9, %v513_v10  ;;  %v528_v20 = vmul.f32 %v525_v9, %v514_v11  ;;  %v529_v21 = vmul.f32 %v525_v9, %v515_v12 }
 0x23e   :  { %v530_v23 = vmul.f32 %v525_v9, %v516_v13  ;;  %v531_v24 = vmul.f32 %v525_v9, %v517_v14  ;;  %v532_v25 = vmul.f32 %v525_v9, %v518_v15  ;;  %v533_v26 = vmul.f32 %v525_v9, %v519_v16 }
 0x23f   :  { %v534_v27 = vmul.f32 %v525_v9, %v520_v17  ;;  %v535_v28 = vmul.f32 %v525_v9, %v521_v18  ;;  %v541_v29 = vadd.f32 %v539_v22, %v527_v19  ;;  %v542_v30 = vadd.f32 %v539_v22, %v528_v20 }
 0x240   :  { %v543_v31 = vadd.f32 %v539_v22, %v529_v21  ;;  %v544_v32 = vadd.f32 %v539_v22, %v530_v23  ;;  %v545_v33 = vadd.f32 %v539_v22, %v531_v24  ;;  %v546_v34 = vadd.f32 %v539_v22, %v532_v25 }
 0x241   :  { %v547_v35 = vadd.f32 %v539_v22, %v533_v26  ;;  %v548_v36 = vadd.f32 %v539_v22, %v534_v27  ;;  %v549_v37 = vadd.f32 %v539_v22, %v535_v28  ;;  %v550_v38 = vmax.f32 %v541_v29, 0.0 }
 0x242   :  { %v551_v39 = vmax.f32 %v542_v30, 0.0  ;;  %v552_v40 = vmax.f32 %v543_v31, 0.0  ;;  %v553_v41 = vmax.f32 %v544_v32, 0.0  ;;  %v554_v42 = vmax.f32 %v545_v33, 0.0 }
 0x243   :  { %v555_v43 = vmax.f32 %v546_v34, 0.0  ;;  %v556_v44 = vmax.f32 %v547_v35, 0.0  ;;  %v557_v45 = vmax.f32 %v548_v36, 0.0  ;;  %v558_v46 = vmax.f32 %v549_v37, 0.0 }
 0x244   :  { %v567_v47 = vcombine.low %v550_v38, %v551_v39  ;;  %v568_v48 = vcombine.low %v552_v40, %v553_v41 }
 0x245   :  { %v569_v49 = vcombine.low %v554_v42, %v555_v43  ;;  %v570_v50 = vcombine.low %v556_v44, %v557_v45  ;;  %579 = vst.msk [vmem:[%s901_s4 + $0x20] sm:$0xf] %vm466_vm3, %v558_v46 }
 0x246   :  { %575 = vst [vmem:[%s901_s4] sm:$0xff] %v567_v47  ;;  %576 = vst [vmem:[%s901_s4 + $0x8] sm:$0xff] %v568_v48 }
 0x247   :  { %577 = vst [vmem:[%s901_s4 + $0x10] sm:$0xff] %v569_v49  ;;  %578 = vst [vmem:[%s901_s4 + $0x18] sm:$0xff] %v570_v50 }

// kernel: unet_forward.13
= control target key start
LH: loop header
LB: loop body
LE: loop exit
PB: predicated region body
PF: predicated region fallthrough
CT: control target
= control target key end

     0   :  { %v544_v3 = vmov 0.0   ;;  %vm62_vm0 = vcmask 1043456   ;;  %vm58_vm1 = vcmask 293888   ;;  %s744_s0 = inlined_call_operand.vmem [shape: f32[36,1024], index: 0, kind: input, shape index: {}]   ;;  %s745_s1 = inlined_call_operand.vmem [shape: f32[4,36], index: 1, kind: input, shape index: {}]   ;;  %s746_s2 = inlined_call_operand.vmem [shape: f32[4,1], index: 2, kind: input, shape index: {}]   ;;  %s747_s3 = inlined_call_operand.vmem [shape: f32[4,1], index: 3, kind: input, shape index: {}]   ;;  %s748_s4 = inlined_call_operand.vmem [shape: f32[4,1024], index: 4, kind: output, shape index: {}]  }
   0x1   :  { %v19_v0 = vld [vmem:[%s744_s0 + $0x8] sm:$0xff]  ;;  %v18_v2 = vld [vmem:[%s744_s0] sm:$0xff]  ;;  %151 = vmatprep.mubr.f32.mxu0 %v544_v3  ;;  %222 = vmatprep.mubr.f32.mxu1 %v544_v3  ;;  %v21_v6 = vld [vmem:[%s744_s0 + $0x18] sm:$0xff] }
   0x2   :  { %v27_v1 = vld [vmem:[%s744_s0 + $0x48] sm:$0xff]  ;;  %v26_v5 = vld [vmem:[%s744_s0 + $0x40] sm:$0xff]  ;;  %v29_v7 = vld [vmem:[%s744_s0 + $0x58] sm:$0xff] }
   0x3   :  { %v506_v4 = vpack.c.bf16 %v27_v1, %v19_v0  ;;  %v508_v8 = vpack.c.bf16 %v26_v5, %v18_v2  ;;  %v514_v9 = vpack.c.bf16 %v29_v7, %v21_v6  ;;  %v35_v10 = vld [vmem:[%s744_s0 + $0x88] sm:$0xff]  ;;  %v20_v12 = vld [vmem:[%s744_s0 + $0x10] sm:$0xff]  ;;  %v34_v15 = vld [vmem:[%s744_s0 + $0x80] sm:$0xff] }
   0x4   :  { %v43_v11 = vld [vmem:[%s744_s0 + $0xc8] sm:$0xff]  ;;  %v28_v14 = vld [vmem:[%s744_s0 + $0x50] sm:$0xff]  ;;  %v42_v16 = vld [vmem:[%s744_s0 + $0xc0] sm:$0xff] }
   0x5   :  { %507 = vmatprep.subr.bf16.mxu0 %v506_v4  ;;  %v510_v13 = vpack.c.bf16 %v43_v11, %v35_v10  ;;  %515 = vmatprep.subr.bf16.mxu1 %v514_v9  ;;  %v516_v17 = vpack.c.bf16 %v28_v14, %v20_v12  ;;  %v512_v18 = vpack.c.bf16 %v42_v16, %v34_v15  ;;  %v37_v19 = vld [vmem:[%s744_s0 + $0x98] sm:$0xff]  ;;  %v36_v22 = vld [vmem:[%s744_s0 + $0x90] sm:$0xff]  ;;  %v51_v24 = vld [vmem:[%s744_s0 + $0x108] sm:$0xf] }
   0x6   :  { %509 = vmatpush1.bf16.msra.mxu0 %v508_v8  ;;  %v45_v20 = vld [vmem:[%s744_s0 + $0xd8] sm:$0xff]  ;;  %v44_v23 = vld [vmem:[%s744_s0 + $0xd0] sm:$0xff]  ;;  %v23_v26 = vld [vmem:[%s744_s0 + $0x28] sm:$0xff] }
   0x7   :  { %511 = vmatprep.subr.bf16.mxu0 %v510_v13  ;;  %v518_v21 = vpack.c.bf16 %v45_v20, %v37_v19  ;;  %517 = vmatpush1.bf16.msra.mxu1 %v516_v17  ;;  %v520_v25 = vpack.c.bf16 %v44_v23, %v36_v22  ;;  %v31_v27 = vld [vmem:[%s744_s0 + $0x68] sm:$0xff]  ;;  %v50_v28 = vld [vmem:[%s744_s0 + $0x100] sm:$0xf]  ;;  %v53_v32 = vld [vmem:[%s744_s0 + $0x118] sm:$0xf]  ;;  %v545_v17 = vmov 0  }
   0x8   :  { %v22_v29 = vld [vmem:[%s744_s0 + $0x20] sm:$0xff]  ;;  %v25_v33 = vld [vmem:[%s744_s0 + $0x38] sm:$0xff]  ;;  %v522_v35 = vpack.c.bf16 %v31_v27, %v23_v26  ;;  %v39_v36 = vld [vmem:[%s744_s0 + $0xa8] sm:$0xff]  ;;  %540 = vset.pattern.permute.xlu1 %v545_v17  ;;  %541 = vset.pattern.permute.xlu0 %v545_v17 }
   0x9   :  { %519 = vmatprep.subr.bf16.mxu1 %v518_v21  ;;  %v30_v30 = vld [vmem:[%s744_s0 + $0x60] sm:$0xff]  ;;  %v33_v34 = vld [vmem:[%s744_s0 + $0x78] sm:$0xff]  ;;  %v47_v37 = vld [vmem:[%s744_s0 + $0xe8] sm:$0xff] }
   0xa   :  { %513 = vmatpush1.bf16.msra.mxu0 %v512_v18  ;;  %v17_v31 = vld [vmem:[%s745_s1] sm:$0xf]  ;;  %v24_v38 = vld [vmem:[%s744_s0 + $0x30] sm:$0xff]  ;;  %v524_v39 = vpack.c.bf16 %v30_v30, %v22_v29  ;;  %v530_v43 = vpack.c.bf16 %v33_v34, %v25_v33  ;;  %v41_v45 = vld [vmem:[%s744_s0 + $0xb8] sm:$0xff]  ;;  %v526_v47 = vpack.c.bf16 %v47_v37, %v39_v36 }
   0xb   :  { %494 = vmatprep.subr.msk.mxu0 %vm62_vm0, %v51_v24  ;;  %521 = vmatpush1.bf16.msra.mxu1 %v520_v25  ;;  %v52_v40 = vld [vmem:[%s744_s0 + $0x110] sm:$0xf]  ;;  %v38_v42 = vld [vmem:[%s744_s0 + $0xa0] sm:$0xff]  ;;  %v49_v46 = vld [vmem:[%s744_s0 + $0xf8] sm:$0xff] }
   0xc   :  { %v32_v41 = vld [vmem:[%s744_s0 + $0x70] sm:$0xff]  ;;  %497 = vmatprep.subr.msk.mxu1 %vm62_vm0, %v53_v32  ;;  %v46_v44 = vld [vmem:[%s744_s0 + $0xe0] sm:$0xff]  ;;  %v534_v49 = vpack.c.bf16 %v49_v46, %v41_v45  ;;  %v55_v53 = vld [vmem:[%s744_s0 + $0x128] sm:$0xf] }
   0xd   :  { %v532_v48 = vpack.c.bf16 %v32_v41, %v24_v38  ;;  %v40_v50 = vld [vmem:[%s744_s0 + $0xb0] sm:$0xff]  ;;  %v528_v52 = vpack.c.bf16 %v46_v44, %v38_v42  ;;  %v57_v55 = vld [vmem:[%s744_s0 + $0x138] sm:$0xf]  ;;  %v54_v56 = vld [vmem:[%s744_s0 + $0x120] sm:$0xf] }
   0xe   :  { %495 = vmatpush1.msk.msra.mxu0 %vm62_vm0, %v50_v28  ;;  %v48_v51 = vld [vmem:[%s744_s0 + $0xf0] sm:$0xff]  ;;  %v371_v18 = vld [vmem:[%s746_s2] sm:$0xf] }
   0xf   :  { %496 = vmatmul.mubr.msk.f32.vlgmr.msra.gmra.mrb[0].mxu0 %vm58_vm1, %v17_v31  ;;  %523 = vmatprep.subr.bf16.mxu0 %v522_v35  ;;  %v536_v54 = vpack.c.bf16 %v48_v51, %v40_v50  ;;  %v56_v57 = vld [vmem:[%s744_s0 + $0x130] sm:$0xf]  ;;  %v372_v19 = vld [vmem:[%s747_s3] sm:$0xf] }
  0x10   :  { %525 = vmatpush1.bf16.msra.mxu0 %v524_v39  ;;  %498 = vmatpush1.msk.msra.mxu1 %vm62_vm0, %v52_v40 }
  0x11   :  { %499 = vmatmul.mubr.msk.f32.vlgmr.msra.gmra.mrb[0].mxu1 %vm58_vm1, %v17_v31  ;;  %531 = vmatprep.subr.bf16.mxu1 %v530_v43 }
  0x12   :  { %527 = vmatprep.subr.bf16.mxu0 %v526_v47  ;;  %533 = vmatpush1.bf16.msra.mxu1 %v532_v48 }
  0x13   :  { %535 = vmatprep.subr.bf16.mxu1 %v534_v49  ;;  %293 = vmatprep.mubr.f32.mxu0 %v544_v3 }
  0x14   :  { %529 = vmatpush1.bf16.msra.mxu0 %v528_v52  ;;  %364 = vmatprep.mubr.f32.mxu1 %v544_v3 }
  0x15   :  { %500 = vmatprep.subr.msk.mxu0 %vm62_vm0, %v55_v53  ;;  %438 = vperm.xlu1 %540, %v371_v18  }
  0x16   :  { %537 = vmatpush1.bf16.msra.mxu1 %v536_v54 }
  0x17   :  { %503 = vmatprep.subr.msk.mxu1 %vm62_vm0, %v57_v55 }
  0x18   :  { %501 = vmatpush1.msk.msra.mxu0 %vm62_vm0, %v54_v56 }
  0x19   :  { %502 = vmatmul.mubr.msk.f32.vlgmr.msra.gmra.mrb[2].mxu0 %vm58_vm1, %v17_v31  ;;  %451 = vperm.xlu1 %540, %v372_v19  }
  0x1a   :  { %504 = vmatpush1.msk.msra.mxu1 %vm62_vm0, %v56_v57 }
  0x1b   :  { %505 = vmatmul.mubr.msk.f32.vlgmr.msra.gmra.mrb[2].mxu1 %vm58_vm1, %v17_v31 }
  0x94   :  { %v439_v56 = vpop.permute.xlu1 %438 }
  0xe2   :  { %v153_v58 = vpop.f32.mrb[0].mxu0 }
  0xe3   :  { %v373_v59 = vsel %vm62_vm0, %v153_v58, 0.0  ;;  %v155_v60 = vpop.f32.mrb[1].mxu0 }
  0xe4   :  { %v374_v61 = vsel %vm62_vm0, %v155_v60, 0.0  ;;  %v224_v62 = vpop.f32.mrb[0].mxu1 }
  0xe5   :  { %v375_v63 = vadd.f32 %v374_v61, %v373_v59  ;;  %v376_v0 = vsel %vm62_vm0, %v224_v62, 0.0  ;;  %v226_v1 = vpop.f32.mrb[1].mxu1 }
  0xe6   :  { %v378_v2 = vsel %vm62_vm0, %v226_v1, 0.0 }
  0xe7   :  { %v377_v3 = vadd.f32 %v376_v0, %v375_v63 }
  0xe9   :  { %v379_v4 = vadd.f32 %v378_v2, %v377_v3 }
  0xec   :  { %v295_v5 = vpop.f32.mrb[2].mxu0 }
  0xed   :  { %v380_v6 = vsel %vm62_vm0, %v295_v5, 0.0  ;;  %v297_v7 = vpop.f32.mrb[3].mxu0 }
  0xee   :  { %v381_v8 = vadd.f32 %v380_v6, %v379_v4  ;;  %v382_v9 = vsel %vm62_vm0, %v297_v7, 0.0  ;;  %v366_v10 = vpop.f32.mrb[2].mxu1  ;;  %v452_v6 = vpop.permute.xlu1 %451 }
  0xef   :  { %v384_v11 = vsel %vm62_vm0, %v366_v10, 0.0  ;;  %v368_v12 = vpop.f32.mrb[3].mxu1 }
  0xf0   :  { %v383_v13 = vadd.f32 %v382_v9, %v381_v8  ;;  %v386_v15 = vsel %vm62_vm0, %v368_v12, 0.0 }
  0xf2   :  { %v385_v14 = vadd.f32 %v384_v11, %v383_v13 }
  0xf4   :  { %v387_v16 = vadd.f32 %v386_v15, %v385_v14 }
  0xf6   :  { %388 = vadd.xlane.f32.xlu0 %v387_v16 }
 0x183   :  { %v389_v20 = vpop.xlane.xlu0 %388 }
 0x184   :  { %v391_v21 = vmul.f32 0.0009765625, %v389_v20 }
 0x186   :  { %v392_v22 = vsub.f32 %v153_v58, %v391_v21  ;;  %v393_v23 = vsub.f32 %v155_v60, %v391_v21  ;;  %v394_v24 = vsub.f32 %v224_v62, %v391_v21  ;;  %v395_v25 = vsub.f32 %v226_v1, %v391_v21 }
 0x187   :  { %v396_v26 = vsub.f32 %v295_v5, %v391_v21  ;;  %v397_v30 = vsub.f32 %v297_v7, %v391_v21  ;;  %v398_v35 = vsub.f32 %v366_v10, %v391_v21  ;;  %v399_v39 = vsub.f32 %v368_v12, %v391_v21 }
 0x188   :  { %v400_v27 = vmul.f32 %v392_v22, %v392_v22  ;;  %v401_v28 = vmul.f32 %v393_v23, %v393_v23  ;;  %v402_v29 = vmul.f32 %v394_v24, %v394_v24  ;;  %v403_v31 = vmul.f32 %v395_v25, %v395_v25 }
 0x189   :  { %v404_v36 = vmul.f32 %v396_v26, %v396_v26  ;;  %v405_v40 = vmul.f32 %v397_v30, %v397_v30  ;;  %v406_v43 = vmul.f32 %v398_v35, %v398_v35  ;;  %v407_v46 = vmul.f32 %v399_v39, %v399_v39 }
 0x18a   :  { %v408_v32 = vsel %vm62_vm0, %v400_v27, 0.0  ;;  %v409_v33 = vsel %vm62_vm0, %v401_v28, 0.0  ;;  %v411_v37 = vsel %vm62_vm0, %v402_v29, 0.0  ;;  %v413_v41 = vsel %vm62_vm0, %v403_v31, 0.0 }
 0x18b   :  { %v410_v34 = vadd.f32 %v409_v33, %v408_v32  ;;  %v415_v44 = vsel %vm62_vm0, %v404_v36, 0.0  ;;  %v417_v47 = vsel %vm62_vm0, %v405_v40, 0.0  ;;  %v419_v49 = vsel %vm62_vm0, %v406_v43, 0.0 }
 0x18c   :  { %v421_v51 = vsel %vm62_vm0, %v407_v46, 0.0 }
 0x18d   :  { %v412_v38 = vadd.f32 %v411_v37, %v410_v34 }
 0x18f   :  { %v414_v42 = vadd.f32 %v413_v41, %v412_v38 }
 0x191   :  { %v416_v45 = vadd.f32 %v415_v44, %v414_v42 }
 0x193   :  { %v418_v48 = vadd.f32 %v417_v47, %v416_v45 }
 0x195   :  { %v420_v50 = vadd.f32 %v419_v49, %v418_v48 }
 0x197   :  { %v422_v52 = vadd.f32 %v421_v51, %v420_v50 }
 0x199   :  { %423 = vadd.xlane.f32.xlu0 %v422_v52 }
 0x226   :  { %v424_v53 = vpop.xlane.xlu0 %423 }
 0x227   :  { %v425_v54 = vmul.f32 0.0009765625, %v424_v53 }
 0x229   :  { %v426_v55 = vadd.f32 1e-05, %v425_v54 }
 0x22b   :  { %542 = vrsqrt.f32 %v426_v55 }
 0x235   :  { %v543_v57 = vpop.eup %542 }
 0x236   :  { %v428_v58 = vmul.f32 %v543_v57, %v392_v22  ;;  %v429_v59 = vmul.f32 %v543_v57, %v393_v23  ;;  %v430_v60 = vmul.f32 %v543_v57, %v394_v24  ;;  %v431_v61 = vmul.f32 %v543_v57, %v395_v25 }
 0x237   :  { %v432_v62 = vmul.f32 %v543_v57, %v396_v26  ;;  %v433_v63 = vmul.f32 %v543_v57, %v397_v30  ;;  %v434_v0 = vmul.f32 %v543_v57, %v398_v35  ;;  %v435_v1 = vmul.f32 %v543_v57, %v399_v39 }
 0x238   :  { %v441_v2 = vmul.f32 %v439_v56, %v428_v58  ;;  %v442_v3 = vmul.f32 %v439_v56, %v429_v59  ;;  %v443_v4 = vmul.f32 %v439_v56, %v430_v60  ;;  %v444_v5 = vmul.f32 %v439_v56, %v431_v61 }
 0x239   :  { %v445_v7 = vmul.f32 %v439_v56, %v432_v62  ;;  %v446_v8 = vmul.f32 %v439_v56, %v433_v63  ;;  %v447_v9 = vmul.f32 %v439_v56, %v434_v0  ;;  %v448_v10 = vmul.f32 %v439_v56, %v435_v1 }
 0x23a   :  { %v454_v11 = vadd.f32 %v452_v6, %v441_v2  ;;  %v455_v12 = vadd.f32 %v452_v6, %v442_v3  ;;  %v456_v13 = vadd.f32 %v452_v6, %v443_v4  ;;  %v457_v14 = vadd.f32 %v452_v6, %v444_v5 }
 0x23b   :  { %v458_v15 = vadd.f32 %v452_v6, %v445_v7  ;;  %v459_v16 = vadd.f32 %v452_v6, %v446_v8  ;;  %v460_v17 = vadd.f32 %v452_v6, %v447_v9  ;;  %v461_v18 = vadd.f32 %v452_v6, %v448_v10 }
 0x23c   :  { %v462_v19 = vmax.f32 %v454_v11, 0.0  ;;  %v463_v20 = vmax.f32 %v455_v12, 0.0  ;;  %v464_v21 = vmax.f32 %v456_v13, 0.0  ;;  %v465_v22 = vmax.f32 %v457_v14, 0.0 }
 0x23d   :  { %v466_v23 = vmax.f32 %v458_v15, 0.0  ;;  %v467_v24 = vmax.f32 %v459_v16, 0.0  ;;  %v468_v25 = vmax.f32 %v460_v17, 0.0  ;;  %v469_v26 = vmax.f32 %v461_v18, 0.0 }
 0x23e   :  { %v478_v27 = vcombine.low %v462_v19, %v463_v20  ;;  %v479_v28 = vcombine.low %v464_v21, %v465_v22 }
 0x23f   :  { %v480_v29 = vcombine.low %v466_v23, %v467_v24  ;;  %v481_v30 = vcombine.low %v468_v25, %v469_v26 }
 0x240   :  { %486 = vst [vmem:[%s748_s4] sm:$0xff] %v478_v27  ;;  %487 = vst [vmem:[%s748_s4 + $0x8] sm:$0xff] %v479_v28 }
 0x241   :  { %488 = vst [vmem:[%s748_s4 + $0x10] sm:$0xff] %v480_v29  ;;  %489 = vst [vmem:[%s748_s4 + $0x18] sm:$0xff] %v481_v30 }

// kernel: unet_forward.14
= control target key start
LH: loop header
LB: loop body
LE: loop exit
PB: predicated region body
PF: predicated region fallthrough
CT: control target
= control target key end

     0   :  { %v171_v3 = vmov 0.0   ;;  %vm32_vm0 = vcmask 1043456   ;;  %vm28_vm1 = vcmask 293888   ;;  %vm112_vm2 = vcmask 785408   ;;  %s246_s0 = inlined_call_operand.vmem [shape: f32[36,224], index: 0, kind: input, shape index: {}]   ;;  %s247_s1 = inlined_call_operand.vmem [shape: f32[8,36], index: 1, kind: input, shape index: {}]   ;;  %s248_s2 = inlined_call_operand.vmem [shape: f32[8,1], index: 2, kind: input, shape index: {}]   ;;  %s249_s3 = inlined_call_operand.vmem [shape: f32[8,1], index: 3, kind: input, shape index: {}]   ;;  %s250_s4 = inlined_call_operand.vmem [shape: f32[8,224], index: 4, kind: output, shape index: {}]  }
   0x1   :  { %v19_v0 = vld [vmem:[%s246_s0 + $0x8] sm:$0xff]  ;;  %v21_v1 = vld [vmem:[%s246_s0 + $0x18] sm:$0xff]  ;;  %v18_v2 = vld [vmem:[%s246_s0] sm:$0xff]  ;;  %103 = vmatprep.mubr.f32.mxu0 %v171_v3  ;;  %v172_v20 = vmov 0  }
   0x2   :  { %v157_v4 = vpack.c.bf16 %v21_v1, %v19_v0  ;;  %v20_v5 = vld [vmem:[%s246_s0 + $0x10] sm:$0xff]  ;;  %v23_v6 = vld [vmem:[%s246_s0 + $0x28] sm:$0xff]  ;;  %v25_v7 = vld [vmem:[%s246_s0 + $0x38] sm:$0xff]  ;;  %167 = vset.pattern.permute.xlu1 %v172_v20  ;;  %168 = vset.pattern.permute.xlu0 %v172_v20 }
   0x3   :  { %v159_v8 = vpack.c.bf16 %v20_v5, %v18_v2  ;;  %v161_v9 = vpack.c.bf16 %v25_v7, %v23_v6  ;;  %v22_v10 = vld [vmem:[%s246_s0 + $0x20] sm:$0xff]  ;;  %v24_v11 = vld [vmem:[%s246_s0 + $0x30] sm:$0xff]  ;;  %v27_v13 = vld [vmem:[%s246_s0 + $0x48] sm:$0xf] }
   0x4   :  { %158 = vmatprep.subr.bf16.mxu0 %v157_v4  ;;  %v163_v12 = vpack.c.bf16 %v24_v11, %v22_v10  ;;  %v26_v14 = vld [vmem:[%s246_s0 + $0x40] sm:$0xf] }
   0x5   :  { %160 = vmatpush1.bf16.msra.mxu0 %v159_v8  ;;  %v17_v15 = vld [vmem:[%s247_s1] sm:$0xff] }
   0x6   :  { %162 = vmatprep.subr.bf16.mxu0 %v161_v9  ;;  %v110_v21 = vld [vmem:[%s248_s2] sm:$0xff] }
   0x7   :  { %134 = vperm.xlu1 %167, %v110_v21   ;;  %v111_v22 = vld [vmem:[%s249_s3] sm:$0xff] }
   0x9   :  { %164 = vmatpush1.bf16.msra.mxu0 %v163_v12 }
   0xa   :  { %154 = vmatprep.subr.msk.mxu0 %vm32_vm0, %v27_v13 }
   0xb   :  { %141 = vperm.xlu1 %167, %v111_v22  }
   0xd   :  { %155 = vmatpush1.msk.msra.mxu0 %vm32_vm0, %v26_v14 }
   0xe   :  { %156 = vmatmul.mubr.msk.f32.vlgmr.msra.gmra.mrb[0].mxu0 %vm28_vm1, %v17_v15 }
  0x86   :  { %v135_v34 = vpop.permute.xlu1 %134 }
  0x8a   :  { %v142_v40 = vpop.permute.xlu1 %141 }
  0xe1   :  { %v105_v16 = vpop.f32.mrb[0].mxu0 }
  0xe2   :  { %v107_v17 = vpop.f32.mrb[1].mxu0 }
  0xe3   :  { %v113_v18 = vsel %vm112_vm2, %v107_v17, 0.0 }
  0xe4   :  { %v114_v19 = vadd.f32 %v113_v18, %v105_v16 }
  0xe6   :  { %115 = vadd.xlane.f32.xlu0 %v114_v19 }
 0x173   :  { %v116_v23 = vpop.xlane.xlu0 %115 }
 0x174   :  { %v118_v24 = vmul.f32 0.004464286, %v116_v23 }
 0x176   :  { %v119_v25 = vsub.f32 %v105_v16, %v118_v24  ;;  %v120_v26 = vsub.f32 %v107_v17, %v118_v24 }
 0x178   :  { %v121_v27 = vmul.f32 %v119_v25, %v119_v25  ;;  %v122_v28 = vmul.f32 %v120_v26, %v120_v26 }
 0x17a   :  { %v123_v29 = vsel %vm112_vm2, %v122_v28, 0.0 }
 0x17b   :  { %v124_v30 = vadd.f32 %v123_v29, %v121_v27 }
 0x17d   :  { %125 = vadd.xlane.f32.xlu0 %v124_v30 }
 0x20a   :  { %v126_v31 = vpop.xlane.xlu0 %125 }
 0x20b   :  { %v127_v32 = vmul.f32 0.004464286, %v126_v31 }
 0x20d   :  { %v128_v33 = vadd.f32 1e-05, %v127_v32 }
 0x20f   :  { %169 = vrsqrt.f32 %v128_v33 }
 0x219   :  { %v170_v35 = vpop.eup %169 }
 0x21a   :  { %v130_v36 = vmul.f32 %v170_v35, %v119_v25  ;;  %v131_v37 = vmul.f32 %v170_v35, %v120_v26 }
 0x21c   :  { %v137_v38 = vmul.f32 %v135_v34, %v130_v36  ;;  %v138_v39 = vmul.f32 %v135_v34, %v131_v37 }
 0x21e   :  { %v144_v41 = vadd.f32 %v142_v40, %v137_v38  ;;  %v145_v42 = vadd.f32 %v142_v40, %v138_v39 }
 0x220   :  { %v146_v43 = vmax.f32 %v144_v41, 0.0  ;;  %v147_v44 = vmax.f32 %v145_v42, 0.0 }
 0x222   :  { %148 = vst [vmem:[%s250_s4] sm:$0xff] %v146_v43  ;;  %149 = vst.msk [vmem:[%s250_s4 + $0x8] sm:$0xff] %vm112_vm2, %v147_v44 }

// kernel: unet_forward.15
= control target key start
LH: loop header
LB: loop body
LE: loop exit
PB: predicated region body
PF: predicated region fallthrough
CT: control target
= control target key end

     0   :  { %v178_v3 = vmov 0.0   ;;  %vm36_vm0 = vcmask 588800   ;;  %vm113_vm1 = vcmask 523264   ;;  %v179_v32 = vmov 0   ;;  %s277_s0 = inlined_call_operand.vmem [shape: f32[72,192], index: 0, kind: input, shape index: {}]   ;;  %s278_s1 = inlined_call_operand.vmem [shape: f32[8,72], index: 1, kind: input, shape index: {}]   ;;  %s279_s2 = inlined_call_operand.vmem [shape: f32[8,1], index: 2, kind: input, shape index: {}]   ;;  %s280_s3 = inlined_call_operand.vmem [shape: f32[8,1], index: 3, kind: input, shape index: {}]   ;;  %s281_s4 = inlined_call_operand.vmem [shape: f32[8,192], index: 4, kind: output, shape index: {}]  }
   0x1   :  { %v19_v0 = vld [vmem:[%s277_s0 + $0x8] sm:$0xff]  ;;  %v21_v1 = vld [vmem:[%s277_s0 + $0x18] sm:$0xff]  ;;  %v18_v2 = vld [vmem:[%s277_s0] sm:$0xff]  ;;  %104 = vmatprep.mubr.f32.mxu0 %v178_v3  ;;  %174 = vset.pattern.permute.xlu1 %v179_v32 }
   0x2   :  { %v156_v4 = vpack.c.bf16 %v21_v1, %v19_v0  ;;  %v20_v5 = vld [vmem:[%s277_s0 + $0x10] sm:$0xff]  ;;  %v23_v6 = vld [vmem:[%s277_s0 + $0x28] sm:$0xff]  ;;  %v25_v7 = vld [vmem:[%s277_s0 + $0x38] sm:$0xff]  ;;  %175 = vset.pattern.permute.xlu0 %v179_v32 }
   0x3   :  { %v158_v8 = vpack.c.bf16 %v20_v5, %v18_v2  ;;  %v160_v9 = vpack.c.bf16 %v25_v7, %v23_v6  ;;  %v22_v10 = vld [vmem:[%s277_s0 + $0x20] sm:$0xff]  ;;  %v24_v11 = vld [vmem:[%s277_s0 + $0x30] sm:$0xff]  ;;  %v27_v12 = vld [vmem:[%s277_s0 + $0x48] sm:$0xff] }
   0x4   :  { %157 = vmatprep.subr.bf16.mxu0 %v156_v4  ;;  %v29_v13 = vld [vmem:[%s277_s0 + $0x58] sm:$0xff]  ;;  %v162_v14 = vpack.c.bf16 %v24_v11, %v22_v10  ;;  %v26_v16 = vld [vmem:[%s277_s0 + $0x40] sm:$0xff]  ;;  %v28_v17 = vld [vmem:[%s277_s0 + $0x50] sm:$0xff] }
   0x5   :  { %159 = vmatpush1.bf16.msra.mxu0 %v158_v8  ;;  %v164_v15 = vpack.c.bf16 %v29_v13, %v27_v12  ;;  %v31_v18 = vld [vmem:[%s277_s0 + $0x68] sm:$0xff]  ;;  %v33_v19 = vld [vmem:[%s277_s0 + $0x78] sm:$0xff]  ;;  %v166_v20 = vpack.c.bf16 %v28_v17, %v26_v16  ;;  %v30_v22 = vld [vmem:[%s277_s0 + $0x60] sm:$0xff] }
   0x6   :  { %161 = vmatprep.subr.bf16.mxu0 %v160_v9  ;;  %v168_v21 = vpack.c.bf16 %v33_v19, %v31_v18  ;;  %v32_v23 = vld [vmem:[%s277_s0 + $0x70] sm:$0xff]  ;;  %v35_v25 = vld [vmem:[%s277_s0 + $0x88] sm:$0xff]  ;;  %v34_v26 = vld [vmem:[%s277_s0 + $0x80] sm:$0xff] }
   0x7   :  { %v170_v24 = vpack.c.bf16 %v32_v23, %v30_v22  ;;  %v17_v27 = vld [vmem:[%s278_s1] sm:$0xff] }
   0x8   :  { %v111_v33 = vld [vmem:[%s279_s2] sm:$0xff] }
   0x9   :  { %163 = vmatpush1.bf16.msra.mxu0 %v162_v14  ;;  %135 = vperm.xlu1 %174, %v111_v33   ;;  %v112_v34 = vld [vmem:[%s280_s3] sm:$0xff] }
   0xa   :  { %165 = vmatprep.subr.bf16.mxu0 %v164_v15 }
   0xd   :  { %167 = vmatpush1.bf16.msra.mxu0 %v166_v20  ;;  %142 = vperm.xlu1 %174, %v112_v34  }
   0xe   :  { %169 = vmatprep.subr.bf16.mxu0 %v168_v21 }
  0x11   :  { %171 = vmatpush1.bf16.msra.mxu0 %v170_v24 }
  0x12   :  { %56 = vmatprep.subr.mxu0 %v35_v25 }
  0x15   :  { %57 = vmatpush1.msra.mxu0 %v34_v26 }
  0x16   :  { %155 = vmatmul.mubr.msk.f32.vlgmr.msra.gmra.mrb[0].mxu0 %vm36_vm0, %v17_v27 }
  0x88   :  { %v136_v46 = vpop.permute.xlu1 %135 }
  0x8c   :  { %v143_v52 = vpop.permute.xlu1 %142 }
  0xe9   :  { %v106_v28 = vpop.f32.mrb[0].mxu0 }
  0xea   :  { %v108_v29 = vpop.f32.mrb[1].mxu0 }
  0xeb   :  { %v114_v30 = vsel %vm113_vm1, %v108_v29, 0.0 }
  0xec   :  { %v115_v31 = vadd.f32 %v114_v30, %v106_v28 }
  0xee   :  { %116 = vadd.xlane.f32.xlu0 %v115_v31 }
 0x17b   :  { %v117_v35 = vpop.xlane.xlu0 %116 }
 0x17c   :  { %v119_v36 = vmul.f32 0.0052083335, %v117_v35 }
 0x17e   :  { %v120_v37 = vsub.f32 %v106_v28, %v119_v36  ;;  %v121_v38 = vsub.f32 %v108_v29, %v119_v36 }
 0x180   :  { %v122_v39 = vmul.f32 %v120_v37, %v120_v37  ;;  %v123_v40 = vmul.f32 %v121_v38, %v121_v38 }
 0x182   :  { %v124_v41 = vsel %vm113_vm1, %v123_v40, 0.0 }
 0x183   :  { %v125_v42 = vadd.f32 %v124_v41, %v122_v39 }
 0x185   :  { %126 = vadd.xlane.f32.xlu0 %v125_v42 }
 0x212   :  { %v127_v43 = vpop.xlane.xlu0 %126 }
 0x213   :  { %v128_v44 = vmul.f32 0.0052083335, %v127_v43 }
 0x215   :  { %v129_v45 = vadd.f32 1e-05, %v128_v44 }
 0x217   :  { %176 = vrsqrt.f32 %v129_v45 }
 0x221   :  { %v177_v47 = vpop.eup %176 }
 0x222   :  { %v131_v48 = vmul.f32 %v177_v47, %v120_v37  ;;  %v132_v49 = vmul.f32 %v177_v47, %v121_v38 }
 0x224   :  { %v138_v50 = vmul.f32 %v136_v46, %v131_v48  ;;  %v139_v51 = vmul.f32 %v136_v46, %v132_v49 }
 0x226   :  { %v145_v53 = vadd.f32 %v143_v52, %v138_v50  ;;  %v146_v54 = vadd.f32 %v143_v52, %v139_v51 }
 0x228   :  { %v147_v55 = vmax.f32 %v145_v53, 0.0  ;;  %v148_v56 = vmax.f32 %v146_v54, 0.0 }
 0x22a   :  { %149 = vst [vmem:[%s281_s4] sm:$0xff] %v147_v55  ;;  %150 = vst.msk [vmem:[%s281_s4 + $0x8] sm:$0xff] %vm113_vm1, %v148_v56 }

// kernel: unet_forward.16
= control target key start
LH: loop header
LB: loop body
LE: loop exit
PB: predicated region body
PF: predicated region fallthrough
CT: control target
= control target key end

     0   :  { %vm28_vm0 = vcmask 588800   ;;  %v231_v15 = vmov 0   ;;  %vm114_vm1 = vcmask 261120   ;;  %s316_s0 = inlined_call_operand.vmem [shape: f32[72,32], index: 0, kind: input, shape index: {}]   ;;  %s317_s1 = inlined_call_operand.vmem [shape: f32[16,72], index: 1, kind: input, shape index: {}]   ;;  %s318_s2 = inlined_call_operand.vmem [shape: f32[16,1], index: 2, kind: input, shape index: {}]   ;;  %s319_s3 = inlined_call_operand.vmem [shape: f32[16,1], index: 3, kind: input, shape index: {}]   ;;  %s320_s4 = inlined_call_operand.vmem [shape: f32[16,32], index: 4, kind: output, shape index: {}]  }
   0x1   :  { %v19_v0 = vld [vmem:[%s316_s0] sm:$0xff]  ;;  %v20_v1 = vld [vmem:[%s316_s0 + $0x8] sm:$0xff]  ;;  %v21_v2 = vld [vmem:[%s316_s0 + $0x10] sm:$0xff]  ;;  %226 = vset.pattern.permute.xlu1 %v231_v15  ;;  %225 = vset.pattern.permute.xlu0 %v231_v15 }
   0x2   :  { %v208_v3 = vpack.c.bf16 %v20_v1, %v19_v0  ;;  %v22_v4 = vld [vmem:[%s316_s0 + $0x18] sm:$0xff]  ;;  %v23_v6 = vld [vmem:[%s316_s0 + $0x20] sm:$0xff]  ;;  %v24_v7 = vld [vmem:[%s316_s0 + $0x28] sm:$0xff] }
   0x3   :  { %v212_v5 = vpack.c.bf16 %v22_v4, %v21_v2  ;;  %v17_v8 = vld [vmem:[%s317_s1] sm:$0xff]  ;;  %v216_v9 = vpack.c.bf16 %v24_v7, %v23_v6  ;;  %v25_v10 = vld [vmem:[%s316_s0 + $0x30] sm:$0xff]  ;;  %v26_v11 = vld [vmem:[%s316_s0 + $0x38] sm:$0xff] }
   0x4   :  { %209 = vmatprep.subr.bf16.mxu0 %v208_v3  ;;  %205 = vmatprep.mubr.msk.f32.mxu0 %vm28_vm0, %v17_v8  ;;  %v220_v12 = vpack.c.bf16 %v26_v11, %v25_v10  ;;  %v27_v13 = vld [vmem:[%s316_s0 + $0x40] sm:$0xff]  ;;  %v18_v14 = vld [vmem:[%s317_s1 + $0x8] sm:$0xff] }
   0x5   :  { %211 = vmatpush3.bf16.msra.mxu0 %v208_v3  ;;  %v111_v16 = vld [vmem:[%s318_s2 + $0x8] sm:$0xff]  ;;  %v112_v17 = vld [vmem:[%s319_s3] sm:$0xff] }
   0x6   :  { %213 = vmatprep.subr.bf16.mxu0 %v212_v5  ;;  %149 = vperm.xlu1 %226, %v111_v16   ;;  %v110_v22 = vld [vmem:[%s318_s2] sm:$0xff]  ;;  %v113_v33 = vld [vmem:[%s319_s3 + $0x8] sm:$0xff] }
   0x9   :  { %215 = vmatpush3.bf16.msra.mxu0 %v212_v5 }
   0xa   :  { %217 = vmatprep.subr.bf16.mxu0 %v216_v9  ;;  %156 = vperm.xlu1 %226, %v112_v17  }
   0xd   :  { %219 = vmatpush3.bf16.msra.mxu0 %v216_v9 }
   0xe   :  { %221 = vmatprep.subr.bf16.mxu0 %v220_v12 }
  0x11   :  { %223 = vmatpush3.bf16.msra.mxu0 %v220_v12 }
  0x12   :  { %203 = vmatprep.subr.mxu0 %v27_v13 }
  0x15   :  { %204 = vmatpush3.msra.mxu0 %v27_v13 }
  0x16   :  { %206 = vmatmul.mubr.msk.f32.vlgmr.msra.gmra.mrb[0].mxu0 %vm28_vm0, %v18_v14 }
  0x85   :  { %v150_v34 = vpop.permute.xlu1 %149 }
  0x89   :  { %v157_v35 = vpop.permute.xlu1 %156 }
  0xe9   :  { %v207_v18 = vpop.f32.mrb[0].mxu0 }
  0xea   :  { %v101_v19 = vpop.f32.mrb[1].mxu0  ;;  %v118_v21 = vsel %vm114_vm1, %v207_v18, 0.0 }
  0xeb   :  { %v115_v20 = vsel %vm114_vm1, %v101_v19, 0.0 }
  0xec   :  { %116 = vadd.xlane.f32.xlu0 %v115_v20 }
  0xf0   :  { %119 = vadd.xlane.f32.xlu0 %v118_v21 }
 0x106   :  { %144 = vperm.xlu0 %225, %v110_v22  }
 0x179   :  { %v117_v23 = vpop.xlane.xlu0 %116 }
 0x17a   :  { %v122_v24 = vmul.f32 0.03125, %v117_v23 }
 0x17c   :  { %v124_v27 = vsub.f32 %v101_v19, %v122_v24 }
 0x17d   :  { %v120_v25 = vpop.xlane.xlu0 %119 }
 0x17e   :  { %v123_v26 = vmul.f32 0.03125, %v120_v25  ;;  %v126_v31 = vmul.f32 %v124_v27, %v124_v27 }
 0x180   :  { %v125_v28 = vsub.f32 %v207_v18, %v123_v26  ;;  %v128_v32 = vsel %vm114_vm1, %v126_v31, 0.0 }
 0x182   :  { %v127_v29 = vmul.f32 %v125_v28, %v125_v28 }
 0x184   :  { %v131_v30 = vsel %vm114_vm1, %v127_v29, 0.0 }
 0x185   :  { %132 = vadd.xlane.f32.xlu1 %v131_v30  ;;  %v145_v47 = vpop.permute.xlu0 %144 }
 0x189   :  { %129 = vadd.xlane.f32.xlu1 %v128_v32 }
 0x19a   :  { %161 = vperm.xlu1 %226, %v113_v33  }
 0x212   :  { %v133_v36 = vpop.xlane.xlu1 %132 }
 0x213   :  { %v135_v37 = vmul.f32 0.03125, %v133_v36 }
 0x215   :  { %v137_v38 = vadd.f32 1e-05, %v135_v37 }
 0x216   :  { %v130_v39 = vpop.xlane.xlu1 %129 }
 0x217   :  { %227 = vrsqrt.f32 %v137_v38  ;;  %v134_v40 = vmul.f32 0.03125, %v130_v39 }
 0x219   :  { %v136_v41 = vadd.f32 1e-05, %v134_v40 }
 0x21a   :  { %v162_v46 = vpop.permute.xlu1 %161 }
 0x21b   :  { %229 = vrsqrt.f32 %v136_v41 }
 0x221   :  { %v228_v42 = vpop.eup %227 }
 0x222   :  { %v141_v43 = vmul.f32 %v228_v42, %v125_v28 }
 0x224   :  { %v153_v44 = vmul.f32 %v150_v34, %v141_v43 }
 0x225   :  { %v230_v45 = vpop.eup %229 }
 0x226   :  { %v165_v48 = vadd.f32 %v162_v46, %v153_v44  ;;  %v140_v49 = vmul.f32 %v230_v45, %v124_v27 }
 0x228   :  { %v167_v50 = vmax.f32 %v165_v48, 0.0  ;;  %v152_v51 = vmul.f32 %v145_v47, %v140_v49 }
 0x22a   :  { %169 = vst.msk [vmem:[%s320_s4 + $0x8] sm:$0xff] %vm114_vm1, %v167_v50  ;;  %v164_v52 = vadd.f32 %v157_v35, %v152_v51 }
 0x22c   :  { %v166_v53 = vmax.f32 %v164_v52, 0.0 }
 0x22e   :  { %168 = vst.msk [vmem:[%s320_s4] sm:$0xff] %vm114_vm1, %v166_v53 }

// kernel: unet_forward.17
= control target key start
LH: loop header
LB: loop body
LE: loop exit
PB: predicated region body
PF: predicated region fallthrough
CT: control target
= control target key end

     0   :  { %v321_v0 = vmov 0.0|0.0   ;;  %vm42_vm0 = vcmask 130048   ;;  %v322_v32 = vmov 0   ;;  %v323_v59 = vmov 0.0   ;;  %s464_s0 = inlined_call_operand.vmem [shape: f32[144,16], index: 0, kind: input, shape index: {}]   ;;  %s465_s1 = inlined_call_operand.vmem [shape: f32[16,144], index: 1, kind: input, shape index: {}]   ;;  %s466_s3 = inlined_call_operand.vmem [shape: f32[16,1], index: 3, kind: input, shape index: {}]   ;;  %s467_s2 = inlined_call_operand.vmem [shape: f32[16,1], index: 2, kind: input, shape index: {}]   ;;  %s468_s4 = inlined_call_operand.vmem [shape: f32[16,224], index: 4, kind: input, shape index: {}]   ;;  %s469_s5 = inlined_call_operand.vmem [shape: f32[16,224], index: 5, kind: output, shape index: {}]  }
   0x1   :  { %281 = vmatprep.subr.bf16.mxu0 %v321_v0  ;;  %v24_v1 = vld [vmem:[%s464_s0] sm:$0xff]  ;;  %v25_v2 = vld [vmem:[%s464_s0 + $0x8] sm:$0xff]  ;;  %v26_v3 = vld [vmem:[%s464_s0 + $0x10] sm:$0xff]  ;;  %316 = vset.pattern.permute.xlu1 %v322_v32  ;;  %vm269_vm1 = vcmask 785408  }
   0x2   :  { %v282_v4 = vpack.c.bf16 %v25_v2, %v24_v1  ;;  %v27_v5 = vld [vmem:[%s464_s0 + $0x18] sm:$0xff]  ;;  %v28_v7 = vld [vmem:[%s464_s0 + $0x20] sm:$0xff]  ;;  %v29_v8 = vld [vmem:[%s464_s0 + $0x28] sm:$0xff]  ;;  %315 = vset.pattern.permute.xlu0 %v322_v32  ;;  %255 = vmatprep.mubr.f32.mxu1 %v323_v59 }
   0x3   :  { %v285_v6 = vpack.c.bf16 %v27_v5, %v26_v3  ;;  %v21_v9 = vld [vmem:[%s465_s1 + $0x8] sm:$0xff]  ;;  %v288_v10 = vpack.c.bf16 %v29_v8, %v28_v7  ;;  %v30_v11 = vld [vmem:[%s464_s0 + $0x30] sm:$0xff]  ;;  %v31_v12 = vld [vmem:[%s464_s0 + $0x38] sm:$0xff] }
   0x4   :  { %283 = vmatpush1.bf16.msra.mxu0 %v282_v4  ;;  %277 = vmatprep.mubr.msk.f32.mxu0 %vm42_vm0, %v21_v9  ;;  %v291_v13 = vpack.c.bf16 %v31_v12, %v30_v11  ;;  %v32_v14 = vld [vmem:[%s464_s0 + $0x40] sm:$0xff]  ;;  %v33_v15 = vld [vmem:[%s464_s0 + $0x48] sm:$0xff]  ;;  %v34_v17 = vld [vmem:[%s464_s0 + $0x50] sm:$0xff] }
   0x5   :  { %284 = vmatprep.subr.bf16.mxu0 %v321_v0  ;;  %v294_v16 = vpack.c.bf16 %v33_v15, %v32_v14  ;;  %v35_v18 = vld [vmem:[%s464_s0 + $0x58] sm:$0xff]  ;;  %v36_v20 = vld [vmem:[%s464_s0 + $0x60] sm:$0xff]  ;;  %v37_v21 = vld [vmem:[%s464_s0 + $0x68] sm:$0xff] }
   0x6   :  { %v297_v19 = vpack.c.bf16 %v35_v18, %v34_v17  ;;  %v300_v22 = vpack.c.bf16 %v37_v21, %v36_v20  ;;  %v38_v23 = vld [vmem:[%s464_s0 + $0x70] sm:$0xff]  ;;  %v39_v24 = vld [vmem:[%s464_s0 + $0x78] sm:$0xff]  ;;  %v40_v26 = vld [vmem:[%s464_s0 + $0x80] sm:$0xff] }
   0x7   :  { %v303_v25 = vpack.c.bf16 %v39_v24, %v38_v23  ;;  %v41_v27 = vld [vmem:[%s464_s0 + $0x88] sm:$0xff]  ;;  %v20_v29 = vld [vmem:[%s465_s1] sm:$0xff]  ;;  %v23_v30 = vld [vmem:[%s465_s1 + $0x18] sm:$0xff] }
   0x8   :  { %286 = vmatpush1.bf16.msra.mxu0 %v285_v6  ;;  %v306_v28 = vpack.c.bf16 %v41_v27, %v40_v26  ;;  %v22_v31 = vld [vmem:[%s465_s1 + $0x10] sm:$0xff]  ;;  %v126_v33 = vld [vmem:[%s466_s3] sm:$0xff]  ;;  %v125_v34 = vld [vmem:[%s467_s2 + $0x8] sm:$0xff] }
   0x9   :  { %287 = vmatprep.subr.bf16.mxu0 %v321_v0  ;;  %169 = vperm.xlu1 %316, %v126_v33   ;;  %v124_v41 = vld [vmem:[%s467_s2] sm:$0xff]  ;;  %v127_v52 = vld [vmem:[%s466_s3 + $0x8] sm:$0xff]  ;;  %v184_v54 = vld [vmem:[%s468_s4 + $0x18] sm:$0xff] }
   0xa   :  { %v182_v53 = vld [vmem:[%s468_s4 + $0x8] sm:$0xff]  ;;  %v181_v56 = vld [vmem:[%s468_s4] sm:$0xff]  ;;  %v183_v57 = vld [vmem:[%s468_s4 + $0x10] sm:$0xff] }
   0xb   :  { %v308_v55 = vpack.c.bf16 %v184_v54, %v182_v53  ;;  %v310_v58 = vpack.c.bf16 %v183_v57, %v181_v56 }
   0xc   :  { %289 = vmatpush1.bf16.msra.mxu0 %v288_v10 }
   0xd   :  { %290 = vmatprep.subr.bf16.mxu0 %v321_v0  ;;  %162 = vperm.xlu1 %316, %v125_v34  }
   0xe   :  { %309 = vmatprep.subr.bf16.mxu1 %v308_v55 }
   0xf   :  { %311 = vmatpush1.bf16.msra.mxu1 %v310_v58 }
  0x10   :  { %292 = vmatpush1.bf16.msra.mxu0 %v291_v13 }
  0x11   :  { %293 = vmatprep.subr.bf16.mxu0 %v321_v0 }
  0x14   :  { %295 = vmatpush1.bf16.msra.mxu0 %v294_v16 }
  0x15   :  { %296 = vmatprep.subr.bf16.mxu0 %v321_v0 }
  0x18   :  { %298 = vmatpush1.bf16.msra.mxu0 %v297_v19 }
  0x19   :  { %299 = vmatprep.subr.bf16.mxu0 %v321_v0 }
  0x1c   :  { %301 = vmatpush1.bf16.msra.mxu0 %v300_v22 }
  0x1d   :  { %302 = vmatprep.subr.bf16.mxu0 %v321_v0 }
  0x20   :  { %304 = vmatpush1.bf16.msra.mxu0 %v303_v25 }
  0x21   :  { %305 = vmatprep.subr.bf16.mxu0 %v321_v0 }
  0x24   :  { %307 = vmatpush1.bf16.msra.mxu0 %v306_v28 }
  0x27   :  { %114 = vmatmul.mubr.f32.vlgmr.msra.gmra.mrb[0].mxu0 %v20_v29 }
  0x28   :  { %278 = vmatprep.mubr.msk.f32.mxu0 %vm42_vm0, %v23_v30 }
  0x2b   :  { %119 = vmatmul.mubr.f32.gmra.mrb[2].mxu0 %v22_v31 }
  0x88   :  { %v170_v60 = vpop.permute.xlu1 %169 }
  0x8c   :  { %v163_v61 = vpop.permute.xlu1 %162 }
  0xfa   :  { %v115_v35 = vpop.f32.mrb[0].mxu0 }
  0xfb   :  { %v117_v36 = vpop.f32.mrb[1].mxu0  ;;  %v128_v37 = vsel %vm42_vm0, %v115_v35, 0.0 }
  0xfc   :  { %129 = vadd.xlane.f32.xlu0 %v128_v37 }
  0xfe   :  { %v120_v38 = vpop.f32.mrb[2].mxu0 }
  0xff   :  { %v122_v39 = vpop.f32.mrb[3].mxu0  ;;  %v131_v40 = vsel %vm42_vm0, %v120_v38, 0.0 }
 0x100   :  { %132 = vadd.xlane.f32.xlu0 %v131_v40 }
 0x116   :  { %157 = vperm.xlu0 %315, %v124_v41  }
 0x189   :  { %v130_v42 = vpop.xlane.xlu0 %129 }
 0x18a   :  { %v135_v43 = vmul.f32 0.0625, %v130_v42 }
 0x18c   :  { %v137_v44 = vsub.f32 %v115_v35, %v135_v43 }
 0x18d   :  { %v133_v45 = vpop.xlane.xlu0 %132 }
 0x18e   :  { %v136_v46 = vmul.f32 0.0625, %v133_v45  ;;  %v139_v47 = vmul.f32 %v137_v44, %v137_v44 }
 0x190   :  { %v138_v48 = vsub.f32 %v120_v38, %v136_v46  ;;  %v141_v49 = vsel %vm42_vm0, %v139_v47, 0.0 }
 0x191   :  { %142 = vadd.xlane.f32.xlu1 %v141_v49 }
 0x192   :  { %v140_v50 = vmul.f32 %v138_v48, %v138_v48 }
 0x194   :  { %v144_v51 = vsel %vm42_vm0, %v140_v50, 0.0 }
 0x195   :  { %145 = vadd.xlane.f32.xlu1 %v144_v51  ;;  %v158_v5 = vpop.permute.xlu0 %157 }
 0x1a6   :  { %174 = vperm.xlu1 %316, %v127_v52  }
 0x21e   :  { %v143_v62 = vpop.xlane.xlu1 %142 }
 0x21f   :  { %v147_v63 = vmul.f32 0.0625, %v143_v62 }
 0x221   :  { %v149_v0 = vadd.f32 1e-05, %v147_v63 }
 0x222   :  { %v146_v1 = vpop.xlane.xlu1 %145 }
 0x223   :  { %317 = vrsqrt.f32 %v149_v0  ;;  %v148_v2 = vmul.f32 0.0625, %v146_v1 }
 0x225   :  { %v150_v3 = vadd.f32 1e-05, %v148_v2 }
 0x226   :  { %v175_v13 = vpop.permute.xlu1 %174 }
 0x227   :  { %319 = vrsqrt.f32 %v150_v3 }
 0x22d   :  { %v318_v4 = vpop.eup %317 }
 0x22e   :  { %v153_v6 = vmul.f32 %v318_v4, %v137_v44 }
 0x230   :  { %v165_v7 = vmul.f32 %v158_v5, %v153_v6 }
 0x231   :  { %v320_v8 = vpop.eup %319 }
 0x232   :  { %v154_v9 = vmul.f32 %v320_v8, %v138_v48  ;;  %v177_v10 = vadd.f32 %v170_v60, %v165_v7 }
 0x234   :  { %v166_v11 = vmul.f32 %v163_v61, %v154_v9  ;;  %v179_v12 = vmax.f32 %v177_v10, 0.0 }
 0x236   :  { %v178_v14 = vadd.f32 %v175_v13, %v166_v11  ;;  %279 = vmatmul.mubr.msk.f32.vlgmr.msra.gmra.mrb[0].mxu1 %vm42_vm0, %v179_v12 }
 0x237   :  { %261 = vmatprep.mubr.f32.mxu1 %v323_v59 }
 0x238   :  { %v180_v15 = vmax.f32 %v178_v14, 0.0 }
 0x23a   :  { %280 = vmatmul.mubr.msk.f32.gmra.mrb[2].mxu1 %vm42_vm0, %v180_v15 }
 0x309   :  { %v257_v16 = vpop.f32.mrb[0].mxu1 }
 0x30a   :  { %268 = vst [vmem:[%s469_s5] sm:$0xff] %v257_v16  ;;  %v259_v17 = vpop.f32.mrb[1].mxu1 }
 0x30b   :  { %270 = vst.msk [vmem:[%s469_s5 + $0x8] sm:$0xff] %vm269_vm1, %v259_v17 }
 0x30d   :  { %v263_v18 = vpop.f32.mrb[2].mxu1 }
 0x30e   :  { %271 = vst [vmem:[%s469_s5 + $0x10] sm:$0xff] %v263_v18  ;;  %v265_v19 = vpop.f32.mrb[3].mxu1 }
 0x30f   :  { %272 = vst.msk [vmem:[%s469_s5 + $0x18] sm:$0xff] %vm269_vm1, %v265_v19 }

// kernel: unet_forward.18
= control target key start
LH: loop header
LB: loop body
LE: loop exit
PB: predicated region body
PF: predicated region fallthrough
CT: control target
= control target key end

     0   :  { %v179_v3 = vmov 0   ;;  %vm58_vm0 = vcmask 130048   ;;  %vm134_vm1 = vcmask 523264   ;;  %s323_s0 = inlined_call_operand.vmem [shape: f32[144,192], index: 0, kind: input, shape index: {}]   ;;  %s324_s1 = inlined_call_operand.vmem [shape: f32[8,144], index: 1, kind: input, shape index: {}]   ;;  %s325_s2 = inlined_call_operand.vmem [shape: f32[8,1], index: 2, kind: input, shape index: {}]   ;;  %s326_s3 = inlined_call_operand.vmem [shape: f32[8,192], index: 3, kind: output, shape index: {}]  }
   0x1   :  { %v17_v0 = vld [vmem:[%s323_s0 + $0x8] sm:$0xff]  ;;  %v19_v1 = vld [vmem:[%s323_s0 + $0x18] sm:$0xff]  ;;  %v16_v2 = vld [vmem:[%s323_s0] sm:$0xff]  ;;  %178 = vset.pattern.permute.xlu0 %v179_v3 }
   0x2   :  { %v141_v4 = vpack.c.bf16 %v19_v1, %v17_v0  ;;  %v18_v5 = vld [vmem:[%s323_s0 + $0x10] sm:$0xff]  ;;  %v21_v6 = vld [vmem:[%s323_s0 + $0x28] sm:$0xff]  ;;  %v23_v7 = vld [vmem:[%s323_s0 + $0x38] sm:$0xff] }
   0x3   :  { %v143_v8 = vpack.c.bf16 %v18_v5, %v16_v2  ;;  %v145_v9 = vpack.c.bf16 %v23_v7, %v21_v6  ;;  %v20_v10 = vld [vmem:[%s323_s0 + $0x20] sm:$0xff]  ;;  %v22_v11 = vld [vmem:[%s323_s0 + $0x30] sm:$0xff]  ;;  %v25_v12 = vld [vmem:[%s323_s0 + $0x48] sm:$0xff] }
   0x4   :  { %142 = vmatprep.subr.bf16.mxu0 %v141_v4  ;;  %v27_v13 = vld [vmem:[%s323_s0 + $0x58] sm:$0xff]  ;;  %v147_v14 = vpack.c.bf16 %v22_v11, %v20_v10  ;;  %v24_v16 = vld [vmem:[%s323_s0 + $0x40] sm:$0xff]  ;;  %v26_v17 = vld [vmem:[%s323_s0 + $0x50] sm:$0xff] }
   0x5   :  { %144 = vmatpush1.bf16.msra.mxu0 %v143_v8  ;;  %v149_v15 = vpack.c.bf16 %v27_v13, %v25_v12  ;;  %v29_v18 = vld [vmem:[%s323_s0 + $0x68] sm:$0xff]  ;;  %v31_v19 = vld [vmem:[%s323_s0 + $0x78] sm:$0xff]  ;;  %v151_v20 = vpack.c.bf16 %v26_v17, %v24_v16  ;;  %v28_v22 = vld [vmem:[%s323_s0 + $0x60] sm:$0xff] }
   0x6   :  { %146 = vmatprep.subr.bf16.mxu0 %v145_v9  ;;  %v153_v21 = vpack.c.bf16 %v31_v19, %v29_v18  ;;  %v30_v23 = vld [vmem:[%s323_s0 + $0x70] sm:$0xff]  ;;  %v33_v24 = vld [vmem:[%s323_s0 + $0x88] sm:$0xff]  ;;  %v35_v25 = vld [vmem:[%s323_s0 + $0x98] sm:$0xff] }
   0x7   :  { %v155_v26 = vpack.c.bf16 %v30_v23, %v28_v22  ;;  %v15_v27 = vld [vmem:[%s324_s1 + $0x8] sm:$0xff]  ;;  %v52_v28 = vld [vmem:[%s325_s2] sm:$0xff]  ;;  %v157_v29 = vpack.c.bf16 %v35_v25, %v33_v24  ;;  %v34_v31 = vld [vmem:[%s323_s0 + $0x90] sm:$0xff] }
   0x8   :  { %v32_v30 = vld [vmem:[%s323_s0 + $0x80] sm:$0xff]  ;;  %140 = vmatprep.mubr.msk.f32.mxu0 %vm58_vm0, %v15_v27  ;;  %v37_v32 = vld [vmem:[%s323_s0 + $0xa8] sm:$0xff]  ;;  %v39_v33 = vld [vmem:[%s323_s0 + $0xb8] sm:$0xff]  ;;  %55 = vperm.xlu0 %178, %v52_v28  }
   0x9   :  { %148 = vmatpush1.bf16.msra.mxu0 %v147_v14  ;;  %v159_v34 = vpack.c.bf16 %v34_v31, %v32_v30  ;;  %v161_v35 = vpack.c.bf16 %v39_v33, %v37_v32  ;;  %v36_v36 = vld [vmem:[%s323_s0 + $0xa0] sm:$0xff]  ;;  %v38_v37 = vld [vmem:[%s323_s0 + $0xb0] sm:$0xff]  ;;  %v41_v38 = vld [vmem:[%s323_s0 + $0xc8] sm:$0xff] }
   0xa   :  { %150 = vmatprep.subr.bf16.mxu0 %v149_v15  ;;  %v43_v39 = vld [vmem:[%s323_s0 + $0xd8] sm:$0xff]  ;;  %v163_v40 = vpack.c.bf16 %v38_v37, %v36_v36  ;;  %v40_v42 = vld [vmem:[%s323_s0 + $0xc0] sm:$0xff]  ;;  %v42_v43 = vld [vmem:[%s323_s0 + $0xd0] sm:$0xff] }
   0xb   :  { %v165_v41 = vpack.c.bf16 %v43_v39, %v41_v38  ;;  %v45_v44 = vld [vmem:[%s323_s0 + $0xe8] sm:$0xff]  ;;  %v47_v45 = vld [vmem:[%s323_s0 + $0xf8] sm:$0xff]  ;;  %v167_v46 = vpack.c.bf16 %v42_v43, %v40_v42  ;;  %v44_v48 = vld [vmem:[%s323_s0 + $0xe0] sm:$0xff] }
   0xc   :  { %v169_v47 = vpack.c.bf16 %v47_v45, %v45_v44  ;;  %v46_v49 = vld [vmem:[%s323_s0 + $0xf0] sm:$0xff]  ;;  %v49_v50 = vld [vmem:[%s323_s0 + $0x108] sm:$0xff]  ;;  %v51_v51 = vld [vmem:[%s323_s0 + $0x118] sm:$0xff] }
   0xd   :  { %152 = vmatpush1.bf16.msra.mxu0 %v151_v20  ;;  %v171_v52 = vpack.c.bf16 %v46_v49, %v44_v48  ;;  %v173_v53 = vpack.c.bf16 %v51_v51, %v49_v50  ;;  %v48_v54 = vld [vmem:[%s323_s0 + $0x100] sm:$0xff]  ;;  %v50_v55 = vld [vmem:[%s323_s0 + $0x110] sm:$0xff] }
   0xe   :  { %154 = vmatprep.subr.bf16.mxu0 %v153_v21  ;;  %v175_v56 = vpack.c.bf16 %v50_v55, %v48_v54  ;;  %v14_v57 = vld [vmem:[%s324_s1] sm:$0xff] }
  0x11   :  { %156 = vmatpush1.bf16.msra.mxu0 %v155_v26 }
  0x12   :  { %158 = vmatprep.subr.bf16.mxu0 %v157_v29 }
  0x15   :  { %160 = vmatpush1.bf16.msra.mxu0 %v159_v34 }
  0x16   :  { %162 = vmatprep.subr.bf16.mxu0 %v161_v35 }
  0x19   :  { %164 = vmatpush1.bf16.msra.mxu0 %v163_v40 }
  0x1a   :  { %166 = vmatprep.subr.bf16.mxu0 %v165_v41 }
  0x1d   :  { %168 = vmatpush1.bf16.msra.mxu0 %v167_v46 }
  0x1e   :  { %170 = vmatprep.subr.bf16.mxu0 %v169_v47 }
  0x21   :  { %172 = vmatpush1.bf16.msra.mxu0 %v171_v52 }
  0x22   :  { %174 = vmatprep.subr.bf16.mxu0 %v173_v53 }
  0x25   :  { %176 = vmatpush1.bf16.msra.mxu0 %v175_v56 }
  0x28   :  { %127 = vmatmul.mubr.f32.vlgmr.msra.gmra.mrb[0].mxu0 %v14_v57 }
  0x87   :  { %v56_v58 = vpop.permute.xlu0 %55 }
  0xfb   :  { %v128_v59 = vpop.f32.mrb[0].mxu0 }
  0xfc   :  { %v129_v60 = vadd.f32 %v128_v59, %v56_v58  ;;  %v130_v61 = vpop.f32.mrb[1].mxu0 }
  0xfd   :  { %v131_v62 = vadd.f32 %v130_v61, %v56_v58 }
  0xfe   :  { %133 = vst [vmem:[%s326_s3] sm:$0xff] %v129_v60 }
  0xff   :  { %135 = vst.msk [vmem:[%s326_s3 + $0x8] sm:$0xff] %vm134_vm1, %v131_v62 }

// kernel: unet_forward.19
= control target key start
LH: loop header
LB: loop body
LE: loop exit
PB: predicated region body
PF: predicated region fallthrough
CT: control target
= control target key end

     0   :  { %vm55_vm0 = vcmask 130048   ;;  %vm132_vm1 = vcmask 785408   ;;  %v216_v60 = vmov 0   ;;  %s371_s0 = inlined_call_operand.vmem [shape: f32[144,224], index: 0, kind: input, shape index: {}]   ;;  %s372_s1 = inlined_call_operand.vmem [shape: f32[8,144], index: 1, kind: input, shape index: {}]   ;;  %s373_s2 = inlined_call_operand.vmem [shape: f32[8,1], index: 2, kind: input, shape index: {}]   ;;  %s374_s3 = inlined_call_operand.vmem [shape: f32[8,1], index: 3, kind: input, shape index: {}]   ;;  %s375_s4 = inlined_call_operand.vmem [shape: f32[8,224], index: 4, kind: output, shape index: {}]  }
   0x1   :  { %v20_v0 = vld [vmem:[%s371_s0 + $0x8] sm:$0xff]  ;;  %v22_v1 = vld [vmem:[%s371_s0 + $0x18] sm:$0xff]  ;;  %v19_v2 = vld [vmem:[%s371_s0] sm:$0xff]  ;;  %212 = vset.pattern.permute.xlu1 %v216_v60  ;;  %213 = vset.pattern.permute.xlu0 %v216_v60 }
   0x2   :  { %v175_v3 = vpack.c.bf16 %v22_v1, %v20_v0  ;;  %v21_v4 = vld [vmem:[%s371_s0 + $0x10] sm:$0xff]  ;;  %v24_v5 = vld [vmem:[%s371_s0 + $0x28] sm:$0xff]  ;;  %v26_v6 = vld [vmem:[%s371_s0 + $0x38] sm:$0xff] }
   0x3   :  { %v177_v7 = vpack.c.bf16 %v21_v4, %v19_v2  ;;  %v179_v8 = vpack.c.bf16 %v26_v6, %v24_v5  ;;  %v23_v9 = vld [vmem:[%s371_s0 + $0x20] sm:$0xff]  ;;  %v25_v10 = vld [vmem:[%s371_s0 + $0x30] sm:$0xff]  ;;  %v28_v11 = vld [vmem:[%s371_s0 + $0x48] sm:$0xff] }
   0x4   :  { %176 = vmatprep.subr.bf16.mxu0 %v175_v3  ;;  %v30_v12 = vld [vmem:[%s371_s0 + $0x58] sm:$0xff]  ;;  %v181_v13 = vpack.c.bf16 %v25_v10, %v23_v9  ;;  %v27_v15 = vld [vmem:[%s371_s0 + $0x40] sm:$0xff]  ;;  %v29_v16 = vld [vmem:[%s371_s0 + $0x50] sm:$0xff] }
   0x5   :  { %178 = vmatpush1.bf16.msra.mxu0 %v177_v7  ;;  %v183_v14 = vpack.c.bf16 %v30_v12, %v28_v11  ;;  %v32_v17 = vld [vmem:[%s371_s0 + $0x68] sm:$0xff]  ;;  %v34_v18 = vld [vmem:[%s371_s0 + $0x78] sm:$0xff]  ;;  %v185_v19 = vpack.c.bf16 %v29_v16, %v27_v15  ;;  %v31_v21 = vld [vmem:[%s371_s0 + $0x60] sm:$0xff] }
   0x6   :  { %180 = vmatprep.subr.bf16.mxu0 %v179_v8  ;;  %v187_v20 = vpack.c.bf16 %v34_v18, %v32_v17  ;;  %v33_v22 = vld [vmem:[%s371_s0 + $0x70] sm:$0xff]  ;;  %v36_v23 = vld [vmem:[%s371_s0 + $0x88] sm:$0xff]  ;;  %v38_v24 = vld [vmem:[%s371_s0 + $0x98] sm:$0xff] }
   0x7   :  { %v189_v25 = vpack.c.bf16 %v33_v22, %v31_v21  ;;  %v18_v26 = vld [vmem:[%s372_s1 + $0x8] sm:$0xff]  ;;  %v191_v27 = vpack.c.bf16 %v38_v24, %v36_v23  ;;  %v35_v28 = vld [vmem:[%s371_s0 + $0x80] sm:$0xff]  ;;  %v37_v29 = vld [vmem:[%s371_s0 + $0x90] sm:$0xff] }
   0x8   :  { %174 = vmatprep.mubr.msk.f32.mxu0 %vm55_vm0, %v18_v26  ;;  %v40_v30 = vld [vmem:[%s371_s0 + $0xa8] sm:$0xff]  ;;  %v42_v31 = vld [vmem:[%s371_s0 + $0xb8] sm:$0xff]  ;;  %v193_v32 = vpack.c.bf16 %v37_v29, %v35_v28  ;;  %v39_v34 = vld [vmem:[%s371_s0 + $0xa0] sm:$0xff] }
   0x9   :  { %182 = vmatpush1.bf16.msra.mxu0 %v181_v13  ;;  %v195_v33 = vpack.c.bf16 %v42_v31, %v40_v30  ;;  %v41_v35 = vld [vmem:[%s371_s0 + $0xb0] sm:$0xff]  ;;  %v44_v36 = vld [vmem:[%s371_s0 + $0xc8] sm:$0xff]  ;;  %v46_v37 = vld [vmem:[%s371_s0 + $0xd8] sm:$0xff] }
   0xa   :  { %184 = vmatprep.subr.bf16.mxu0 %v183_v14  ;;  %v197_v38 = vpack.c.bf16 %v41_v35, %v39_v34  ;;  %v199_v39 = vpack.c.bf16 %v46_v37, %v44_v36  ;;  %v43_v40 = vld [vmem:[%s371_s0 + $0xc0] sm:$0xff]  ;;  %v45_v41 = vld [vmem:[%s371_s0 + $0xd0] sm:$0xff]  ;;  %v48_v42 = vld [vmem:[%s371_s0 + $0xe8] sm:$0xff] }
   0xb   :  { %v50_v43 = vld [vmem:[%s371_s0 + $0xf8] sm:$0xff]  ;;  %v201_v44 = vpack.c.bf16 %v45_v41, %v43_v40  ;;  %v47_v46 = vld [vmem:[%s371_s0 + $0xe0] sm:$0xff]  ;;  %v49_v47 = vld [vmem:[%s371_s0 + $0xf0] sm:$0xff] }
   0xc   :  { %v203_v45 = vpack.c.bf16 %v50_v43, %v48_v42  ;;  %v52_v48 = vld [vmem:[%s371_s0 + $0x108] sm:$0xff]  ;;  %v54_v49 = vld [vmem:[%s371_s0 + $0x118] sm:$0xff]  ;;  %v205_v50 = vpack.c.bf16 %v49_v47, %v47_v46  ;;  %v51_v52 = vld [vmem:[%s371_s0 + $0x100] sm:$0xff] }
   0xd   :  { %186 = vmatpush1.bf16.msra.mxu0 %v185_v19  ;;  %v207_v51 = vpack.c.bf16 %v54_v49, %v52_v48  ;;  %v53_v53 = vld [vmem:[%s371_s0 + $0x110] sm:$0xff]  ;;  %v17_v55 = vld [vmem:[%s372_s1] sm:$0xff] }
   0xe   :  { %188 = vmatprep.subr.bf16.mxu0 %v187_v20  ;;  %v209_v54 = vpack.c.bf16 %v53_v53, %v51_v52  ;;  %v130_v61 = vld [vmem:[%s373_s2] sm:$0xff] }
   0xf   :  { %154 = vperm.xlu1 %212, %v130_v61   ;;  %v131_v62 = vld [vmem:[%s374_s3] sm:$0xff] }
  0x11   :  { %190 = vmatpush1.bf16.msra.mxu0 %v189_v25 }
  0x12   :  { %192 = vmatprep.subr.bf16.mxu0 %v191_v27 }
  0x13   :  { %161 = vperm.xlu1 %212, %v131_v62  }
  0x15   :  { %194 = vmatpush1.bf16.msra.mxu0 %v193_v32 }
  0x16   :  { %196 = vmatprep.subr.bf16.mxu0 %v195_v33 }
  0x19   :  { %198 = vmatpush1.bf16.msra.mxu0 %v197_v38 }
  0x1a   :  { %200 = vmatprep.subr.bf16.mxu0 %v199_v39 }
  0x1d   :  { %202 = vmatpush1.bf16.msra.mxu0 %v201_v44 }
  0x1e   :  { %204 = vmatprep.subr.bf16.mxu0 %v203_v45 }
  0x21   :  { %206 = vmatpush1.bf16.msra.mxu0 %v205_v50 }
  0x22   :  { %208 = vmatprep.subr.bf16.mxu0 %v207_v51 }
  0x25   :  { %210 = vmatpush1.bf16.msra.mxu0 %v209_v54 }
  0x28   :  { %124 = vmatmul.mubr.f32.vlgmr.msra.gmra.mrb[0].mxu0 %v17_v55 }
  0x8e   :  { %v155_v10 = vpop.permute.xlu1 %154 }
  0x92   :  { %v162_v16 = vpop.permute.xlu1 %161 }
  0xfb   :  { %v125_v56 = vpop.f32.mrb[0].mxu0 }
  0xfc   :  { %v127_v57 = vpop.f32.mrb[1].mxu0 }
  0xfd   :  { %v133_v58 = vsel %vm132_vm1, %v127_v57, 0.0 }
  0xfe   :  { %v134_v59 = vadd.f32 %v133_v58, %v125_v56 }
 0x100   :  { %135 = vadd.xlane.f32.xlu0 %v134_v59 }
 0x18d   :  { %v136_v63 = vpop.xlane.xlu0 %135 }
 0x18e   :  { %v138_v0 = vmul.f32 0.004464286, %v136_v63 }
 0x190   :  { %v139_v1 = vsub.f32 %v125_v56, %v138_v0  ;;  %v140_v2 = vsub.f32 %v127_v57, %v138_v0 }
 0x192   :  { %v141_v3 = vmul.f32 %v139_v1, %v139_v1  ;;  %v142_v4 = vmul.f32 %v140_v2, %v140_v2 }
 0x194   :  { %v143_v5 = vsel %vm132_vm1, %v142_v4, 0.0 }
 0x195   :  { %v144_v6 = vadd.f32 %v143_v5, %v141_v3 }
 0x197   :  { %145 = vadd.xlane.f32.xlu0 %v144_v6 }
 0x224   :  { %v146_v7 = vpop.xlane.xlu0 %145 }
 0x225   :  { %v147_v8 = vmul.f32 0.004464286, %v146_v7 }
 0x227   :  { %v148_v9 = vadd.f32 1e-05, %v147_v8 }
 0x229   :  { %214 = vrsqrt.f32 %v148_v9 }
 0x233   :  { %v215_v11 = vpop.eup %214 }
 0x234   :  { %v150_v12 = vmul.f32 %v215_v11, %v139_v1  ;;  %v151_v13 = vmul.f32 %v215_v11, %v140_v2 }
 0x236   :  { %v157_v14 = vmul.f32 %v155_v10, %v150_v12  ;;  %v158_v15 = vmul.f32 %v155_v10, %v151_v13 }
 0x238   :  { %v164_v17 = vadd.f32 %v162_v16, %v157_v14  ;;  %v165_v18 = vadd.f32 %v162_v16, %v158_v15 }
 0x23a   :  { %v166_v19 = vmax.f32 %v164_v17, 0.0  ;;  %v167_v20 = vmax.f32 %v165_v18, 0.0 }
 0x23c   :  { %168 = vst [vmem:[%s375_s4] sm:$0xff] %v166_v19  ;;  %169 = vst.msk [vmem:[%s375_s4 + $0x8] sm:$0xff] %vm132_vm1, %v167_v20 }

// kernel: unet_forward.20
= control target key start
LH: loop header
LB: loop body
LE: loop exit
PB: predicated region body
PF: predicated region fallthrough
CT: control target
= control target key end

     0   :  { %v1151_v3 = vmov 0.0   ;;  %vm39_vm0 = vcmask 588800   ;;  %v1152_v31 = vmov 0   ;;  %vm799_vm1 = vcmask 523264   ;;  %s2169_s0 = inlined_call_operand.vmem [shape: f32[72,256], index: 0, kind: input, shape index: {}]   ;;  %s2170_s1 = inlined_call_operand.vmem [shape: f32[8,72], index: 1, kind: input, shape index: {}]   ;;  %s2171_s2 = inlined_call_operand.vmem [shape: f32[8,1], index: 2, kind: input, shape index: {}]   ;;  %s2172_s3 = inlined_call_operand.vmem [shape: f32[8,1], index: 3, kind: input, shape index: {}]   ;;  %s2173_s4 = inlined_call_operand.vmem [shape: f32[256,1088], index: 4, kind: input, shape index: {}]   ;;  %s2174_s5 = inlined_call_operand.vmem [shape: f32[8,1088], index: 5, kind: output, shape index: {}]  }
   0x1   :  { %v22_v0 = vld [vmem:[%s2169_s0 + $0x8] sm:$0xff]  ;;  %v24_v1 = vld [vmem:[%s2169_s0 + $0x18] sm:$0xff]  ;;  %v21_v2 = vld [vmem:[%s2169_s0] sm:$0xff]  ;;  %107 = vmatprep.mubr.f32.mxu0 %v1151_v3  ;;  %1147 = vset.pattern.permute.xlu1 %v1152_v31 }
   0x2   :  { %v841_v4 = vpack.c.bf16 %v24_v1, %v22_v0  ;;  %v23_v5 = vld [vmem:[%s2169_s0 + $0x10] sm:$0xff]  ;;  %v26_v6 = vld [vmem:[%s2169_s0 + $0x28] sm:$0xff]  ;;  %v28_v7 = vld [vmem:[%s2169_s0 + $0x38] sm:$0xff]  ;;  %1148 = vset.pattern.permute.xlu0 %v1152_v31 }
   0x3   :  { %v843_v8 = vpack.c.bf16 %v23_v5, %v21_v2  ;;  %v845_v9 = vpack.c.bf16 %v28_v7, %v26_v6  ;;  %v25_v10 = vld [vmem:[%s2169_s0 + $0x20] sm:$0xff]  ;;  %v27_v11 = vld [vmem:[%s2169_s0 + $0x30] sm:$0xff]  ;;  %v30_v12 = vld [vmem:[%s2169_s0 + $0x48] sm:$0xff] }
   0x4   :  { %842 = vmatprep.subr.bf16.mxu0 %v841_v4  ;;  %v32_v13 = vld [vmem:[%s2169_s0 + $0x58] sm:$0xff]  ;;  %v847_v14 = vpack.c.bf16 %v27_v11, %v25_v10  ;;  %v29_v16 = vld [vmem:[%s2169_s0 + $0x40] sm:$0xff]  ;;  %v31_v17 = vld [vmem:[%s2169_s0 + $0x50] sm:$0xff] }
   0x5   :  { %844 = vmatpush1.bf16.msra.mxu0 %v843_v8  ;;  %v849_v15 = vpack.c.bf16 %v32_v13, %v30_v12  ;;  %v34_v18 = vld [vmem:[%s2169_s0 + $0x68] sm:$0xff]  ;;  %v36_v19 = vld [vmem:[%s2169_s0 + $0x78] sm:$0xff]  ;;  %v851_v20 = vpack.c.bf16 %v31_v17, %v29_v16  ;;  %v33_v22 = vld [vmem:[%s2169_s0 + $0x60] sm:$0xff] }
   0x6   :  { %846 = vmatprep.subr.bf16.mxu0 %v845_v9  ;;  %v853_v21 = vpack.c.bf16 %v36_v19, %v34_v18  ;;  %v35_v23 = vld [vmem:[%s2169_s0 + $0x70] sm:$0xff]  ;;  %v38_v25 = vld [vmem:[%s2169_s0 + $0x88] sm:$0xff]  ;;  %v37_v26 = vld [vmem:[%s2169_s0 + $0x80] sm:$0xff] }
   0x7   :  { %v855_v24 = vpack.c.bf16 %v35_v23, %v33_v22  ;;  %v20_v27 = vld [vmem:[%s2170_s1] sm:$0xff]  ;;  %v150_v34 = vld [vmem:[%s2173_s4 + $0x8] sm:$0xff]  ;;  %v159_v35 = vld [vmem:[%s2173_s4 + $0x50] sm:$0xff] }
   0x8   :  { %v114_v32 = vld [vmem:[%s2171_s2] sm:$0xff]  ;;  %v152_v36 = vld [vmem:[%s2173_s4 + $0x18] sm:$0xff]  ;;  %v857_v38 = vpack.c.bf16 %v159_v35, %v150_v34  ;;  %v158_v41 = vld [vmem:[%s2173_s4 + $0x48] sm:$0xff] }
   0x9   :  { %848 = vmatpush1.bf16.msra.mxu0 %v847_v14  ;;  %v115_v33 = vld [vmem:[%s2172_s3] sm:$0xff]  ;;  %135 = vperm.xlu1 %1147, %v114_v32   ;;  %v151_v42 = vld [vmem:[%s2173_s4 + $0x10] sm:$0xff]  ;;  %v160_v44 = vld [vmem:[%s2173_s4 + $0x58] sm:$0xff] }
   0xa   :  { %850 = vmatprep.subr.bf16.mxu0 %v849_v15  ;;  %v161_v37 = vld [vmem:[%s2173_s4 + $0x60] sm:$0xff]  ;;  %v168_v45 = vld [vmem:[%s2173_s4 + $0x98] sm:$0xff]  ;;  %858 = vmatprep.subr.bf16.mxu1 %v857_v38  ;;  %v923_v47 = vpack.c.bf16 %v160_v44, %v151_v42  ;;  %v170_v49 = vld [vmem:[%s2173_s4 + $0xa8] sm:$0xff] }
   0xb   :  { %v921_v39 = vpack.c.bf16 %v161_v37, %v152_v36  ;;  %v149_v40 = vld [vmem:[%s2173_s4] sm:$0xff]  ;;  %v179_v50 = vld [vmem:[%s2173_s4 + $0xf0] sm:$0xff]  ;;  %v176_v53 = vld [vmem:[%s2173_s4 + $0xd8] sm:$0xff] }
   0xc   :  { %v859_v43 = vpack.c.bf16 %v158_v41, %v149_v40  ;;  %v177_v46 = vld [vmem:[%s2173_s4 + $0xe0] sm:$0xff]  ;;  %v167_v51 = vld [vmem:[%s2173_s4 + $0x90] sm:$0xff]  ;;  %v925_v52 = vpack.c.bf16 %v179_v50, %v170_v49  ;;  %v178_v55 = vld [vmem:[%s2173_s4 + $0xe8] sm:$0xff] }
   0xd   :  { %852 = vmatpush1.bf16.msra.mxu0 %v851_v20  ;;  %v861_v48 = vpack.c.bf16 %v177_v46, %v168_v45  ;;  %142 = vperm.xlu1 %1147, %v115_v33   ;;  %v169_v54 = vld [vmem:[%s2173_s4 + $0xa0] sm:$0xff]  ;;  %v863_v56 = vpack.c.bf16 %v176_v53, %v167_v51  ;;  %v186_v58 = vld [vmem:[%s2173_s4 + $0x128] sm:$0xff]  ;;  %v195_v59 = vld [vmem:[%s2173_s4 + $0x170] sm:$0xff] }
   0xe   :  { %854 = vmatprep.subr.bf16.mxu0 %v853_v21  ;;  %860 = vmatpush1.bf16.msra.mxu1 %v859_v43  ;;  %v927_v57 = vpack.c.bf16 %v178_v55, %v169_v54  ;;  %v188_v60 = vld [vmem:[%s2173_s4 + $0x138] sm:$0xff]  ;;  %v865_v61 = vpack.c.bf16 %v195_v59, %v186_v58  ;;  %v197_v62 = vld [vmem:[%s2173_s4 + $0x180] sm:$0xff]  ;;  %v194_v0 = vld [vmem:[%s2173_s4 + $0x168] sm:$0xff] }
   0xf   :  { %862 = vmatprep.subr.bf16.mxu1 %v861_v48  ;;  %v185_v63 = vld [vmem:[%s2173_s4 + $0x120] sm:$0xff]  ;;  %v929_v1 = vpack.c.bf16 %v197_v62, %v188_v60  ;;  %v187_v2 = vld [vmem:[%s2173_s4 + $0x130] sm:$0xff]  ;;  %v196_v3 = vld [vmem:[%s2173_s4 + $0x178] sm:$0xff] }
  0x10   :  { %v204_v4 = vld [vmem:[%s2173_s4 + $0x1b8] sm:$0xff]  ;;  %v867_v5 = vpack.c.bf16 %v194_v0, %v185_v63  ;;  %v213_v6 = vld [vmem:[%s2173_s4 + $0x200] sm:$0xff]  ;;  %v206_v7 = vld [vmem:[%s2173_s4 + $0x1c8] sm:$0xff]  ;;  %v931_v9 = vpack.c.bf16 %v196_v3, %v187_v2 }
  0x11   :  { %856 = vmatpush1.bf16.msra.mxu0 %v855_v24  ;;  %v215_v8 = vld [vmem:[%s2173_s4 + $0x210] sm:$0xff]  ;;  %v869_v10 = vpack.c.bf16 %v213_v6, %v204_v4  ;;  %v212_v12 = vld [vmem:[%s2173_s4 + $0x1f8] sm:$0xff]  ;;  %v205_v13 = vld [vmem:[%s2173_s4 + $0x1c0] sm:$0xff] }
  0x12   :  { %59 = vmatprep.subr.mxu0 %v38_v25  ;;  %864 = vmatpush1.bf16.msra.mxu1 %v863_v56  ;;  %v203_v11 = vld [vmem:[%s2173_s4 + $0x1b0] sm:$0xff]  ;;  %v933_v14 = vpack.c.bf16 %v215_v8, %v206_v7  ;;  %v214_v15 = vld [vmem:[%s2173_s4 + $0x208] sm:$0xff]  ;;  %v224_v18 = vld [vmem:[%s2173_s4 + $0x258] sm:$0xff] }
  0x13   :  { %866 = vmatprep.subr.bf16.mxu1 %v865_v61  ;;  %v222_v16 = vld [vmem:[%s2173_s4 + $0x248] sm:$0xff]  ;;  %v231_v17 = vld [vmem:[%s2173_s4 + $0x290] sm:$0xff]  ;;  %v233_v19 = vld [vmem:[%s2173_s4 + $0x2a0] sm:$0xff]  ;;  %v871_v20 = vpack.c.bf16 %v212_v12, %v203_v11  ;;  %v935_v21 = vpack.c.bf16 %v214_v15, %v205_v13 }
  0x14   :  { %v873_v22 = vpack.c.bf16 %v231_v17, %v222_v16  ;;  %v221_v23 = vld [vmem:[%s2173_s4 + $0x240] sm:$0xff]  ;;  %v230_v24 = vld [vmem:[%s2173_s4 + $0x288] sm:$0xff]  ;;  %v223_v25 = vld [vmem:[%s2173_s4 + $0x250] sm:$0xff] }
  0x15   :  { %60 = vmatpush1.msra.mxu0 %v37_v26  ;;  %v937_v26 = vpack.c.bf16 %v233_v19, %v224_v18  ;;  %v249_v31 = vld [vmem:[%s2173_s4 + $0x320] sm:$0xff]  ;;  %v242_v32 = vld [vmem:[%s2173_s4 + $0x2e8] sm:$0xff]  ;;  %v251_v33 = vld [vmem:[%s2173_s4 + $0x330] sm:$0xff]  ;;  %v875_v34 = vpack.c.bf16 %v230_v24, %v221_v23 }
  0x16   :  { %805 = vmatmul.mubr.msk.f32.vlgmr.msra.gmra.mrb[0].mxu0 %vm39_vm0, %v20_v27  ;;  %922 = vmatprep.subr.bf16.mxu0 %v921_v39  ;;  %v232_v27 = vld [vmem:[%s2173_s4 + $0x298] sm:$0xff]  ;;  %v239_v37 = vld [vmem:[%s2173_s4 + $0x2d0] sm:$0xff]  ;;  %v241_v39 = vld [vmem:[%s2173_s4 + $0x2e0] sm:$0xff]  ;;  %v941_v40 = vpack.c.bf16 %v251_v33, %v242_v32 }
  0x17   :  { %924 = vmatpush1.bf16.msra.mxu0 %v923_v47  ;;  %868 = vmatpush1.bf16.msra.mxu1 %v867_v5  ;;  %v939_v35 = vpack.c.bf16 %v232_v27, %v223_v25  ;;  %v248_v38 = vld [vmem:[%s2173_s4 + $0x318] sm:$0xff]  ;;  %v250_v41 = vld [vmem:[%s2173_s4 + $0x328] sm:$0xff]  ;;  %v267_v43 = vld [vmem:[%s2173_s4 + $0x3b0] sm:$0xff] }
  0x18   :  { %926 = vmatprep.subr.bf16.mxu0 %v925_v52  ;;  %870 = vmatprep.subr.bf16.mxu1 %v869_v10  ;;  %v258_v42 = vld [vmem:[%s2173_s4 + $0x368] sm:$0xff]  ;;  %v260_v44 = vld [vmem:[%s2173_s4 + $0x378] sm:$0xff]  ;;  %v269_v45 = vld [vmem:[%s2173_s4 + $0x3c0] sm:$0xff]  ;;  %v879_v46 = vpack.c.bf16 %v248_v38, %v239_v37  ;;  %v943_v47 = vpack.c.bf16 %v250_v41, %v241_v39 }
  0x19   :  { %v881_v48 = vpack.c.bf16 %v267_v43, %v258_v42  ;;  %v257_v49 = vld [vmem:[%s2173_s4 + $0x360] sm:$0xff]  ;;  %v266_v50 = vld [vmem:[%s2173_s4 + $0x3a8] sm:$0xff]  ;;  %v259_v51 = vld [vmem:[%s2173_s4 + $0x370] sm:$0xff]  ;;  %v945_v52 = vpack.c.bf16 %v269_v45, %v260_v44 }
  0x1a   :  { %v268_v53 = vld [vmem:[%s2173_s4 + $0x3b8] sm:$0xff]  ;;  %v285_v55 = vld [vmem:[%s2173_s4 + $0x440] sm:$0xff]  ;;  %v278_v56 = vld [vmem:[%s2173_s4 + $0x408] sm:$0xff]  ;;  %v883_v58 = vpack.c.bf16 %v266_v50, %v257_v49 }
  0x1b   :  { %928 = vmatpush1.bf16.msra.mxu0 %v927_v57  ;;  %872 = vmatpush1.bf16.msra.mxu1 %v871_v20  ;;  %v276_v54 = vld [vmem:[%s2173_s4 + $0x3f8] sm:$0xff]  ;;  %v287_v57 = vld [vmem:[%s2173_s4 + $0x450] sm:$0xff]  ;;  %v947_v59 = vpack.c.bf16 %v268_v53, %v259_v51  ;;  %v277_v63 = vld [vmem:[%s2173_s4 + $0x400] sm:$0xff] }
  0x1c   :  { %930 = vmatprep.subr.bf16.mxu0 %v929_v1  ;;  %874 = vmatprep.subr.bf16.mxu1 %v873_v22  ;;  %v885_v60 = vpack.c.bf16 %v285_v55, %v276_v54  ;;  %v275_v61 = vld [vmem:[%s2173_s4 + $0x3f0] sm:$0xff]  ;;  %v284_v62 = vld [vmem:[%s2173_s4 + $0x438] sm:$0xff]  ;;  %v949_v0 = vpack.c.bf16 %v287_v57, %v278_v56  ;;  %v286_v1 = vld [vmem:[%s2173_s4 + $0x448] sm:$0xff] }
  0x1d   :  { %v294_v2 = vld [vmem:[%s2173_s4 + $0x488] sm:$0xff]  ;;  %v303_v3 = vld [vmem:[%s2173_s4 + $0x4d0] sm:$0xff]  ;;  %v296_v4 = vld [vmem:[%s2173_s4 + $0x498] sm:$0xff]  ;;  %v887_v6 = vpack.c.bf16 %v284_v62, %v275_v61  ;;  %v951_v7 = vpack.c.bf16 %v286_v1, %v277_v63 }
  0x1e   :  { %v305_v5 = vld [vmem:[%s2173_s4 + $0x4e0] sm:$0xff]  ;;  %v889_v8 = vpack.c.bf16 %v303_v3, %v294_v2  ;;  %v302_v10 = vld [vmem:[%s2173_s4 + $0x4c8] sm:$0xff]  ;;  %v295_v11 = vld [vmem:[%s2173_s4 + $0x490] sm:$0xff] }
  0x1f   :  { %932 = vmatpush1.bf16.msra.mxu0 %v931_v9  ;;  %876 = vmatpush1.bf16.msra.mxu1 %v875_v34  ;;  %v293_v9 = vld [vmem:[%s2173_s4 + $0x480] sm:$0xff]  ;;  %v953_v12 = vpack.c.bf16 %v305_v5, %v296_v4  ;;  %v304_v13 = vld [vmem:[%s2173_s4 + $0x4d8] sm:$0xff]  ;;  %v314_v16 = vld [vmem:[%s2173_s4 + $0x528] sm:$0xff] }
  0x20   :  { %934 = vmatprep.subr.bf16.mxu0 %v933_v14  ;;  %v312_v14 = vld [vmem:[%s2173_s4 + $0x518] sm:$0xff]  ;;  %v321_v15 = vld [vmem:[%s2173_s4 + $0x560] sm:$0xff]  ;;  %v323_v17 = vld [vmem:[%s2173_s4 + $0x570] sm:$0xff]  ;;  %v891_v18 = vpack.c.bf16 %v302_v10, %v293_v9  ;;  %v955_v19 = vpack.c.bf16 %v304_v13, %v295_v11 }
  0x21   :  { %v893_v20 = vpack.c.bf16 %v321_v15, %v312_v14  ;;  %v320_v22 = vld [vmem:[%s2173_s4 + $0x558] sm:$0xff]  ;;  %v313_v23 = vld [vmem:[%s2173_s4 + $0x520] sm:$0xff]  ;;  %v957_v24 = vpack.c.bf16 %v323_v17, %v314_v16  ;;  %v322_v25 = vld [vmem:[%s2173_s4 + $0x568] sm:$0xff] }
  0x22   :  { %v339_v27 = vld [vmem:[%s2173_s4 + $0x5f0] sm:$0xff]  ;;  %v959_v33 = vpack.c.bf16 %v322_v25, %v313_v23  ;;  %v329_v43 = vld [vmem:[%s2173_s4 + $0x5a0] sm:$0xff]  ;;  %v340_v45 = vld [vmem:[%s2173_s4 + $0x5f8] sm:$0xff] }
  0x23   :  { %936 = vmatpush1.bf16.msra.mxu0 %v935_v21  ;;  %v311_v21 = vld [vmem:[%s2173_s4 + $0x510] sm:$0xff]  ;;  %v350_v49 = vld [vmem:[%s2173_s4 + $0x648] sm:$0xff]  ;;  %v356_v53 = vld [vmem:[%s2173_s4 + $0x678] sm:$0xff] }
  0x24   :  { %938 = vmatprep.subr.bf16.mxu0 %v937_v26  ;;  %v330_v26 = vld [vmem:[%s2173_s4 + $0x5a8] sm:$0xff]  ;;  %v895_v32 = vpack.c.bf16 %v320_v22, %v311_v21  ;;  %v359_v51 = vld [vmem:[%s2173_s4 + $0x690] sm:$0xff]  ;;  %v349_v56 = vld [vmem:[%s2173_s4 + $0x640] sm:$0xff] }
  0x25   :  { %v897_v34 = vpack.c.bf16 %v339_v27, %v330_v26  ;;  %v965_v54 = vpack.c.bf16 %v359_v51, %v350_v49  ;;  %v358_v57 = vld [vmem:[%s2173_s4 + $0x688] sm:$0xff]  ;;  %v368_v61 = vld [vmem:[%s2173_s4 + $0x6d8] sm:$0xff]  ;;  %v377_v63 = vld [vmem:[%s2173_s4 + $0x720] sm:$0xff] }
  0x26   :  { %v374_v1 = vld [vmem:[%s2173_s4 + $0x708] sm:$0xff]  ;;  %v969_v2 = vpack.c.bf16 %v377_v63, %v368_v61  ;;  %v367_v4 = vld [vmem:[%s2173_s4 + $0x6d0] sm:$0xff]  ;;  %v376_v5 = vld [vmem:[%s2173_s4 + $0x718] sm:$0xff] }
  0x27   :  { %940 = vmatpush1.bf16.msra.mxu0 %v939_v35  ;;  %v386_v9 = vld [vmem:[%s2173_s4 + $0x768] sm:$0xff]  ;;  %v395_v11 = vld [vmem:[%s2173_s4 + $0x7b0] sm:$0xff]  ;;  %v392_v13 = vld [vmem:[%s2173_s4 + $0x798] sm:$0xff] }
  0x28   :  { %942 = vmatprep.subr.bf16.mxu0 %v941_v40  ;;  %v973_v14 = vpack.c.bf16 %v395_v11, %v386_v9  ;;  %v385_v16 = vld [vmem:[%s2173_s4 + $0x760] sm:$0xff]  ;;  %v394_v17 = vld [vmem:[%s2173_s4 + $0x7a8] sm:$0xff]  ;;  %v404_v21 = vld [vmem:[%s2173_s4 + $0x7f8] sm:$0xff] }
  0x29   :  { %v413_v23 = vld [vmem:[%s2173_s4 + $0x840] sm:$0xff]  ;;  %v410_v25 = vld [vmem:[%s2173_s4 + $0x828] sm:$0xff]  ;;  %v155_v63 = vld [vmem:[%s2173_s4 + $0x30] sm:$0xff] }
  0x2a   :  { %v977_v26 = vpack.c.bf16 %v413_v23, %v404_v21  ;;  %v165_v49 = vld [vmem:[%s2173_s4 + $0x80] sm:$0xff]  ;;  %v171_v9 = vld [vmem:[%s2173_s4 + $0xb0] sm:$0xff] }
  0x2b   :  { %944 = vmatpush1.bf16.msra.mxu0 %v943_v47  ;;  %v348_v47 = vld [vmem:[%s2173_s4 + $0x638] sm:$0xff]  ;;  %v173_v11 = vld [vmem:[%s2173_s4 + $0xc0] sm:$0xff] }
  0x2c   :  { %946 = vmatprep.subr.bf16.mxu0 %v945_v52  ;;  %v347_v52 = vld [vmem:[%s2173_s4 + $0x630] sm:$0xff]  ;;  %v189_v21 = vld [vmem:[%s2173_s4 + $0x140] sm:$0xff] }
  0x2d   :  { %v903_v55 = vpack.c.bf16 %v356_v53, %v347_v52 }
  0x2f   :  { %948 = vmatpush1.bf16.msra.mxu0 %v947_v59  ;;  %v366_v59 = vld [vmem:[%s2173_s4 + $0x6c8] sm:$0xff] }
  0x30   :  { %950 = vmatprep.subr.bf16.mxu0 %v949_v0  ;;  %v365_v0 = vld [vmem:[%s2173_s4 + $0x6c0] sm:$0xff] }
  0x31   :  { %v907_v3 = vpack.c.bf16 %v374_v1, %v365_v0  ;;  %v172_v1 = vld [vmem:[%s2173_s4 + $0xb8] sm:$0xff] }
  0x33   :  { %952 = vmatpush1.bf16.msra.mxu0 %v951_v7  ;;  %v384_v7 = vld [vmem:[%s2173_s4 + $0x758] sm:$0xff] }
  0x34   :  { %954 = vmatprep.subr.bf16.mxu0 %v953_v12  ;;  %v383_v12 = vld [vmem:[%s2173_s4 + $0x750] sm:$0xff] }
  0x35   :  { %v911_v15 = vpack.c.bf16 %v392_v13, %v383_v12  ;;  %v182_v12 = vld [vmem:[%s2173_s4 + $0x108] sm:$0xff] }
  0x36   :  { %v190_v13 = vld [vmem:[%s2173_s4 + $0x148] sm:$0xff] }
  0x37   :  { %956 = vmatpush1.bf16.msra.mxu0 %v955_v19  ;;  %v402_v19 = vld [vmem:[%s2173_s4 + $0x7e8] sm:$0xff] }
  0x38   :  { %958 = vmatprep.subr.bf16.mxu0 %v957_v24  ;;  %v401_v24 = vld [vmem:[%s2173_s4 + $0x7e0] sm:$0xff] }
  0x39   :  { %v915_v27 = vpack.c.bf16 %v410_v25, %v401_v24  ;;  %v191_v25 = vld [vmem:[%s2173_s4 + $0x150] sm:$0xff] }
  0x3b   :  { %960 = vmatpush1.bf16.msra.mxu0 %v959_v33  ;;  %v420_v33 = vld [vmem:[%s2173_s4 + $0x878] sm:$0xff] }
  0xe9   :  { %v1240_v28 = vpop.f32.mrb[0].mxu0 }
  0xea   :  { %v1242_v29 = vpop.f32.mrb[1].mxu0 }
  0xeb   :  { %v116_v30 = vadd.f32 %v1242_v29, %v1240_v28 }
  0xed   :  { %117 = vadd.xlane.f32.xlu0 %v116_v30  ;;  %v240_v30 = vld [vmem:[%s2173_s4 + $0x2d8] sm:$0xff] }
  0xee   :  { %v877_v36 = vpack.c.bf16 %v249_v31, %v240_v30  ;;  %v332_v30 = vld [vmem:[%s2173_s4 + $0x5b8] sm:$0xff]  ;;  %v341_v31 = vld [vmem:[%s2173_s4 + $0x600] sm:$0xff] }
  0xef   :  { %v961_v35 = vpack.c.bf16 %v341_v31, %v332_v30  ;;  %v403_v30 = vld [vmem:[%s2173_s4 + $0x7f0] sm:$0xff]  ;;  %v412_v31 = vld [vmem:[%s2173_s4 + $0x838] sm:$0xff] }
  0xf0   :  { %878 = vmatprep.subr.bf16.mxu1 %v877_v36 }
  0xf1   :  { %880 = vmatpush1.bf16.msra.mxu1 %v879_v46  ;;  %962 = vmatprep.subr.bf16.mxu0 %v961_v35  ;;  %v422_v35 = vld [vmem:[%s2173_s4 + $0x888] sm:$0xff] }
  0xf2   :  { %882 = vmatprep.subr.bf16.mxu1 %v881_v48  ;;  %v357_v48 = vld [vmem:[%s2173_s4 + $0x680] sm:$0xff] }
  0xf3   :  { %v901_v50 = vpack.c.bf16 %v357_v48, %v348_v47  ;;  %v156_v47 = vld [vmem:[%s2173_s4 + $0x38] sm:$0xff] }
  0xf5   :  { %884 = vmatpush1.bf16.msra.mxu1 %v883_v58  ;;  %v967_v58 = vpack.c.bf16 %v358_v57, %v349_v56 }
  0xf6   :  { %886 = vmatprep.subr.bf16.mxu1 %v885_v60  ;;  %v375_v60 = vld [vmem:[%s2173_s4 + $0x710] sm:$0xff] }
  0xf7   :  { %v905_v62 = vpack.c.bf16 %v375_v60, %v366_v59  ;;  %v153_v60 = vld [vmem:[%s2173_s4 + $0x20] sm:$0xff] }
  0xf9   :  { %888 = vmatpush1.bf16.msra.mxu1 %v887_v6  ;;  %v971_v6 = vpack.c.bf16 %v376_v5, %v367_v4  ;;  %v183_v4 = vld [vmem:[%s2173_s4 + $0x110] sm:$0xff] }
  0xfa   :  { %890 = vmatprep.subr.bf16.mxu1 %v889_v8  ;;  %v393_v8 = vld [vmem:[%s2173_s4 + $0x7a0] sm:$0xff] }
  0xfb   :  { %v909_v10 = vpack.c.bf16 %v393_v8, %v384_v7 }
  0xfd   :  { %892 = vmatpush1.bf16.msra.mxu1 %v891_v18  ;;  %v975_v18 = vpack.c.bf16 %v394_v17, %v385_v16  ;;  %v199_v16 = vld [vmem:[%s2173_s4 + $0x190] sm:$0xff]  ;;  %v192_v17 = vld [vmem:[%s2173_s4 + $0x158] sm:$0xff] }
  0xfe   :  { %894 = vmatprep.subr.bf16.mxu1 %v893_v20  ;;  %v411_v20 = vld [vmem:[%s2173_s4 + $0x830] sm:$0xff]  ;;  %v993_v23 = vpack.c.bf16 %v199_v16, %v190_v13  ;;  %v280_v13 = vld [vmem:[%s2173_s4 + $0x418] sm:$0xff] }
  0xff   :  { %v913_v22 = vpack.c.bf16 %v411_v20, %v402_v19  ;;  %v1055_v20 = vpack.c.bf16 %v182_v12, %v173_v11  ;;  %v263_v11 = vld [vmem:[%s2173_s4 + $0x390] sm:$0xff]  ;;  %v272_v12 = vld [vmem:[%s2173_s4 + $0x3d8] sm:$0xff] }
 0x100   :  { %v291_v16 = vld [vmem:[%s2173_s4 + $0x470] sm:$0xff] }
 0x101   :  { %896 = vmatpush1.bf16.msra.mxu1 %v895_v32  ;;  %v979_v32 = vpack.c.bf16 %v412_v31, %v403_v30  ;;  %v217_v30 = vld [vmem:[%s2173_s4 + $0x220] sm:$0xff]  ;;  %v210_v31 = vld [vmem:[%s2173_s4 + $0x1e8] sm:$0xff] }
 0x102   :  { %898 = vmatprep.subr.bf16.mxu1 %v897_v34  ;;  %v429_v34 = vld [vmem:[%s2173_s4 + $0x8c0] sm:$0xff] }
 0x17a   :  { %v118_v36 = vpop.xlane.xlu0 %117 }
 0x17b   :  { %v120_v37 = vmul.f32 0.00390625, %v118_v36  ;;  %v917_v36 = vpack.c.bf16 %v429_v34, %v420_v33 }
 0x17d   :  { %v1505_v38 = vsub.f32 %v1240_v28, %v120_v37  ;;  %v1508_v39 = vsub.f32 %v1242_v29, %v120_v37  ;;  %v338_v28 = vld [vmem:[%s2173_s4 + $0x5e8] sm:$0xff]  ;;  %v331_v29 = vld [vmem:[%s2173_s4 + $0x5b0] sm:$0xff] }
 0x17e   :  { %v899_v44 = vpack.c.bf16 %v338_v28, %v329_v43  ;;  %v963_v46 = vpack.c.bf16 %v340_v45, %v331_v29  ;;  %v431_v37 = vld [vmem:[%s2173_s4 + $0x8d0] sm:$0xff]  ;;  %v421_v28 = vld [vmem:[%s2173_s4 + $0x880] sm:$0xff]  ;;  %v430_v29 = vld [vmem:[%s2173_s4 + $0x8c8] sm:$0xff] }
 0x17f   :  { %v123_v40 = vmul.f32 %v1505_v38, %v1505_v38  ;;  %v124_v41 = vmul.f32 %v1508_v39, %v1508_v39  ;;  %v154_v45 = vld [vmem:[%s2173_s4 + $0x28] sm:$0xff] }
 0x180   :  { %900 = vmatpush1.bf16.msra.mxu1 %v899_v44  ;;  %964 = vmatpush1.bf16.msra.mxu0 %v963_v46  ;;  %v983_v44 = vpack.c.bf16 %v430_v29, %v421_v28  ;;  %v163_v46 = vld [vmem:[%s2173_s4 + $0x70] sm:$0xff]  ;;  %v228_v29 = vld [vmem:[%s2173_s4 + $0x278] sm:$0xff] }
 0x181   :  { %v125_v42 = vadd.f32 %v124_v41, %v123_v40  ;;  %902 = vmatprep.subr.bf16.mxu1 %v901_v50  ;;  %966 = vmatprep.subr.bf16.mxu0 %v965_v54  ;;  %v419_v40 = vld [vmem:[%s2173_s4 + $0x870] sm:$0xff]  ;;  %v428_v41 = vld [vmem:[%s2173_s4 + $0x8b8] sm:$0xff]  ;;  %v985_v48 = vpack.c.bf16 %v163_v46, %v154_v45  ;;  %v1049_v50 = vpack.c.bf16 %v165_v49, %v156_v47  ;;  %v136_v54 = vpop.permute.xlu1 %135  ;;  %v225_v47 = vld [vmem:[%s2173_s4 + $0x260] sm:$0xff] }
 0x182   :  { %v919_v43 = vpack.c.bf16 %v428_v41, %v419_v40  ;;  %v209_v41 = vld [vmem:[%s2173_s4 + $0x1e0] sm:$0xff]  ;;  %v235_v28 = vld [vmem:[%s2173_s4 + $0x2b0] sm:$0xff] }
 0x183   :  { %126 = vadd.xlane.f32.xlu0 %v125_v42  ;;  %v981_v42 = vpack.c.bf16 %v431_v37, %v422_v35  ;;  %v207_v35 = vld [vmem:[%s2173_s4 + $0x1d0] sm:$0xff] }
 0x184   :  { %904 = vmatpush1.bf16.msra.mxu1 %v903_v55  ;;  %968 = vmatpush1.bf16.msra.mxu0 %v967_v58 }
 0x185   :  { %906 = vmatprep.subr.bf16.mxu1 %v905_v62  ;;  %970 = vmatprep.subr.bf16.mxu0 %v969_v2  ;;  %v143_v61 = vpop.permute.xlu1 %142  ;;  %v162_v62 = vld [vmem:[%s2173_s4 + $0x68] sm:$0xff]  ;;  %v181_v2 = vld [vmem:[%s2173_s4 + $0x100] sm:$0xff] }
 0x186   :  { %v987_v7 = vpack.c.bf16 %v162_v62, %v153_v60  ;;  %v252_v60 = vld [vmem:[%s2173_s4 + $0x338] sm:$0xff] }
 0x188   :  { %908 = vmatpush1.bf16.msra.mxu1 %v907_v3  ;;  %972 = vmatpush1.bf16.msra.mxu0 %v971_v6  ;;  %v174_v3 = vld [vmem:[%s2173_s4 + $0xc8] sm:$0xff] }
 0x189   :  { %910 = vmatprep.subr.bf16.mxu1 %v909_v10  ;;  %974 = vmatprep.subr.bf16.mxu0 %v973_v14  ;;  %v180_v10 = vld [vmem:[%s2173_s4 + $0xf8] sm:$0xff]  ;;  %v989_v14 = vpack.c.bf16 %v181_v2, %v172_v1  ;;  %v273_v2 = vld [vmem:[%s2173_s4 + $0x3e0] sm:$0xff] }
 0x18a   :  { %v991_v19 = vpack.c.bf16 %v180_v10, %v171_v9  ;;  %v264_v1 = vld [vmem:[%s2173_s4 + $0x398] sm:$0xff] }
 0x18b   :  { %v1073_v10 = vpack.c.bf16 %v273_v2, %v264_v1 }
 0x18c   :  { %912 = vmatpush1.bf16.msra.mxu1 %v911_v15  ;;  %976 = vmatpush1.bf16.msra.mxu0 %v975_v18  ;;  %v1053_v15 = vpack.c.bf16 %v183_v4, %v174_v3  ;;  %v201_v18 = vld [vmem:[%s2173_s4 + $0x1a0] sm:$0xff] }
 0x18d   :  { %914 = vmatprep.subr.bf16.mxu1 %v913_v22  ;;  %978 = vmatprep.subr.bf16.mxu0 %v977_v26  ;;  %v198_v22 = vld [vmem:[%s2173_s4 + $0x188] sm:$0xff]  ;;  %v1057_v24 = vpack.c.bf16 %v201_v18, %v192_v17  ;;  %v200_v26 = vld [vmem:[%s2173_s4 + $0x198] sm:$0xff]  ;;  %v1075_v18 = vpack.c.bf16 %v272_v12, %v263_v11  ;;  %v379_v12 = vld [vmem:[%s2173_s4 + $0x730] sm:$0xff] }
 0x18e   :  { %v995_v33 = vpack.c.bf16 %v198_v22, %v189_v21  ;;  %v1059_v34 = vpack.c.bf16 %v200_v26, %v191_v25  ;;  %v298_v25 = vld [vmem:[%s2173_s4 + $0x4a8] sm:$0xff]  ;;  %v307_v26 = vld [vmem:[%s2173_s4 + $0x4f0] sm:$0xff] }
 0x18f   :  { %v370_v11 = vld [vmem:[%s2173_s4 + $0x6e8] sm:$0xff] }
 0x190   :  { %916 = vmatpush1.bf16.msra.mxu1 %v915_v27  ;;  %980 = vmatpush1.bf16.msra.mxu0 %v979_v32  ;;  %v208_v27 = vld [vmem:[%s2173_s4 + $0x1d8] sm:$0xff]  ;;  %v219_v32 = vld [vmem:[%s2173_s4 + $0x230] sm:$0xff] }
 0x191   :  { %918 = vmatprep.subr.bf16.mxu1 %v917_v36  ;;  %982 = vmatprep.subr.bf16.mxu0 %v981_v42  ;;  %v216_v36 = vld [vmem:[%s2173_s4 + $0x218] sm:$0xff]  ;;  %v997_v37 = vpack.c.bf16 %v217_v30, %v208_v27  ;;  %v1061_v40 = vpack.c.bf16 %v219_v32, %v210_v31  ;;  %v218_v42 = vld [vmem:[%s2173_s4 + $0x228] sm:$0xff]  ;;  %v309_v30 = vld [vmem:[%s2173_s4 + $0x500] sm:$0xff] }
 0x192   :  { %v999_v45 = vpack.c.bf16 %v216_v36, %v207_v35  ;;  %v1063_v46 = vpack.c.bf16 %v218_v42, %v209_v41  ;;  %v300_v27 = vld [vmem:[%s2173_s4 + $0x4b8] sm:$0xff]  ;;  %v1017_v35 = vpack.c.bf16 %v307_v26, %v298_v25  ;;  %v325_v42 = vld [vmem:[%s2173_s4 + $0x580] sm:$0xff]  ;;  %v390_v25 = vld [vmem:[%s2173_s4 + $0x788] sm:$0xff] }
 0x193   :  { %v1081_v36 = vpack.c.bf16 %v309_v30, %v300_v27  ;;  %v316_v41 = vld [vmem:[%s2173_s4 + $0x538] sm:$0xff]  ;;  %v399_v26 = vld [vmem:[%s2173_s4 + $0x7d0] sm:$0xff] }
 0x194   :  { %920 = vmatpush1.bf16.msra.mxu1 %v919_v43  ;;  %984 = vmatpush1.bf16.msra.mxu0 %v983_v44  ;;  %v226_v43 = vld [vmem:[%s2173_s4 + $0x268] sm:$0xff]  ;;  %v237_v44 = vld [vmem:[%s2173_s4 + $0x2c0] sm:$0xff] }
 0x195   :  { %986 = vmatprep.subr.bf16.mxu1 %v985_v48  ;;  %1050 = vmatprep.subr.bf16.mxu0 %v1049_v50  ;;  %v234_v48 = vld [vmem:[%s2173_s4 + $0x2a8] sm:$0xff]  ;;  %v1001_v49 = vpack.c.bf16 %v235_v28, %v226_v43  ;;  %v1065_v50 = vpack.c.bf16 %v237_v44, %v228_v29  ;;  %v327_v28 = vld [vmem:[%s2173_s4 + $0x590] sm:$0xff] }
 0x196   :  { %v318_v43 = vld [vmem:[%s2173_s4 + $0x548] sm:$0xff] }
 0x210   :  { %v127_v51 = vpop.xlane.xlu0 %126 }
 0x211   :  { %v128_v52 = vmul.f32 0.00390625, %v127_v51  ;;  %v227_v51 = vld [vmem:[%s2173_s4 + $0x270] sm:$0xff] }
 0x213   :  { %v129_v53 = vadd.f32 1e-05, %v128_v52  ;;  %v236_v52 = vld [vmem:[%s2173_s4 + $0x2b8] sm:$0xff] }
 0x215   :  { %1149 = vrsqrt.f32 %v129_v53  ;;  %v244_v53 = vld [vmem:[%s2173_s4 + $0x2f8] sm:$0xff] }
 0x21f   :  { %v1150_v55 = vpop.eup %1149 }
 0x220   :  { %v131_v56 = vmul.f32 %v1150_v55, %v1505_v38  ;;  %v132_v57 = vmul.f32 %v1150_v55, %v1508_v39  ;;  %v164_v38 = vld [vmem:[%s2173_s4 + $0x78] sm:$0xff]  ;;  %v246_v55 = vld [vmem:[%s2173_s4 + $0x308] sm:$0xff] }
 0x221   :  { %v1051_v8 = vpack.c.bf16 %v164_v38, %v155_v63  ;;  %v245_v63 = vld [vmem:[%s2173_s4 + $0x300] sm:$0xff]  ;;  %v254_v38 = vld [vmem:[%s2173_s4 + $0x348] sm:$0xff] }
 0x222   :  { %v138_v58 = vmul.f32 %v136_v54, %v131_v56  ;;  %v139_v59 = vmul.f32 %v136_v54, %v132_v57  ;;  %v253_v54 = vld [vmem:[%s2173_s4 + $0x340] sm:$0xff]  ;;  %v255_v56 = vld [vmem:[%s2173_s4 + $0x350] sm:$0xff]  ;;  %v1003_v57 = vpack.c.bf16 %v234_v48, %v225_v47  ;;  %v1071_v4 = vpack.c.bf16 %v254_v38, %v245_v63  ;;  %v352_v63 = vld [vmem:[%s2173_s4 + $0x658] sm:$0xff] }
 0x223   :  { %v1069_v62 = vpack.c.bf16 %v255_v56, %v246_v55  ;;  %v1021_v47 = vpack.c.bf16 %v325_v42, %v316_v41  ;;  %v1085_v48 = vpack.c.bf16 %v327_v28, %v318_v43  ;;  %v361_v38 = vld [vmem:[%s2173_s4 + $0x6a0] sm:$0xff]  ;;  %v408_v41 = vld [vmem:[%s2173_s4 + $0x818] sm:$0xff] }
 0x224   :  { %v145_v39 = vadd.f32 %v143_v61, %v138_v58  ;;  %v146_v0 = vadd.f32 %v143_v61, %v139_v59  ;;  %v1067_v58 = vpack.c.bf16 %v236_v52, %v227_v51  ;;  %v243_v59 = vld [vmem:[%s2173_s4 + $0x2f0] sm:$0xff]  ;;  %v1005_v61 = vpack.c.bf16 %v253_v54, %v244_v53  ;;  %v334_v51 = vld [vmem:[%s2173_s4 + $0x5c8] sm:$0xff]  ;;  %v336_v53 = vld [vmem:[%s2173_s4 + $0x5d8] sm:$0xff] }
 0x225   :  { %v1007_v3 = vpack.c.bf16 %v252_v60, %v243_v59  ;;  %v343_v52 = vld [vmem:[%s2173_s4 + $0x610] sm:$0xff]  ;;  %v345_v54 = vld [vmem:[%s2173_s4 + $0x620] sm:$0xff] }
 0x226   :  { %v1684_v5 = vmax.f32 %v145_v39, 0.0  ;;  %v1686_v6 = vmax.f32 %v146_v0, 0.0  ;;  %v262_v39 = vld [vmem:[%s2173_s4 + $0x388] sm:$0xff]  ;;  %v271_v0 = vld [vmem:[%s2173_s4 + $0x3d0] sm:$0xff]  ;;  %v1025_v59 = vpack.c.bf16 %v343_v52, %v334_v51  ;;  %v1089_v60 = vpack.c.bf16 %v345_v54, %v336_v53  ;;  %v417_v42 = vld [vmem:[%s2173_s4 + $0x860] sm:$0xff] }
 0x227   :  { %v1009_v9 = vpack.c.bf16 %v271_v0, %v262_v39  ;;  %v354_v39 = vld [vmem:[%s2173_s4 + $0x668] sm:$0xff]  ;;  %v363_v0 = vld [vmem:[%s2173_s4 + $0x6b0] sm:$0xff] }
 0x228   :  { %501 = vmatprep.mubr.f32.mxu1 %v1686_v6  ;;  %572 = vmatprep.mubr.f32.mxu0 %v1686_v6  ;;  %v426_v51 = vld [vmem:[%s2173_s4 + $0x8a8] sm:$0xff]  ;;  %v435_v52 = vld [vmem:[%s2173_s4 + $0x8f0] sm:$0xff] }
 0x229   :  { %502 = vmatmul.mubr.f32.vlgmr.msra.gmra.mrb[0].mxu1 %v1684_v5  ;;  %573 = vmatmul.mubr.f32.vlgmr.msra.gmra.mrb[2].mxu0 %v1684_v5 }
 0x22a   :  { %988 = vmatpush1.bf16.msra.mxu1 %v987_v7  ;;  %1052 = vmatpush1.bf16.msra.mxu0 %v1051_v8  ;;  %v261_v7 = vld [vmem:[%s2173_s4 + $0x380] sm:$0xff]  ;;  %v270_v8 = vld [vmem:[%s2173_s4 + $0x3c8] sm:$0xff] }
 0x22b   :  { %643 = vmatprep.mubr.f32.mxu1 %v1686_v6  ;;  %714 = vmatprep.mubr.f32.mxu0 %v1686_v6  ;;  %v1011_v17 = vpack.c.bf16 %v270_v8, %v261_v7  ;;  %v1029_v7 = vpack.c.bf16 %v361_v38, %v352_v63  ;;  %v1093_v8 = vpack.c.bf16 %v363_v0, %v354_v39  ;;  %v157_v0 = vld [vmem:[%s2173_s4 + $0x40] sm:$0xff] }
 0x22c   :  { %990 = vmatprep.subr.bf16.mxu1 %v989_v14  ;;  %1054 = vmatprep.subr.bf16.mxu0 %v1053_v15  ;;  %v289_v14 = vld [vmem:[%s2173_s4 + $0x460] sm:$0xff]  ;;  %v282_v15 = vld [vmem:[%s2173_s4 + $0x428] sm:$0xff] }
 0x22d   :  { %v1013_v21 = vpack.c.bf16 %v289_v14, %v280_v13  ;;  %v1077_v22 = vpack.c.bf16 %v291_v16, %v282_v15  ;;  %v372_v13 = vld [vmem:[%s2173_s4 + $0x6f8] sm:$0xff]  ;;  %v381_v14 = vld [vmem:[%s2173_s4 + $0x740] sm:$0xff] }
 0x22e   :  { %992 = vmatpush1.bf16.msra.mxu1 %v991_v19  ;;  %1056 = vmatpush1.bf16.msra.mxu0 %v1055_v20  ;;  %v279_v19 = vld [vmem:[%s2173_s4 + $0x410] sm:$0xff]  ;;  %v288_v20 = vld [vmem:[%s2173_s4 + $0x458] sm:$0xff] }
 0x22f   :  { %994 = vmatprep.subr.bf16.mxu1 %v993_v23  ;;  %1058 = vmatprep.subr.bf16.mxu0 %v1057_v24  ;;  %v281_v23 = vld [vmem:[%s2173_s4 + $0x420] sm:$0xff]  ;;  %v290_v24 = vld [vmem:[%s2173_s4 + $0x468] sm:$0xff]  ;;  %v1015_v31 = vpack.c.bf16 %v288_v20, %v279_v19  ;;  %v1033_v19 = vpack.c.bf16 %v379_v12, %v370_v11  ;;  %v1097_v20 = vpack.c.bf16 %v381_v14, %v372_v13 }
 0x230   :  { %v1079_v32 = vpack.c.bf16 %v290_v24, %v281_v23  ;;  %v388_v23 = vld [vmem:[%s2173_s4 + $0x778] sm:$0xff]  ;;  %v397_v24 = vld [vmem:[%s2173_s4 + $0x7c0] sm:$0xff]  ;;  %v346_v11 = vld [vmem:[%s2173_s4 + $0x628] sm:$0xff] }
 0x231   :  { %v193_v14 = vld [vmem:[%s2173_s4 + $0x160] sm:$0xff] }
 0x232   :  { %996 = vmatpush1.bf16.msra.mxu1 %v995_v33  ;;  %1060 = vmatpush1.bf16.msra.mxu0 %v1059_v34  ;;  %v297_v33 = vld [vmem:[%s2173_s4 + $0x4a0] sm:$0xff]  ;;  %v306_v34 = vld [vmem:[%s2173_s4 + $0x4e8] sm:$0xff] }
 0x233   :  { %998 = vmatprep.subr.bf16.mxu1 %v997_v37  ;;  %1062 = vmatprep.subr.bf16.mxu0 %v1061_v40  ;;  %v299_v37 = vld [vmem:[%s2173_s4 + $0x4b0] sm:$0xff]  ;;  %v308_v40 = vld [vmem:[%s2173_s4 + $0x4f8] sm:$0xff]  ;;  %v1019_v29 = vpack.c.bf16 %v306_v34, %v297_v33  ;;  %v1037_v33 = vpack.c.bf16 %v397_v24, %v388_v23  ;;  %v1101_v34 = vpack.c.bf16 %v399_v26, %v390_v25  ;;  %v229_v25 = vld [vmem:[%s2173_s4 + $0x280] sm:$0xff] }
 0x234   :  { %v1083_v44 = vpack.c.bf16 %v308_v40, %v299_v37  ;;  %v406_v37 = vld [vmem:[%s2173_s4 + $0x808] sm:$0xff]  ;;  %v415_v40 = vld [vmem:[%s2173_s4 + $0x850] sm:$0xff] }
 0x235   :  { %v238_v26 = vld [vmem:[%s2173_s4 + $0x2c8] sm:$0xff] }
 0x236   :  { %1000 = vmatpush1.bf16.msra.mxu1 %v999_v45  ;;  %1064 = vmatpush1.bf16.msra.mxu0 %v1063_v46  ;;  %v315_v45 = vld [vmem:[%s2173_s4 + $0x530] sm:$0xff]  ;;  %v324_v46 = vld [vmem:[%s2173_s4 + $0x578] sm:$0xff] }
 0x237   :  { %1002 = vmatprep.subr.bf16.mxu1 %v1001_v49  ;;  %1066 = vmatprep.subr.bf16.mxu0 %v1065_v50  ;;  %v317_v49 = vld [vmem:[%s2173_s4 + $0x540] sm:$0xff]  ;;  %v326_v50 = vld [vmem:[%s2173_s4 + $0x588] sm:$0xff]  ;;  %v1023_v55 = vpack.c.bf16 %v324_v46, %v315_v45  ;;  %v1041_v45 = vpack.c.bf16 %v415_v40, %v406_v37  ;;  %v1105_v46 = vpack.c.bf16 %v417_v42, %v408_v41 }
 0x238   :  { %v1087_v56 = vpack.c.bf16 %v326_v50, %v317_v49  ;;  %v424_v49 = vld [vmem:[%s2173_s4 + $0x898] sm:$0xff]  ;;  %v433_v50 = vld [vmem:[%s2173_s4 + $0x8e0] sm:$0xff]  ;;  %v274_v42 = vld [vmem:[%s2173_s4 + $0x3e8] sm:$0xff] }
 0x239   :  { %v265_v41 = vld [vmem:[%s2173_s4 + $0x3a0] sm:$0xff] }
 0x23a   :  { %1004 = vmatpush1.bf16.msra.mxu1 %v1003_v57  ;;  %1068 = vmatpush1.bf16.msra.mxu0 %v1067_v58  ;;  %v333_v57 = vld [vmem:[%s2173_s4 + $0x5c0] sm:$0xff]  ;;  %v342_v58 = vld [vmem:[%s2173_s4 + $0x608] sm:$0xff] }
 0x23b   :  { %1006 = vmatprep.subr.bf16.mxu1 %v1005_v61  ;;  %1070 = vmatprep.subr.bf16.mxu0 %v1069_v62  ;;  %v335_v61 = vld [vmem:[%s2173_s4 + $0x5d0] sm:$0xff]  ;;  %v344_v62 = vld [vmem:[%s2173_s4 + $0x618] sm:$0xff]  ;;  %v1027_v1 = vpack.c.bf16 %v342_v58, %v333_v57  ;;  %v1109_v57 = vpack.c.bf16 %v435_v52, %v426_v51 }
 0x23c   :  { %v1091_v2 = vpack.c.bf16 %v344_v62, %v335_v61  ;;  %v432_v58 = vld [vmem:[%s2173_s4 + $0x8d8] sm:$0xff]  ;;  %v301_v61 = vld [vmem:[%s2173_s4 + $0x4c0] sm:$0xff]  ;;  %v310_v62 = vld [vmem:[%s2173_s4 + $0x508] sm:$0xff] }
 0x23d   :  { %v1113_v39 = vpack.c.bf16 %v310_v62, %v301_v61 }
 0x23e   :  { %1008 = vmatpush1.bf16.msra.mxu1 %v1007_v3  ;;  %1072 = vmatpush1.bf16.msra.mxu0 %v1071_v4  ;;  %v351_v3 = vld [vmem:[%s2173_s4 + $0x650] sm:$0xff]  ;;  %v360_v4 = vld [vmem:[%s2173_s4 + $0x698] sm:$0xff] }
 0x23f   :  { %1010 = vmatprep.subr.bf16.mxu1 %v1009_v9  ;;  %1074 = vmatprep.subr.bf16.mxu0 %v1073_v10  ;;  %v353_v9 = vld [vmem:[%s2173_s4 + $0x660] sm:$0xff]  ;;  %v362_v10 = vld [vmem:[%s2173_s4 + $0x6a8] sm:$0xff]  ;;  %v1031_v15 = vpack.c.bf16 %v360_v4, %v351_v3  ;;  %v328_v3 = vld [vmem:[%s2173_s4 + $0x598] sm:$0xff] }
 0x240   :  { %v1095_v16 = vpack.c.bf16 %v362_v10, %v353_v9  ;;  %v184_v9 = vld [vmem:[%s2173_s4 + $0x118] sm:$0xff]  ;;  %v337_v10 = vld [vmem:[%s2173_s4 + $0x5e0] sm:$0xff] }
 0x241   :  { %v1121_v13 = vpack.c.bf16 %v346_v11, %v337_v10 }
 0x242   :  { %1012 = vmatpush1.bf16.msra.mxu1 %v1011_v17  ;;  %1076 = vmatpush1.bf16.msra.mxu0 %v1075_v18  ;;  %v369_v17 = vld [vmem:[%s2173_s4 + $0x6e0] sm:$0xff]  ;;  %v378_v18 = vld [vmem:[%s2173_s4 + $0x728] sm:$0xff] }
 0x243   :  { %1014 = vmatprep.subr.bf16.mxu1 %v1013_v21  ;;  %1078 = vmatprep.subr.bf16.mxu0 %v1077_v22  ;;  %v371_v21 = vld [vmem:[%s2173_s4 + $0x6f0] sm:$0xff]  ;;  %v380_v22 = vld [vmem:[%s2173_s4 + $0x738] sm:$0xff]  ;;  %v1035_v27 = vpack.c.bf16 %v378_v18, %v369_v17 }
 0x244   :  { %v1099_v30 = vpack.c.bf16 %v380_v22, %v371_v21  ;;  %v364_v17 = vld [vmem:[%s2173_s4 + $0x6b8] sm:$0xff]  ;;  %v373_v21 = vld [vmem:[%s2173_s4 + $0x700] sm:$0xff]  ;;  %v382_v22 = vld [vmem:[%s2173_s4 + $0x748] sm:$0xff] }
 0x245   :  { %v1129_v24 = vpack.c.bf16 %v382_v22, %v373_v21 }
 0x246   :  { %1016 = vmatpush1.bf16.msra.mxu1 %v1015_v31  ;;  %1080 = vmatpush1.bf16.msra.mxu0 %v1079_v32  ;;  %v387_v31 = vld [vmem:[%s2173_s4 + $0x770] sm:$0xff]  ;;  %v396_v32 = vld [vmem:[%s2173_s4 + $0x7b8] sm:$0xff] }
 0x247   :  { %1018 = vmatprep.subr.bf16.mxu1 %v1017_v35  ;;  %1082 = vmatprep.subr.bf16.mxu0 %v1081_v36  ;;  %v389_v35 = vld [vmem:[%s2173_s4 + $0x780] sm:$0xff]  ;;  %v398_v36 = vld [vmem:[%s2173_s4 + $0x7c8] sm:$0xff]  ;;  %v1039_v43 = vpack.c.bf16 %v396_v32, %v387_v31  ;;  %v1131_v31 = vpack.c.bf16 %v238_v26, %v229_v25 }
 0x248   :  { %v1103_v28 = vpack.c.bf16 %v398_v36, %v389_v35  ;;  %v409_v35 = vld [vmem:[%s2173_s4 + $0x820] sm:$0xff]  ;;  %v418_v36 = vld [vmem:[%s2173_s4 + $0x868] sm:$0xff] }
 0x249   :  { %v1137_v40 = vpack.c.bf16 %v418_v36, %v409_v35 }
 0x24a   :  { %1020 = vmatpush1.bf16.msra.mxu1 %v1019_v29  ;;  %1084 = vmatpush1.bf16.msra.mxu0 %v1083_v44  ;;  %v405_v29 = vld [vmem:[%s2173_s4 + $0x800] sm:$0xff]  ;;  %v414_v44 = vld [vmem:[%s2173_s4 + $0x848] sm:$0xff] }
 0x24b   :  { %1022 = vmatprep.subr.bf16.mxu1 %v1021_v47  ;;  %1086 = vmatprep.subr.bf16.mxu0 %v1085_v48  ;;  %v407_v47 = vld [vmem:[%s2173_s4 + $0x810] sm:$0xff]  ;;  %v416_v48 = vld [vmem:[%s2173_s4 + $0x858] sm:$0xff]  ;;  %v1043_v53 = vpack.c.bf16 %v414_v44, %v405_v29  ;;  %v1139_v29 = vpack.c.bf16 %v274_v42, %v265_v41 }
 0x24c   :  { %v1107_v54 = vpack.c.bf16 %v416_v48, %v407_v47 }
 0x24e   :  { %1024 = vmatpush1.bf16.msra.mxu1 %v1023_v55  ;;  %1088 = vmatpush1.bf16.msra.mxu0 %v1087_v56  ;;  %v423_v55 = vld [vmem:[%s2173_s4 + $0x890] sm:$0xff]  ;;  %v1045_v56 = vpack.c.bf16 %v433_v50, %v424_v49 }
 0x24f   :  { %1026 = vmatprep.subr.bf16.mxu1 %v1025_v59  ;;  %1090 = vmatprep.subr.bf16.mxu0 %v1089_v60  ;;  %v425_v59 = vld [vmem:[%s2173_s4 + $0x8a0] sm:$0xff]  ;;  %v434_v60 = vld [vmem:[%s2173_s4 + $0x8e8] sm:$0xff]  ;;  %v1047_v63 = vpack.c.bf16 %v432_v58, %v423_v55 }
 0x250   :  { %v1111_v38 = vpack.c.bf16 %v434_v60, %v425_v59 }
 0x252   :  { %1028 = vmatpush1.bf16.msra.mxu1 %v1027_v1  ;;  %1092 = vmatpush1.bf16.msra.mxu0 %v1091_v2  ;;  %v166_v1 = vld [vmem:[%s2173_s4 + $0x88] sm:$0xff]  ;;  %v319_v2 = vld [vmem:[%s2173_s4 + $0x550] sm:$0xff] }
 0x253   :  { %1030 = vmatprep.subr.bf16.mxu1 %v1029_v7  ;;  %1094 = vmatprep.subr.bf16.mxu0 %v1093_v8  ;;  %v1115_v4 = vpack.c.bf16 %v166_v1, %v157_v0  ;;  %v1117_v7 = vpack.c.bf16 %v328_v3, %v319_v2  ;;  %v175_v8 = vld [vmem:[%s2173_s4 + $0xd0] sm:$0xff] }
 0x254   :  { %v1119_v12 = vpack.c.bf16 %v184_v9, %v175_v8 }
 0x256   :  { %1032 = vmatpush1.bf16.msra.mxu1 %v1031_v15  ;;  %1096 = vmatpush1.bf16.msra.mxu0 %v1095_v16  ;;  %v202_v15 = vld [vmem:[%s2173_s4 + $0x1a8] sm:$0xff]  ;;  %v355_v16 = vld [vmem:[%s2173_s4 + $0x670] sm:$0xff] }
 0x257   :  { %1034 = vmatprep.subr.bf16.mxu1 %v1033_v19  ;;  %1098 = vmatprep.subr.bf16.mxu0 %v1097_v20  ;;  %v1125_v18 = vpack.c.bf16 %v364_v17, %v355_v16  ;;  %v211_v19 = vld [vmem:[%s2173_s4 + $0x1f0] sm:$0xff]  ;;  %v220_v20 = vld [vmem:[%s2173_s4 + $0x238] sm:$0xff] }
 0x258   :  { %v1127_v23 = vpack.c.bf16 %v220_v20, %v211_v19 }
 0x25a   :  { %1036 = vmatpush1.bf16.msra.mxu1 %v1035_v27  ;;  %1100 = vmatpush1.bf16.msra.mxu0 %v1099_v30  ;;  %v391_v27 = vld [vmem:[%s2173_s4 + $0x790] sm:$0xff]  ;;  %v400_v30 = vld [vmem:[%s2173_s4 + $0x7d8] sm:$0xff] }
 0x25b   :  { %1038 = vmatprep.subr.bf16.mxu1 %v1037_v33  ;;  %1102 = vmatprep.subr.bf16.mxu0 %v1101_v34  ;;  %v1133_v32 = vpack.c.bf16 %v400_v30, %v391_v27  ;;  %v247_v33 = vld [vmem:[%s2173_s4 + $0x310] sm:$0xff]  ;;  %v256_v34 = vld [vmem:[%s2173_s4 + $0x358] sm:$0xff] }
 0x25c   :  { %v1135_v37 = vpack.c.bf16 %v256_v34, %v247_v33 }
 0x25e   :  { %1040 = vmatpush1.bf16.msra.mxu1 %v1039_v43  ;;  %1104 = vmatpush1.bf16.msra.mxu0 %v1103_v28  ;;  %v427_v43 = vld [vmem:[%s2173_s4 + $0x8b0] sm:$0xff]  ;;  %v436_v28 = vld [vmem:[%s2173_s4 + $0x8f8] sm:$0xff] }
 0x25f   :  { %1042 = vmatprep.subr.bf16.mxu1 %v1041_v45  ;;  %1106 = vmatprep.subr.bf16.mxu0 %v1105_v46  ;;  %v1141_v44 = vpack.c.bf16 %v436_v28, %v427_v43  ;;  %v283_v45 = vld [vmem:[%s2173_s4 + $0x430] sm:$0xff]  ;;  %v292_v46 = vld [vmem:[%s2173_s4 + $0x478] sm:$0xff] }
 0x260   :  { %v1143_v47 = vpack.c.bf16 %v292_v46, %v283_v45 }
 0x262   :  { %1044 = vmatpush1.bf16.msra.mxu1 %v1043_v53  ;;  %1108 = vmatpush1.bf16.msra.mxu0 %v1107_v54 }
 0x263   :  { %1046 = vmatprep.subr.bf16.mxu1 %v1045_v56  ;;  %1110 = vmatprep.subr.bf16.mxu0 %v1109_v57 }
 0x266   :  { %1048 = vmatpush1.bf16.msra.mxu1 %v1047_v63  ;;  %1112 = vmatpush1.bf16.msra.mxu0 %v1111_v38 }
 0x267   :  { %1114 = vmatprep.subr.bf16.mxu1 %v1113_v39 }
 0x269   :  { %644 = vmatmul.mubr.f32.vlgmr.msra.gmra.mrb[2].mxu1 %v1684_v5  ;;  %715 = vmatmul.mubr.f32.vlgmr.msra.gmra.mrb[4].mxu0 %v1684_v5 }
 0x26a   :  { %1116 = vmatpush3.bf16.msra.mxu1 %v1115_v4  ;;  %785 = vmatprep.mubr.f32.mxu1 %v1686_v6  ;;  %v1123_v6 = vpack.c.bf16 %v202_v15, %v193_v14 }
 0x26b   :  { %1118 = vmatprep.subr.bf16.mxu1 %v1117_v7 }
 0x26e   :  { %1120 = vmatpush3.bf16.msra.mxu1 %v1119_v12 }
 0x26f   :  { %1122 = vmatprep.subr.bf16.mxu1 %v1121_v13 }
 0x272   :  { %1124 = vmatpush3.bf16.msra.mxu1 %v1123_v6 }
 0x273   :  { %1126 = vmatprep.subr.bf16.mxu1 %v1125_v18 }
 0x276   :  { %1128 = vmatpush3.bf16.msra.mxu1 %v1127_v23 }
 0x277   :  { %1130 = vmatprep.subr.bf16.mxu1 %v1129_v24 }
 0x27a   :  { %1132 = vmatpush3.bf16.msra.mxu1 %v1131_v31 }
 0x27b   :  { %1134 = vmatprep.subr.bf16.mxu1 %v1133_v32 }
 0x27e   :  { %1136 = vmatpush3.bf16.msra.mxu1 %v1135_v37 }
 0x27f   :  { %1138 = vmatprep.subr.bf16.mxu1 %v1137_v40 }
 0x282   :  { %1140 = vmatpush3.bf16.msra.mxu1 %v1139_v29 }
 0x283   :  { %1142 = vmatprep.subr.bf16.mxu1 %v1141_v44 }
 0x286   :  { %1144 = vmatpush3.bf16.msra.mxu1 %v1143_v47 }
 0x289   :  { %786 = vmatmul.mubr.f32.vlgmr.msra.gmra.mrb[4].mxu1 %v1684_v5 }
 0x2fc   :  { %v503_v48 = vpop.f32.mrb[0].mxu1  ;;  %v574_v49 = vpop.f32.mrb[2].mxu0 }
 0x2fd   :  { %791 = vst [vmem:[%s2174_s5] sm:$0xff] %v503_v48  ;;  %793 = vst [vmem:[%s2174_s5 + $0x10] sm:$0xff] %v574_v49  ;;  %v505_v50 = vpop.f32.mrb[1].mxu1  ;;  %v576_v51 = vpop.f32.mrb[3].mxu0 }
 0x2fe   :  { %792 = vst [vmem:[%s2174_s5 + $0x8] sm:$0xff] %v505_v50  ;;  %794 = vst [vmem:[%s2174_s5 + $0x18] sm:$0xff] %v576_v51 }
 0x33c   :  { %v645_v5 = vpop.f32.mrb[2].mxu1  ;;  %v716_v52 = vpop.f32.mrb[4].mxu0 }
 0x33d   :  { %795 = vst [vmem:[%s2174_s5 + $0x20] sm:$0xff] %v645_v5  ;;  %797 = vst [vmem:[%s2174_s5 + $0x30] sm:$0xff] %v716_v52  ;;  %v647_v53 = vpop.f32.mrb[3].mxu1  ;;  %v718_v54 = vpop.f32.mrb[5].mxu0 }
 0x33e   :  { %796 = vst [vmem:[%s2174_s5 + $0x28] sm:$0xff] %v647_v53  ;;  %798 = vst [vmem:[%s2174_s5 + $0x38] sm:$0xff] %v718_v54 }
 0x35c   :  { %v838_v55 = vpop.f32.mrb[4].mxu1 }
 0x35d   :  { %v839_v56 = vpop.f32.mrb[5].mxu1 }
 0x35e   :  { %v840_v57 = vadd.f32 %v839_v56, %v838_v55 }
 0x360   :  { %800 = vst.msk [vmem:[%s2174_s5 + $0x40] sm:$0xff] %vm799_vm1, %v840_v57 }

// kernel: unet_forward.21
= control target key start
LH: loop header
LB: loop body
LE: loop exit
PB: predicated region body
PF: predicated region fallthrough
CT: control target
= control target key end

     0   :  { %v476_v3 = vmov 0.0   ;;  %v477_v8 = vmov 0   ;;  %vm93_vm0 = vcmask 588800   ;;  %s746_s0 = inlined_call_operand.vmem [shape: f32[72,1024], index: 0, kind: input, shape index: {}]   ;;  %s747_s1 = inlined_call_operand.vmem [shape: f32[4,72], index: 1, kind: input, shape index: {}]   ;;  %s748_s2 = inlined_call_operand.vmem [shape: f32[4,1], index: 2, kind: input, shape index: {}]   ;;  %s749_s3 = inlined_call_operand.vmem [shape: f32[4,1024], index: 3, kind: output, shape index: {}]  }
   0x1   :  { %v16_v0 = vld [vmem:[%s746_s0 + $0x8] sm:$0xff]  ;;  %v18_v2 = vld [vmem:[%s746_s0 + $0x18] sm:$0xff]  ;;  %161 = vmatprep.mubr.f32.mxu0 %v476_v3  ;;  %232 = vmatprep.mubr.f32.mxu1 %v476_v3  ;;  %v15_v6 = vld [vmem:[%s746_s0] sm:$0xff] }
   0x2   :  { %v24_v1 = vld [vmem:[%s746_s0 + $0x48] sm:$0xff]  ;;  %v26_v5 = vld [vmem:[%s746_s0 + $0x58] sm:$0xff]  ;;  %v23_v7 = vld [vmem:[%s746_s0 + $0x40] sm:$0xff]  ;;  %475 = vset.pattern.permute.xlu0 %v477_v8 }
   0x3   :  { %v409_v4 = vpack.c.bf16 %v24_v1, %v16_v0  ;;  %v425_v9 = vpack.c.bf16 %v26_v5, %v18_v2  ;;  %v411_v10 = vpack.c.bf16 %v23_v7, %v15_v6  ;;  %v17_v11 = vld [vmem:[%s746_s0 + $0x10] sm:$0xff]  ;;  %v32_v13 = vld [vmem:[%s746_s0 + $0x88] sm:$0xff]  ;;  %v34_v16 = vld [vmem:[%s746_s0 + $0x98] sm:$0xff] }
   0x4   :  { %v25_v12 = vld [vmem:[%s746_s0 + $0x50] sm:$0xff]  ;;  %v40_v15 = vld [vmem:[%s746_s0 + $0xc8] sm:$0xff]  ;;  %v42_v17 = vld [vmem:[%s746_s0 + $0xd8] sm:$0xff] }
   0x5   :  { %410 = vmatprep.subr.bf16.mxu0 %v409_v4  ;;  %v427_v14 = vpack.c.bf16 %v25_v12, %v17_v11  ;;  %426 = vmatprep.subr.bf16.mxu1 %v425_v9  ;;  %v413_v18 = vpack.c.bf16 %v40_v15, %v32_v13  ;;  %v429_v19 = vpack.c.bf16 %v42_v17, %v34_v16  ;;  %v31_v20 = vld [vmem:[%s746_s0 + $0x80] sm:$0xff]  ;;  %v33_v22 = vld [vmem:[%s746_s0 + $0x90] sm:$0xff]  ;;  %v48_v25 = vld [vmem:[%s746_s0 + $0x108] sm:$0xff] }
   0x6   :  { %412 = vmatpush1.bf16.msra.mxu0 %v411_v10  ;;  %v39_v21 = vld [vmem:[%s746_s0 + $0xc0] sm:$0xff]  ;;  %v41_v24 = vld [vmem:[%s746_s0 + $0xd0] sm:$0xff]  ;;  %v56_v26 = vld [vmem:[%s746_s0 + $0x148] sm:$0xff] }
   0x7   :  { %428 = vmatpush1.bf16.msra.mxu1 %v427_v14  ;;  %v415_v23 = vpack.c.bf16 %v39_v21, %v31_v20  ;;  %414 = vmatprep.subr.bf16.mxu0 %v413_v18  ;;  %v431_v27 = vpack.c.bf16 %v41_v24, %v33_v22  ;;  %v417_v28 = vpack.c.bf16 %v56_v26, %v48_v25  ;;  %v50_v29 = vld [vmem:[%s746_s0 + $0x118] sm:$0xff]  ;;  %v47_v31 = vld [vmem:[%s746_s0 + $0x100] sm:$0xff]  ;;  %v49_v34 = vld [vmem:[%s746_s0 + $0x110] sm:$0xff] }
   0x8   :  { %430 = vmatprep.subr.bf16.mxu1 %v429_v19  ;;  %v58_v30 = vld [vmem:[%s746_s0 + $0x158] sm:$0xff]  ;;  %v55_v33 = vld [vmem:[%s746_s0 + $0x140] sm:$0xff]  ;;  %v57_v35 = vld [vmem:[%s746_s0 + $0x150] sm:$0xff] }
   0x9   :  { %v433_v32 = vpack.c.bf16 %v58_v30, %v50_v29  ;;  %v419_v36 = vpack.c.bf16 %v55_v33, %v47_v31  ;;  %v64_v37 = vld [vmem:[%s746_s0 + $0x188] sm:$0xff]  ;;  %v66_v39 = vld [vmem:[%s746_s0 + $0x198] sm:$0xff]  ;;  %v435_v40 = vpack.c.bf16 %v57_v35, %v49_v34  ;;  %v63_v43 = vld [vmem:[%s746_s0 + $0x180] sm:$0xff] }
   0xa   :  { %416 = vmatpush1.bf16.msra.mxu0 %v415_v23  ;;  %v72_v38 = vld [vmem:[%s746_s0 + $0x1c8] sm:$0xff]  ;;  %v74_v42 = vld [vmem:[%s746_s0 + $0x1d8] sm:$0xff]  ;;  %v71_v44 = vld [vmem:[%s746_s0 + $0x1c0] sm:$0xff] }
   0xb   :  { %432 = vmatpush1.bf16.msra.mxu1 %v431_v27  ;;  %418 = vmatprep.subr.bf16.mxu0 %v417_v28  ;;  %v421_v41 = vpack.c.bf16 %v72_v38, %v64_v37  ;;  %v437_v45 = vpack.c.bf16 %v74_v42, %v66_v39  ;;  %v65_v46 = vld [vmem:[%s746_s0 + $0x190] sm:$0xff]  ;;  %v423_v48 = vpack.c.bf16 %v71_v44, %v63_v43  ;;  %v80_v50 = vld [vmem:[%s746_s0 + $0x208] sm:$0xff]  ;;  %v82_v51 = vld [vmem:[%s746_s0 + $0x218] sm:$0xff] }
   0xc   :  { %434 = vmatprep.subr.bf16.mxu1 %v433_v32  ;;  %v73_v47 = vld [vmem:[%s746_s0 + $0x1d0] sm:$0xff]  ;;  %v20_v52 = vld [vmem:[%s746_s0 + $0x28] sm:$0xff]  ;;  %v79_v53 = vld [vmem:[%s746_s0 + $0x200] sm:$0xff] }
   0xd   :  { %v439_v49 = vpack.c.bf16 %v73_v47, %v65_v46  ;;  %v28_v54 = vld [vmem:[%s746_s0 + $0x68] sm:$0xff]  ;;  %v22_v55 = vld [vmem:[%s746_s0 + $0x38] sm:$0xff]  ;;  %v81_v57 = vld [vmem:[%s746_s0 + $0x210] sm:$0xff] }
   0xe   :  { %420 = vmatpush1.bf16.msra.mxu0 %v419_v36  ;;  %v30_v56 = vld [vmem:[%s746_s0 + $0x78] sm:$0xff]  ;;  %v19_v58 = vld [vmem:[%s746_s0 + $0x20] sm:$0xff]  ;;  %v21_v60 = vld [vmem:[%s746_s0 + $0x30] sm:$0xff]  ;;  %v441_v1 = vpack.c.bf16 %v28_v54, %v20_v52 }
   0xf   :  { %436 = vmatpush1.bf16.msra.mxu1 %v435_v40  ;;  %422 = vmatprep.subr.bf16.mxu0 %v421_v41  ;;  %v27_v59 = vld [vmem:[%s746_s0 + $0x60] sm:$0xff]  ;;  %v29_v61 = vld [vmem:[%s746_s0 + $0x70] sm:$0xff]  ;;  %v36_v62 = vld [vmem:[%s746_s0 + $0xa8] sm:$0xff]  ;;  %v457_v5 = vpack.c.bf16 %v30_v56, %v22_v55 }
  0x10   :  { %438 = vmatprep.subr.bf16.mxu1 %v437_v45  ;;  %v44_v63 = vld [vmem:[%s746_s0 + $0xe8] sm:$0xff]  ;;  %v641_v0 = vld [vmem:[%s747_s1] sm:$0xf]  ;;  %v38_v2 = vld [vmem:[%s746_s0 + $0xb8] sm:$0xff]  ;;  %v443_v6 = vpack.c.bf16 %v27_v59, %v19_v58  ;;  %v459_v7 = vpack.c.bf16 %v29_v61, %v21_v60 }
  0x11   :  { %v46_v4 = vld [vmem:[%s746_s0 + $0xf8] sm:$0xff]  ;;  %v445_v8 = vpack.c.bf16 %v44_v63, %v36_v62  ;;  %v35_v9 = vld [vmem:[%s746_s0 + $0xa0] sm:$0xff]  ;;  %v37_v11 = vld [vmem:[%s746_s0 + $0xb0] sm:$0xff] }
  0x12   :  { %424 = vmatpush1.bf16.msra.mxu0 %v423_v48  ;;  %v43_v10 = vld [vmem:[%s746_s0 + $0xe0] sm:$0xff]  ;;  %v461_v12 = vpack.c.bf16 %v46_v4, %v38_v2  ;;  %v45_v13 = vld [vmem:[%s746_s0 + $0xf0] sm:$0xff]  ;;  %v52_v14 = vld [vmem:[%s746_s0 + $0x128] sm:$0xff] }
  0x13   :  { %440 = vmatpush1.bf16.msra.mxu1 %v439_v49  ;;  %113 = vmatprep.subr.mxu0 %v80_v50  ;;  %v60_v15 = vld [vmem:[%s746_s0 + $0x168] sm:$0xff]  ;;  %v54_v16 = vld [vmem:[%s746_s0 + $0x138] sm:$0xff]  ;;  %v447_v18 = vpack.c.bf16 %v43_v10, %v35_v9  ;;  %v51_v19 = vld [vmem:[%s746_s0 + $0x120] sm:$0xff]  ;;  %v463_v20 = vpack.c.bf16 %v45_v13, %v37_v11 }
  0x14   :  { %184 = vmatprep.subr.mxu1 %v82_v51  ;;  %v62_v17 = vld [vmem:[%s746_s0 + $0x178] sm:$0xff]  ;;  %v449_v21 = vpack.c.bf16 %v60_v15, %v52_v14  ;;  %v59_v22 = vld [vmem:[%s746_s0 + $0x160] sm:$0xff]  ;;  %v53_v23 = vld [vmem:[%s746_s0 + $0x130] sm:$0xff] }
  0x15   :  { %v87_v24 = vld [vmem:[%s748_s2] sm:$0xf]  ;;  %v465_v25 = vpack.c.bf16 %v62_v17, %v54_v16  ;;  %v61_v26 = vld [vmem:[%s746_s0 + $0x170] sm:$0xff]  ;;  %v68_v27 = vld [vmem:[%s746_s0 + $0x1a8] sm:$0xff]  ;;  %v451_v31 = vpack.c.bf16 %v59_v22, %v51_v19 }
  0x16   :  { %114 = vmatpush1.msra.mxu0 %v79_v53  ;;  %v76_v28 = vld [vmem:[%s746_s0 + $0x1e8] sm:$0xff]  ;;  %v70_v29 = vld [vmem:[%s746_s0 + $0x1b8] sm:$0xff]  ;;  %90 = vperm.xlu0 %475, %v87_v24   ;;  %v467_v32 = vpack.c.bf16 %v61_v26, %v53_v23  ;;  %v67_v34 = vld [vmem:[%s746_s0 + $0x1a0] sm:$0xff] }
  0x17   :  { %185 = vmatpush1.msra.mxu1 %v81_v57  ;;  %405 = vmatmul.mubr.msk.f32.vlgmr.msra.gmra.mrb[0].mxu0 %vm93_vm0, %v641_v0  ;;  %v78_v30 = vld [vmem:[%s746_s0 + $0x1f8] sm:$0xff]  ;;  %v453_v33 = vpack.c.bf16 %v76_v28, %v68_v27  ;;  %v75_v35 = vld [vmem:[%s746_s0 + $0x1e0] sm:$0xff]  ;;  %v77_v37 = vld [vmem:[%s746_s0 + $0x1f0] sm:$0xff] }
  0x18   :  { %406 = vmatmul.mubr.msk.f32.vlgmr.msra.gmra.mrb[0].mxu1 %vm93_vm0, %v641_v0  ;;  %442 = vmatprep.subr.bf16.mxu0 %v441_v1  ;;  %v469_v36 = vpack.c.bf16 %v78_v30, %v70_v29  ;;  %v455_v38 = vpack.c.bf16 %v75_v35, %v67_v34  ;;  %v84_v40 = vld [vmem:[%s746_s0 + $0x228] sm:$0xff]  ;;  %v86_v41 = vld [vmem:[%s746_s0 + $0x238] sm:$0xff]  ;;  %v83_v42 = vld [vmem:[%s746_s0 + $0x220] sm:$0xff] }
  0x19   :  { %458 = vmatprep.subr.bf16.mxu1 %v457_v5  ;;  %444 = vmatpush1.bf16.msra.mxu0 %v443_v6  ;;  %v85_v43 = vld [vmem:[%s746_s0 + $0x230] sm:$0xff] }
  0x1a   :  { %460 = vmatpush1.bf16.msra.mxu1 %v459_v7  ;;  %446 = vmatprep.subr.bf16.mxu0 %v445_v8 }
  0x1b   :  { %462 = vmatprep.subr.bf16.mxu1 %v461_v12  ;;  %303 = vmatprep.mubr.f32.mxu0 %v476_v3 }
  0x1c   :  { %374 = vmatprep.mubr.f32.mxu1 %v476_v3  ;;  %v69_v3 = vld [vmem:[%s746_s0 + $0x1b0] sm:$0xff] }
  0x1d   :  { %448 = vmatpush1.bf16.msra.mxu0 %v447_v18  ;;  %v471_v39 = vpack.c.bf16 %v77_v37, %v69_v3 }
  0x1e   :  { %464 = vmatpush1.bf16.msra.mxu1 %v463_v20  ;;  %450 = vmatprep.subr.bf16.mxu0 %v449_v21 }
  0x1f   :  { %466 = vmatprep.subr.bf16.mxu1 %v465_v25 }
  0x21   :  { %452 = vmatpush1.bf16.msra.mxu0 %v451_v31 }
  0x22   :  { %468 = vmatpush1.bf16.msra.mxu1 %v467_v32  ;;  %454 = vmatprep.subr.bf16.mxu0 %v453_v33 }
  0x23   :  { %470 = vmatprep.subr.bf16.mxu1 %v469_v36 }
  0x25   :  { %456 = vmatpush1.bf16.msra.mxu0 %v455_v38 }
  0x26   :  { %472 = vmatpush1.bf16.msra.mxu1 %v471_v39  ;;  %255 = vmatprep.subr.mxu0 %v84_v40 }
  0x27   :  { %326 = vmatprep.subr.mxu1 %v86_v41 }
  0x29   :  { %256 = vmatpush1.msra.mxu0 %v83_v42 }
  0x2a   :  { %327 = vmatpush1.msra.mxu1 %v85_v43  ;;  %407 = vmatmul.mubr.msk.f32.vlgmr.msra.gmra.mrb[2].mxu0 %vm93_vm0, %v641_v0 }
  0x2b   :  { %408 = vmatmul.mubr.msk.f32.vlgmr.msra.gmra.mrb[2].mxu1 %vm93_vm0, %v641_v0 }
  0x95   :  { %v91_v44 = vpop.permute.xlu0 %90 }
  0xea   :  { %v163_v45 = vpop.f32.mrb[0].mxu0 }
  0xeb   :  { %v234_v46 = vpop.f32.mrb[0].mxu1  ;;  %v164_v47 = vadd.f32 %v163_v45, %v91_v44  ;;  %v165_v48 = vpop.f32.mrb[1].mxu0 }
  0xec   :  { %v166_v49 = vadd.f32 %v165_v48, %v91_v44  ;;  %v235_v50 = vadd.f32 %v234_v46, %v91_v44  ;;  %v236_v51 = vpop.f32.mrb[1].mxu1 }
  0xed   :  { %v237_v52 = vadd.f32 %v236_v51, %v91_v44 }
  0xee   :  { %v389_v53 = vcombine.low %v164_v47, %v166_v49 }
  0xef   :  { %v390_v54 = vcombine.low %v235_v50, %v237_v52 }
  0xf0   :  { %397 = vst [vmem:[%s749_s3] sm:$0xff] %v389_v53 }
  0xf1   :  { %398 = vst [vmem:[%s749_s3 + $0x8] sm:$0xff] %v390_v54 }
  0xfd   :  { %v305_v55 = vpop.f32.mrb[2].mxu0 }
  0xfe   :  { %v306_v56 = vadd.f32 %v305_v55, %v91_v44  ;;  %v376_v57 = vpop.f32.mrb[2].mxu1  ;;  %v307_v58 = vpop.f32.mrb[3].mxu0 }
  0xff   :  { %v377_v59 = vadd.f32 %v376_v57, %v91_v44  ;;  %v308_v60 = vadd.f32 %v307_v58, %v91_v44  ;;  %v378_v61 = vpop.f32.mrb[3].mxu1 }
 0x100   :  { %v379_v62 = vadd.f32 %v378_v61, %v91_v44 }
 0x101   :  { %v391_v63 = vcombine.low %v306_v56, %v308_v60 }
 0x102   :  { %v392_v0 = vcombine.low %v377_v59, %v379_v62 }
 0x103   :  { %399 = vst [vmem:[%s749_s3 + $0x10] sm:$0xff] %v391_v63 }
 0x104   :  { %400 = vst [vmem:[%s749_s3 + $0x18] sm:$0xff] %v392_v0 }

// kernel: unet_forward.22
= control target key start
LH: loop header
LB: loop body
LE: loop exit
PB: predicated region body
PF: predicated region fallthrough
CT: control target
= control target key end

     0   :  { %v713_v3 = vmov 0.0   ;;  %vm99_vm0 = vcmask 588800   ;;  %vm715_vm1 = vmmov 0   ;;  %vm459_vm2 = vcmask 1043456   ;;  %s1046_s0 = inlined_call_operand.vmem [shape: f32[72,1088], index: 0, kind: input, shape index: {}]   ;;  %s1047_s1 = inlined_call_operand.vmem [shape: f32[4,72], index: 1, kind: input, shape index: {}]   ;;  %s1048_s2 = inlined_call_operand.vmem [shape: f32[4,1], index: 2, kind: input, shape index: {}]   ;;  %s1049_s3 = inlined_call_operand.vmem [shape: f32[4,1], index: 3, kind: input, shape index: {}]   ;;  %s1050_s4 = inlined_call_operand.vmem [shape: f32[4,1088], index: 4, kind: output, shape index: {}]  }
   0x1   :  { %v19_v0 = vld [vmem:[%s1046_s0 + $0x8] sm:$0xff]  ;;  %v28_v1 = vld [vmem:[%s1046_s0 + $0x50] sm:$0xff]  ;;  %v18_v2 = vld [vmem:[%s1046_s0] sm:$0xff]  ;;  %167 = vmatprep.mubr.f32.mxu0 %v713_v3  ;;  %238 = vmatprep.mubr.f32.mxu1 %v713_v3  ;;  %vm475_vm3 = vcmask 519168  }
   0x2   :  { %v629_v4 = vpack.c.bf16 %v28_v1, %v19_v0  ;;  %v27_v5 = vld [vmem:[%s1046_s0 + $0x48] sm:$0xff]  ;;  %v21_v6 = vld [vmem:[%s1046_s0 + $0x18] sm:$0xff]  ;;  %v30_v7 = vld [vmem:[%s1046_s0 + $0x60] sm:$0xff] }
   0x3   :  { %v631_v8 = vpack.c.bf16 %v27_v5, %v18_v2  ;;  %v645_v9 = vpack.c.bf16 %v30_v7, %v21_v6  ;;  %v37_v10 = vld [vmem:[%s1046_s0 + $0x98] sm:$0xff]  ;;  %v46_v11 = vld [vmem:[%s1046_s0 + $0xe0] sm:$0xff]  ;;  %v20_v12 = vld [vmem:[%s1046_s0 + $0x10] sm:$0xff] }
   0x4   :  { %630 = vmatprep.subr.bf16.mxu0 %v629_v4  ;;  %v633_v13 = vpack.c.bf16 %v46_v11, %v37_v10  ;;  %v29_v14 = vld [vmem:[%s1046_s0 + $0x58] sm:$0xff]  ;;  %v36_v15 = vld [vmem:[%s1046_s0 + $0x90] sm:$0xff]  ;;  %v39_v19 = vld [vmem:[%s1046_s0 + $0xa8] sm:$0xff] }
   0x5   :  { %v45_v16 = vld [vmem:[%s1046_s0 + $0xd8] sm:$0xff]  ;;  %632 = vmatpush1.bf16.msra.mxu0 %v631_v8  ;;  %646 = vmatprep.subr.bf16.mxu1 %v645_v9  ;;  %v647_v17 = vpack.c.bf16 %v29_v14, %v20_v12  ;;  %v48_v20 = vld [vmem:[%s1046_s0 + $0xf0] sm:$0xff]  ;;  %v55_v21 = vld [vmem:[%s1046_s0 + $0x128] sm:$0xff] }
   0x6   :  { %v635_v18 = vpack.c.bf16 %v45_v16, %v36_v15  ;;  %634 = vmatprep.subr.bf16.mxu0 %v633_v13  ;;  %v649_v22 = vpack.c.bf16 %v48_v20, %v39_v19  ;;  %v64_v23 = vld [vmem:[%s1046_s0 + $0x170] sm:$0xff]  ;;  %v38_v24 = vld [vmem:[%s1046_s0 + $0xa0] sm:$0xff]  ;;  %v47_v25 = vld [vmem:[%s1046_s0 + $0xe8] sm:$0xff] }
   0x7   :  { %648 = vmatpush1.bf16.msra.mxu1 %v647_v17  ;;  %v637_v26 = vpack.c.bf16 %v64_v23, %v55_v21  ;;  %v651_v27 = vpack.c.bf16 %v47_v25, %v38_v24  ;;  %v54_v28 = vld [vmem:[%s1046_s0 + $0x120] sm:$0xff]  ;;  %v63_v29 = vld [vmem:[%s1046_s0 + $0x168] sm:$0xff]  ;;  %v57_v30 = vld [vmem:[%s1046_s0 + $0x138] sm:$0xff] }
   0x8   :  { %650 = vmatprep.subr.bf16.mxu1 %v649_v22  ;;  %v66_v31 = vld [vmem:[%s1046_s0 + $0x180] sm:$0xff]  ;;  %v73_v32 = vld [vmem:[%s1046_s0 + $0x1b8] sm:$0xff]  ;;  %v639_v34 = vpack.c.bf16 %v63_v29, %v54_v28  ;;  %v56_v36 = vld [vmem:[%s1046_s0 + $0x130] sm:$0xff] }
   0x9   :  { %v82_v33 = vld [vmem:[%s1046_s0 + $0x200] sm:$0xff]  ;;  %636 = vmatpush1.bf16.msra.mxu0 %v635_v18  ;;  %v653_v35 = vpack.c.bf16 %v66_v31, %v57_v30  ;;  %v65_v37 = vld [vmem:[%s1046_s0 + $0x178] sm:$0xff]  ;;  %v72_v38 = vld [vmem:[%s1046_s0 + $0x1b0] sm:$0xff] }
   0xa   :  { %638 = vmatprep.subr.bf16.mxu0 %v637_v26  ;;  %v641_v39 = vpack.c.bf16 %v82_v33, %v73_v32  ;;  %v81_v40 = vld [vmem:[%s1046_s0 + $0x1f8] sm:$0xff]  ;;  %v75_v41 = vld [vmem:[%s1046_s0 + $0x1c8] sm:$0xff]  ;;  %v84_v42 = vld [vmem:[%s1046_s0 + $0x210] sm:$0xff]  ;;  %v655_v43 = vpack.c.bf16 %v65_v37, %v56_v36 }
   0xb   :  { %652 = vmatpush1.bf16.msra.mxu1 %v651_v27  ;;  %v657_v44 = vpack.c.bf16 %v84_v42, %v75_v41  ;;  %v74_v45 = vld [vmem:[%s1046_s0 + $0x1c0] sm:$0xff]  ;;  %v83_v46 = vld [vmem:[%s1046_s0 + $0x208] sm:$0xff]  ;;  %v643_v47 = vpack.c.bf16 %v81_v40, %v72_v38  ;;  %v32_v51 = vld [vmem:[%s1046_s0 + $0x70] sm:$0xff] }
   0xc   :  { %654 = vmatprep.subr.bf16.mxu1 %v653_v35  ;;  %v91_v48 = vld [vmem:[%s1046_s0 + $0x248] sm:$0xff]  ;;  %v659_v49 = vpack.c.bf16 %v83_v46, %v74_v45  ;;  %v90_v52 = vld [vmem:[%s1046_s0 + $0x240] sm:$0xff]  ;;  %v93_v56 = vld [vmem:[%s1046_s0 + $0x258] sm:$0xff] }
   0xd   :  { %640 = vmatpush1.bf16.msra.mxu0 %v639_v34  ;;  %v23_v50 = vld [vmem:[%s1046_s0 + $0x28] sm:$0xff]  ;;  %v22_v53 = vld [vmem:[%s1046_s0 + $0x20] sm:$0xff]  ;;  %v41_v57 = vld [vmem:[%s1046_s0 + $0xb8] sm:$0xff] }
   0xe   :  { %642 = vmatprep.subr.bf16.mxu0 %v641_v39  ;;  %v31_v54 = vld [vmem:[%s1046_s0 + $0x68] sm:$0xff]  ;;  %v861_v55 = vld [vmem:[%s1047_s1] sm:$0xf]  ;;  %v661_v59 = vpack.c.bf16 %v32_v51, %v23_v50  ;;  %v92_v60 = vld [vmem:[%s1046_s0 + $0x250] sm:$0xff] }
   0xf   :  { %656 = vmatpush1.bf16.msra.mxu1 %v655_v43  ;;  %v50_v58 = vld [vmem:[%s1046_s0 + $0x100] sm:$0xff]  ;;  %v25_v61 = vld [vmem:[%s1046_s0 + $0x38] sm:$0xff]  ;;  %v663_v63 = vpack.c.bf16 %v31_v54, %v22_v53  ;;  %v40_v0 = vld [vmem:[%s1046_s0 + $0xb0] sm:$0xff] }
  0x10   :  { %658 = vmatprep.subr.bf16.mxu1 %v657_v44  ;;  %v34_v62 = vld [vmem:[%s1046_s0 + $0x80] sm:$0xff]  ;;  %v24_v1 = vld [vmem:[%s1046_s0 + $0x30] sm:$0xff]  ;;  %v33_v2 = vld [vmem:[%s1046_s0 + $0x78] sm:$0xff]  ;;  %v665_v4 = vpack.c.bf16 %v50_v58, %v41_v57 }
  0x11   :  { %644 = vmatpush1.bf16.msra.mxu0 %v643_v47  ;;  %v49_v5 = vld [vmem:[%s1046_s0 + $0xf8] sm:$0xff]  ;;  %v43_v6 = vld [vmem:[%s1046_s0 + $0xc8] sm:$0xff]  ;;  %v52_v7 = vld [vmem:[%s1046_s0 + $0x110] sm:$0xff]  ;;  %v677_v8 = vpack.c.bf16 %v34_v62, %v25_v61  ;;  %v679_v11 = vpack.c.bf16 %v33_v2, %v24_v1 }
  0x12   :  { %119 = vmatprep.subr.mxu0 %v91_v48  ;;  %v59_v9 = vld [vmem:[%s1046_s0 + $0x148] sm:$0xff]  ;;  %v68_v10 = vld [vmem:[%s1046_s0 + $0x190] sm:$0xff]  ;;  %v667_v12 = vpack.c.bf16 %v49_v5, %v40_v0  ;;  %v681_v13 = vpack.c.bf16 %v52_v7, %v43_v6  ;;  %v58_v14 = vld [vmem:[%s1046_s0 + $0x140] sm:$0xff]  ;;  %v714_v48 = vmov 0.0|0.0  }
  0x13   :  { %660 = vmatpush1.bf16.msra.mxu1 %v659_v49  ;;  %v42_v15 = vld [vmem:[%s1046_s0 + $0xc0] sm:$0xff]  ;;  %v51_v16 = vld [vmem:[%s1046_s0 + $0x108] sm:$0xff]  ;;  %v669_v17 = vpack.c.bf16 %v68_v10, %v59_v9  ;;  %v61_v19 = vld [vmem:[%s1046_s0 + $0x158] sm:$0xff] }
  0x14   :  { %190 = vmatprep.subr.mxu1 %v93_v56  ;;  %v67_v18 = vld [vmem:[%s1046_s0 + $0x188] sm:$0xff]  ;;  %v70_v20 = vld [vmem:[%s1046_s0 + $0x1a0] sm:$0xff]  ;;  %v77_v21 = vld [vmem:[%s1046_s0 + $0x1d8] sm:$0xff]  ;;  %v683_v23 = vpack.c.bf16 %v51_v16, %v42_v15 }
  0x15   :  { %120 = vmatpush1.msra.mxu0 %v90_v52  ;;  %v86_v22 = vld [vmem:[%s1046_s0 + $0x220] sm:$0xff]  ;;  %v671_v24 = vpack.c.bf16 %v67_v18, %v58_v14  ;;  %v685_v25 = vpack.c.bf16 %v70_v20, %v61_v19  ;;  %v76_v26 = vld [vmem:[%s1046_s0 + $0x1d0] sm:$0xff]  ;;  %v69_v28 = vld [vmem:[%s1046_s0 + $0x198] sm:$0xff]  ;;  %v716_v20 = vmov 0  }
  0x16   :  { %593 = vmatmul.mubr.msk.f32.vlgmr.msra.gmra.mrb[0].mxu0 %vm99_vm0, %v861_v55  ;;  %662 = vmatprep.subr.bf16.mxu0 %v661_v59  ;;  %v60_v27 = vld [vmem:[%s1046_s0 + $0x150] sm:$0xff]  ;;  %v673_v29 = vpack.c.bf16 %v86_v22, %v77_v21  ;;  %v85_v30 = vld [vmem:[%s1046_s0 + $0x218] sm:$0xff]  ;;  %v79_v31 = vld [vmem:[%s1046_s0 + $0x1e8] sm:$0xff] }
  0x17   :  { %664 = vmatpush1.bf16.msra.mxu0 %v663_v63  ;;  %191 = vmatpush1.msra.mxu1 %v92_v60  ;;  %v88_v32 = vld [vmem:[%s1046_s0 + $0x230] sm:$0xff]  ;;  %v687_v33 = vpack.c.bf16 %v69_v28, %v60_v27  ;;  %v675_v34 = vpack.c.bf16 %v85_v30, %v76_v26  ;;  %v78_v36 = vld [vmem:[%s1046_s0 + $0x1e0] sm:$0xff]  ;;  %v87_v37 = vld [vmem:[%s1046_s0 + $0x228] sm:$0xff] }
  0x18   :  { %594 = vmatmul.mubr.msk.f32.vlgmr.msra.gmra.mrb[0].mxu1 %vm99_vm0, %v861_v55  ;;  %666 = vmatprep.subr.bf16.mxu0 %v665_v4  ;;  %v689_v35 = vpack.c.bf16 %v88_v32, %v79_v31  ;;  %v95_v38 = vld [vmem:[%s1046_s0 + $0x268] sm:$0xff]  ;;  %v691_v39 = vpack.c.bf16 %v87_v37, %v78_v36  ;;  %v26_v40 = vld [vmem:[%s1046_s0 + $0x40] sm:$0xff]  ;;  %v97_v43 = vld [vmem:[%s1046_s0 + $0x278] sm:$0xff] }
  0x19   :  { %678 = vmatprep.subr.bf16.mxu1 %v677_v8  ;;  %309 = vmatprep.mubr.f32.mxu0 %v713_v3  ;;  %v35_v41 = vld [vmem:[%s1046_s0 + $0x88] sm:$0xff]  ;;  %v94_v42 = vld [vmem:[%s1046_s0 + $0x260] sm:$0xff]  ;;  %v44_v45 = vld [vmem:[%s1046_s0 + $0xd0] sm:$0xff] }
  0x1a   :  { %680 = vmatpush1.bf16.msra.mxu1 %v679_v11  ;;  %380 = vmatprep.mubr.f32.mxu1 %v713_v3  ;;  %v694_v44 = vpack.c.bf16 %v35_v41, %v26_v40  ;;  %v53_v46 = vld [vmem:[%s1046_s0 + $0x118] sm:$0xff]  ;;  %v96_v47 = vld [vmem:[%s1046_s0 + $0x270] sm:$0xff]  ;;  %v62_v50 = vld [vmem:[%s1046_s0 + $0x160] sm:$0xff] }
  0x1b   :  { %668 = vmatpush1.bf16.msra.mxu0 %v667_v12  ;;  %682 = vmatprep.subr.bf16.mxu1 %v681_v13  ;;  %v697_v49 = vpack.c.bf16 %v53_v46, %v44_v45  ;;  %v71_v51 = vld [vmem:[%s1046_s0 + $0x1a8] sm:$0xff]  ;;  %v80_v53 = vld [vmem:[%s1046_s0 + $0x1f0] sm:$0xff]  ;;  %v89_v54 = vld [vmem:[%s1046_s0 + $0x238] sm:$0xff] }
  0x1c   :  { %670 = vmatprep.subr.bf16.mxu0 %v669_v17  ;;  %v700_v52 = vpack.c.bf16 %v71_v51, %v62_v50  ;;  %v703_v56 = vpack.c.bf16 %v89_v54, %v80_v53  ;;  %v98_v57 = vld [vmem:[%s1046_s0 + $0x280] sm:$0xff]  ;;  %709 = vset.pattern.permute.xlu1 %v716_v20 }
  0x1d   :  { %v457_v21 = vld [vmem:[%s1048_s2] sm:$0xf]  ;;  %710 = vset.pattern.permute.xlu0 %v716_v20 }
  0x1e   :  { %684 = vmatpush1.bf16.msra.mxu1 %v683_v23  ;;  %533 = vperm.xlu1 %709, %v457_v21   ;;  %v458_v22 = vld [vmem:[%s1049_s3] sm:$0xf] }
  0x1f   :  { %672 = vmatpush1.bf16.msra.mxu0 %v671_v24  ;;  %686 = vmatprep.subr.bf16.mxu1 %v685_v25 }
  0x20   :  { %674 = vmatprep.subr.bf16.mxu0 %v673_v29 }
  0x22   :  { %688 = vmatpush1.bf16.msra.mxu1 %v687_v33  ;;  %547 = vperm.xlu1 %709, %v458_v22  }
  0x23   :  { %676 = vmatpush1.bf16.msra.mxu0 %v675_v34  ;;  %690 = vmatprep.subr.bf16.mxu1 %v689_v35 }
  0x24   :  { %261 = vmatprep.subr.mxu0 %v95_v38 }
  0x26   :  { %692 = vmatpush1.bf16.msra.mxu1 %v691_v39 }
  0x27   :  { %262 = vmatpush1.msra.mxu0 %v94_v42  ;;  %332 = vmatprep.subr.mxu1 %v97_v43 }
  0x28   :  { %595 = vmatmul.mubr.msk.f32.vlgmr.msra.gmra.mrb[2].mxu0 %vm99_vm0, %v861_v55  ;;  %693 = vmatprep.subr.bf16.mxu0 %v714_v48 }
  0x29   :  { %695 = vmatpush3.bf16.msra.mxu0 %v694_v44  ;;  %626 = vmatprep.mubr.msk.f32.mxu0 %vm715_vm1, %v713_v3 }
  0x2a   :  { %333 = vmatpush1.msra.mxu1 %v96_v47  ;;  %696 = vmatprep.subr.bf16.mxu0 %v714_v48 }
  0x2b   :  { %596 = vmatmul.mubr.msk.f32.vlgmr.msra.gmra.mrb[2].mxu1 %vm99_vm0, %v861_v55 }
  0x2d   :  { %698 = vmatpush3.bf16.msra.mxu0 %v697_v49 }
  0x2e   :  { %699 = vmatprep.subr.bf16.mxu0 %v714_v48 }
  0x31   :  { %701 = vmatpush3.bf16.msra.mxu0 %v700_v52 }
  0x32   :  { %702 = vmatprep.subr.bf16.mxu0 %v714_v48 }
  0x35   :  { %704 = vmatpush3.bf16.msra.mxu0 %v703_v56 }
  0x36   :  { %624 = vmatprep.subr.mxu0 %v713_v3 }
  0x39   :  { %625 = vmatpush3.msra.mxu0 %v98_v57 }
  0x3a   :  { %627 = vmatmul.mubr.msk.f32.vlgmr.msra.gmra.mrb[4].mxu0 %vm99_vm0, %v861_v55 }
  0xe9   :  { %v169_v58 = vpop.f32.mrb[0].mxu0 }
  0xea   :  { %v460_v59 = vsel %vm459_vm2, %v169_v58, 0.0  ;;  %v171_v60 = vpop.f32.mrb[1].mxu0 }
  0xeb   :  { %v461_v61 = vsel %vm459_vm2, %v171_v60, 0.0  ;;  %v240_v62 = vpop.f32.mrb[0].mxu1 }
  0xec   :  { %v462_v63 = vadd.f32 %v461_v61, %v460_v59  ;;  %v463_v0 = vsel %vm459_vm2, %v240_v62, 0.0  ;;  %v242_v3 = vpop.f32.mrb[1].mxu1 }
  0xed   :  { %v465_v1 = vsel %vm459_vm2, %v242_v3, 0.0 }
  0xee   :  { %v464_v2 = vadd.f32 %v463_v0, %v462_v63  ;;  %v534_v0 = vpop.permute.xlu1 %533 }
  0xf0   :  { %v466_v4 = vadd.f32 %v465_v1, %v464_v2 }
  0xfb   :  { %v311_v5 = vpop.f32.mrb[2].mxu0 }
  0xfc   :  { %v467_v6 = vsel %vm459_vm2, %v311_v5, 0.0  ;;  %v313_v55 = vpop.f32.mrb[3].mxu0 }
  0xfd   :  { %v468_v7 = vadd.f32 %v467_v6, %v466_v4  ;;  %v469_v8 = vsel %vm459_vm2, %v313_v55, 0.0 }
  0xfe   :  { %v382_v9 = vpop.f32.mrb[2].mxu1 }
  0xff   :  { %v470_v10 = vadd.f32 %v469_v8, %v468_v7  ;;  %v471_v11 = vsel %vm459_vm2, %v382_v9, 0.0  ;;  %v384_v12 = vpop.f32.mrb[3].mxu1 }
 0x100   :  { %v473_v13 = vsel %vm459_vm2, %v384_v12, 0.0 }
 0x101   :  { %v472_v14 = vadd.f32 %v471_v11, %v470_v10 }
 0x103   :  { %v474_v15 = vadd.f32 %v473_v13, %v472_v14  ;;  %v548_v13 = vpop.permute.xlu1 %547 }
 0x10d   :  { %v453_v16 = vpop.f32.mrb[4].mxu0 }
 0x10e   :  { %v628_v17 = vpop.f32.mrb[5].mxu0  ;;  %v476_v18 = vsel %vm475_vm3, %v453_v16, 0.0 }
 0x10f   :  { %v477_v19 = vadd.f32 %v476_v18, %v474_v15 }
 0x111   :  { %478 = vadd.xlane.f32.xlu0 %v477_v19 }
 0x19e   :  { %v479_v23 = vpop.xlane.xlu0 %478 }
 0x19f   :  { %v481_v24 = vmul.f32 0.00091911765, %v479_v23 }
 0x1a1   :  { %v482_v25 = vsub.f32 %v169_v58, %v481_v24  ;;  %v483_v26 = vsub.f32 %v171_v60, %v481_v24  ;;  %v484_v27 = vsub.f32 %v240_v62, %v481_v24  ;;  %v485_v28 = vsub.f32 %v242_v3, %v481_v24 }
 0x1a2   :  { %v486_v29 = vsub.f32 %v311_v5, %v481_v24  ;;  %v487_v33 = vsub.f32 %v313_v55, %v481_v24  ;;  %v488_v38 = vsub.f32 %v382_v9, %v481_v24  ;;  %v489_v42 = vsub.f32 %v384_v12, %v481_v24 }
 0x1a3   :  { %v491_v30 = vmul.f32 %v482_v25, %v482_v25  ;;  %v492_v31 = vmul.f32 %v483_v26, %v483_v26  ;;  %v493_v32 = vmul.f32 %v484_v27, %v484_v27  ;;  %v494_v34 = vmul.f32 %v485_v28, %v485_v28 }
 0x1a4   :  { %v495_v39 = vmul.f32 %v486_v29, %v486_v29  ;;  %v496_v43 = vmul.f32 %v487_v33, %v487_v33  ;;  %v490_v46 = vsub.f32 %v453_v16, %v481_v24  ;;  %v497_v47 = vmul.f32 %v488_v38, %v488_v38 }
 0x1a5   :  { %v500_v35 = vsel %vm459_vm2, %v491_v30, 0.0  ;;  %v501_v36 = vsel %vm459_vm2, %v492_v31, 0.0  ;;  %v503_v40 = vsel %vm459_vm2, %v493_v32, 0.0  ;;  %v505_v44 = vsel %vm459_vm2, %v494_v34, 0.0 }
 0x1a6   :  { %v502_v37 = vadd.f32 %v501_v36, %v500_v35  ;;  %v507_v48 = vsel %vm459_vm2, %v495_v39, 0.0  ;;  %v498_v50 = vmul.f32 %v489_v42, %v489_v42  ;;  %v509_v51 = vsel %vm459_vm2, %v496_v43, 0.0 }
 0x1a7   :  { %v499_v53 = vmul.f32 %v490_v46, %v490_v46  ;;  %v511_v54 = vsel %vm459_vm2, %v497_v47, 0.0 }
 0x1a8   :  { %v504_v41 = vadd.f32 %v503_v40, %v502_v37  ;;  %v513_v57 = vsel %vm459_vm2, %v498_v50, 0.0 }
 0x1a9   :  { %v515_v59 = vsel %vm475_vm3, %v499_v53, 0.0 }
 0x1aa   :  { %v506_v45 = vadd.f32 %v505_v44, %v504_v41 }
 0x1ac   :  { %v508_v49 = vadd.f32 %v507_v48, %v506_v45 }
 0x1ae   :  { %v510_v52 = vadd.f32 %v509_v51, %v508_v49 }
 0x1b0   :  { %v512_v56 = vadd.f32 %v511_v54, %v510_v52 }
 0x1b2   :  { %v514_v58 = vadd.f32 %v513_v57, %v512_v56 }
 0x1b4   :  { %v516_v60 = vadd.f32 %v515_v59, %v514_v58 }
 0x1b6   :  { %517 = vadd.xlane.f32.xlu0 %v516_v60 }
 0x243   :  { %v518_v61 = vpop.xlane.xlu0 %517 }
 0x244   :  { %v519_v62 = vmul.f32 0.00091911765, %v518_v61 }
 0x246   :  { %v520_v63 = vadd.f32 1e-05, %v519_v62 }
 0x248   :  { %711 = vrsqrt.f32 %v520_v63 }
 0x252   :  { %v712_v3 = vpop.eup %711 }
 0x253   :  { %v522_v1 = vmul.f32 %v712_v3, %v482_v25  ;;  %v523_v2 = vmul.f32 %v712_v3, %v483_v26  ;;  %v524_v4 = vmul.f32 %v712_v3, %v484_v27  ;;  %v525_v5 = vmul.f32 %v712_v3, %v485_v28 }
 0x254   :  { %v526_v6 = vmul.f32 %v712_v3, %v486_v29  ;;  %v527_v55 = vmul.f32 %v712_v3, %v487_v33  ;;  %v528_v7 = vmul.f32 %v712_v3, %v488_v38  ;;  %v529_v8 = vmul.f32 %v712_v3, %v489_v42 }
 0x255   :  { %v530_v9 = vmul.f32 %v712_v3, %v490_v46  ;;  %v536_v10 = vmul.f32 %v534_v0, %v522_v1  ;;  %v537_v11 = vmul.f32 %v534_v0, %v523_v2  ;;  %v538_v12 = vmul.f32 %v534_v0, %v524_v4 }
 0x256   :  { %v539_v14 = vmul.f32 %v534_v0, %v525_v5  ;;  %v540_v15 = vmul.f32 %v534_v0, %v526_v6  ;;  %v541_v16 = vmul.f32 %v534_v0, %v527_v55  ;;  %v542_v17 = vmul.f32 %v534_v0, %v528_v7 }
 0x257   :  { %v543_v18 = vmul.f32 %v534_v0, %v529_v8  ;;  %v544_v19 = vmul.f32 %v534_v0, %v530_v9  ;;  %v550_v20 = vadd.f32 %v548_v13, %v536_v10  ;;  %v551_v21 = vadd.f32 %v548_v13, %v537_v11 }
 0x258   :  { %v552_v22 = vadd.f32 %v548_v13, %v538_v12  ;;  %v553_v23 = vadd.f32 %v548_v13, %v539_v14  ;;  %v554_v24 = vadd.f32 %v548_v13, %v540_v15  ;;  %v555_v25 = vadd.f32 %v548_v13, %v541_v16 }
 0x259   :  { %v556_v26 = vadd.f32 %v548_v13, %v542_v17  ;;  %v557_v27 = vadd.f32 %v548_v13, %v543_v18  ;;  %v558_v28 = vadd.f32 %v548_v13, %v544_v19  ;;  %v559_v29 = vmax.f32 %v550_v20, 0.0 }
 0x25a   :  { %v560_v30 = vmax.f32 %v551_v21, 0.0  ;;  %v561_v31 = vmax.f32 %v552_v22, 0.0  ;;  %v562_v32 = vmax.f32 %v553_v23, 0.0  ;;  %v563_v33 = vmax.f32 %v554_v24, 0.0 }
 0x25b   :  { %v564_v34 = vmax.f32 %v555_v25, 0.0  ;;  %v565_v35 = vmax.f32 %v556_v26, 0.0  ;;  %v566_v36 = vmax.f32 %v557_v27, 0.0  ;;  %v567_v37 = vmax.f32 %v558_v28, 0.0 }
 0x25c   :  { %v576_v38 = vcombine.low %v559_v29, %v560_v30  ;;  %v577_v39 = vcombine.low %v561_v31, %v562_v32 }
 0x25d   :  { %v578_v40 = vcombine.low %v563_v33, %v564_v34  ;;  %v579_v41 = vcombine.low %v565_v35, %v566_v36  ;;  %588 = vst.msk [vmem:[%s1050_s4 + $0x20] sm:$0xf] %vm475_vm3, %v567_v37 }
 0x25e   :  { %584 = vst [vmem:[%s1050_s4] sm:$0xff] %v576_v38  ;;  %585 = vst [vmem:[%s1050_s4 + $0x8] sm:$0xff] %v577_v39 }
 0x25f   :  { %586 = vst [vmem:[%s1050_s4 + $0x10] sm:$0xff] %v578_v40  ;;  %587 = vst [vmem:[%s1050_s4 + $0x18] sm:$0xff] %v579_v41 }

// kernel: unet_forward.23
= control target key start
LH: loop header
LB: loop body
LE: loop exit
PB: predicated region body
PF: predicated region fallthrough
CT: control target
= control target key end

     0   :  { %v1118_v3 = vmov 0.0   ;;  %vm73_vm0 = vcmask 1043456   ;;  %vm69_vm1 = vcmask 293888   ;;  %v1119_v63 = vmov 0.0|0.0   ;;  %s1384_s0 = inlined_call_operand.vmem [shape: f32[36,1152], index: 0, kind: input, shape index: {}]   ;;  %s1385_s1 = inlined_call_operand.vmem [shape: f32[4,36], index: 1, kind: input, shape index: {}]   ;;  %s1386_s2 = inlined_call_operand.vmem [shape: f32[4,1], index: 2, kind: input, shape index: {}]   ;;  %s1387_s3 = inlined_call_operand.vmem [shape: f32[4,1], index: 3, kind: input, shape index: {}]   ;;  %s1388_s5 = inlined_call_operand.vmem [shape: f32[2,1], index: 5, kind: input, shape index: {}]   ;;  %s1389_s4 = inlined_call_operand.vmem [shape: f32[2,4], index: 4, kind: input, shape index: {}]   ;;  %s1390_s6 = inlined_call_operand.vmem [shape: f32[2,1152], index: 6, kind: output, shape index: {}]  }
   0x1   :  { %v25_v0 = vld [vmem:[%s1384_s0 + $0x8] sm:$0xff]  ;;  %v34_v1 = vld [vmem:[%s1384_s0 + $0x50] sm:$0xff]  ;;  %v24_v2 = vld [vmem:[%s1384_s0] sm:$0xff]  ;;  %165 = vmatprep.mubr.f32.mxu0 %v1118_v3  ;;  %236 = vmatprep.mubr.f32.mxu1 %v1118_v3  ;;  %vm1120_vm2 = vmmov 0   ;;  %vm571_vm3 = vcmask 31744  }
   0x2   :  { %v1071_v4 = vpack.c.bf16 %v34_v1, %v25_v0  ;;  %v33_v5 = vld [vmem:[%s1384_s0 + $0x48] sm:$0xff]  ;;  %v27_v6 = vld [vmem:[%s1384_s0 + $0x18] sm:$0xff]  ;;  %v36_v7 = vld [vmem:[%s1384_s0 + $0x60] sm:$0xff] }
   0x3   :  { %v1073_v8 = vpack.c.bf16 %v33_v5, %v24_v2  ;;  %v1079_v9 = vpack.c.bf16 %v36_v7, %v27_v6  ;;  %v43_v10 = vld [vmem:[%s1384_s0 + $0x98] sm:$0xff]  ;;  %v52_v11 = vld [vmem:[%s1384_s0 + $0xe0] sm:$0xff]  ;;  %v26_v12 = vld [vmem:[%s1384_s0 + $0x10] sm:$0xff] }
   0x4   :  { %1072 = vmatprep.subr.bf16.mxu0 %v1071_v4  ;;  %v1075_v13 = vpack.c.bf16 %v52_v11, %v43_v10  ;;  %v35_v14 = vld [vmem:[%s1384_s0 + $0x58] sm:$0xff]  ;;  %v42_v15 = vld [vmem:[%s1384_s0 + $0x90] sm:$0xff]  ;;  %v45_v19 = vld [vmem:[%s1384_s0 + $0xa8] sm:$0xff] }
   0x5   :  { %v51_v16 = vld [vmem:[%s1384_s0 + $0xd8] sm:$0xff]  ;;  %1074 = vmatpush1.bf16.msra.mxu0 %v1073_v8  ;;  %1080 = vmatprep.subr.bf16.mxu1 %v1079_v9  ;;  %v1081_v17 = vpack.c.bf16 %v35_v14, %v26_v12  ;;  %v54_v20 = vld [vmem:[%s1384_s0 + $0xf0] sm:$0xff]  ;;  %v44_v22 = vld [vmem:[%s1384_s0 + $0xa0] sm:$0xff] }
   0x6   :  { %v1077_v18 = vpack.c.bf16 %v51_v16, %v42_v15  ;;  %1076 = vmatprep.subr.bf16.mxu0 %v1075_v13  ;;  %v1083_v21 = vpack.c.bf16 %v54_v20, %v45_v19  ;;  %v53_v23 = vld [vmem:[%s1384_s0 + $0xe8] sm:$0xff]  ;;  %v38_v27 = vld [vmem:[%s1384_s0 + $0x70] sm:$0xff]  ;;  %v60_v28 = vld [vmem:[%s1384_s0 + $0x120] sm:$0xf] }
   0x7   :  { %1082 = vmatpush1.bf16.msra.mxu1 %v1081_v17  ;;  %v61_v24 = vld [vmem:[%s1384_s0 + $0x128] sm:$0xf]  ;;  %v1085_v25 = vpack.c.bf16 %v53_v23, %v44_v22  ;;  %v28_v29 = vld [vmem:[%s1384_s0 + $0x20] sm:$0xff]  ;;  %v63_v32 = vld [vmem:[%s1384_s0 + $0x138] sm:$0xf] }
   0x8   :  { %v29_v26 = vld [vmem:[%s1384_s0 + $0x28] sm:$0xff]  ;;  %1084 = vmatprep.subr.bf16.mxu1 %v1083_v21  ;;  %v1229_v31 = vld [vmem:[%s1385_s1] sm:$0xf]  ;;  %v47_v33 = vld [vmem:[%s1384_s0 + $0xb8] sm:$0xff] }
   0x9   :  { %v37_v30 = vld [vmem:[%s1384_s0 + $0x68] sm:$0xff]  ;;  %1078 = vmatpush1.bf16.msra.mxu0 %v1077_v18  ;;  %v56_v34 = vld [vmem:[%s1384_s0 + $0x100] sm:$0xff]  ;;  %v1087_v35 = vpack.c.bf16 %v38_v27, %v29_v26  ;;  %v62_v36 = vld [vmem:[%s1384_s0 + $0x130] sm:$0xf] }
   0xa   :  { %1016 = vmatprep.subr.msk.mxu0 %vm73_vm0, %v61_v24  ;;  %v31_v37 = vld [vmem:[%s1384_s0 + $0x38] sm:$0xff]  ;;  %v40_v38 = vld [vmem:[%s1384_s0 + $0x80] sm:$0xff]  ;;  %v1089_v39 = vpack.c.bf16 %v37_v30, %v28_v29  ;;  %v46_v40 = vld [vmem:[%s1384_s0 + $0xb0] sm:$0xff]  ;;  %v1091_v43 = vpack.c.bf16 %v56_v34, %v47_v33  ;;  %v1121_v30 = vmov 0  }
   0xb   :  { %1086 = vmatpush1.bf16.msra.mxu1 %v1085_v25  ;;  %v30_v41 = vld [vmem:[%s1384_s0 + $0x30] sm:$0xff]  ;;  %v39_v42 = vld [vmem:[%s1384_s0 + $0x78] sm:$0xff]  ;;  %v49_v45 = vld [vmem:[%s1384_s0 + $0xc8] sm:$0xff]  ;;  %v1095_v47 = vpack.c.bf16 %v40_v38, %v31_v37  ;;  %1114 = vset.pattern.permute.xlu1 %v1121_v30 }
   0xc   :  { %1019 = vmatprep.subr.msk.mxu1 %vm73_vm0, %v63_v32  ;;  %v55_v44 = vld [vmem:[%s1384_s0 + $0xf8] sm:$0xff]  ;;  %v58_v46 = vld [vmem:[%s1384_s0 + $0x110] sm:$0xff]  ;;  %v1097_v48 = vpack.c.bf16 %v39_v42, %v30_v41  ;;  %v48_v51 = vld [vmem:[%s1384_s0 + $0xc0] sm:$0xff]  ;;  %1115 = vset.pattern.permute.xlu0 %v1121_v30 }
   0xd   :  { %1017 = vmatpush1.msk.msra.mxu0 %vm73_vm0, %v60_v28  ;;  %v1093_v49 = vpack.c.bf16 %v55_v44, %v46_v40  ;;  %v1099_v50 = vpack.c.bf16 %v58_v46, %v49_v45  ;;  %v57_v52 = vld [vmem:[%s1384_s0 + $0x108] sm:$0xff]  ;;  %v32_v55 = vld [vmem:[%s1384_s0 + $0x40] sm:$0xff]  ;;  %v67_v58 = vld [vmem:[%s1384_s0 + $0x158] sm:$0xf] }
   0xe   :  { %1018 = vmatmul.mubr.msk.f32.vlgmr.msra.gmra.mrb[0].mxu0 %vm69_vm1, %v1229_v31  ;;  %1088 = vmatprep.subr.bf16.mxu0 %v1087_v35  ;;  %v65_v53 = vld [vmem:[%s1384_s0 + $0x148] sm:$0xf]  ;;  %v1101_v54 = vpack.c.bf16 %v57_v52, %v48_v51  ;;  %v64_v57 = vld [vmem:[%s1384_s0 + $0x140] sm:$0xf]  ;;  %v50_v60 = vld [vmem:[%s1384_s0 + $0xd0] sm:$0xff] }
   0xf   :  { %1090 = vmatpush1.bf16.msra.mxu0 %v1089_v39  ;;  %1020 = vmatpush1.msk.msra.mxu1 %vm73_vm0, %v62_v36  ;;  %v41_v56 = vld [vmem:[%s1384_s0 + $0x88] sm:$0xff]  ;;  %v59_v61 = vld [vmem:[%s1384_s0 + $0x118] sm:$0xff]  ;;  %v66_v62 = vld [vmem:[%s1384_s0 + $0x150] sm:$0xf] }
  0x10   :  { %1021 = vmatmul.mubr.msk.f32.vlgmr.msra.gmra.mrb[0].mxu1 %vm69_vm1, %v1229_v31  ;;  %1092 = vmatprep.subr.bf16.mxu0 %v1091_v43  ;;  %v1104_v59 = vpack.c.bf16 %v41_v56, %v32_v55  ;;  %v1107_v0 = vpack.c.bf16 %v59_v61, %v50_v60  ;;  %v68_v1 = vld [vmem:[%s1384_s0 + $0x160] sm:$0xf] }
  0x11   :  { %1096 = vmatprep.subr.bf16.mxu1 %v1095_v47  ;;  %307 = vmatprep.mubr.f32.mxu0 %v1118_v3  ;;  %v456_v32 = vld [vmem:[%s1387_s3] sm:$0xf] }
  0x12   :  { %1098 = vmatpush1.bf16.msra.mxu1 %v1097_v48  ;;  %378 = vmatprep.mubr.f32.mxu1 %v1118_v3 }
  0x13   :  { %1094 = vmatpush1.bf16.msra.mxu0 %v1093_v49  ;;  %1100 = vmatprep.subr.bf16.mxu1 %v1099_v50 }
  0x14   :  { %1022 = vmatprep.subr.msk.mxu0 %vm73_vm0, %v65_v53 }
  0x16   :  { %1102 = vmatpush1.bf16.msra.mxu1 %v1101_v54 }
  0x17   :  { %1023 = vmatpush1.msk.msra.mxu0 %vm73_vm0, %v64_v57  ;;  %1025 = vmatprep.subr.msk.mxu1 %vm73_vm0, %v67_v58 }
  0x18   :  { %1024 = vmatmul.mubr.msk.f32.vlgmr.msra.gmra.mrb[2].mxu0 %vm69_vm1, %v1229_v31  ;;  %1103 = vmatprep.subr.bf16.mxu0 %v1119_v63 }
  0x19   :  { %1105 = vmatpush3.bf16.msra.mxu0 %v1104_v59  ;;  %1063 = vmatprep.mubr.msk.f32.mxu0 %vm1120_vm2, %v1118_v3 }
  0x1a   :  { %1026 = vmatpush1.msk.msra.mxu1 %vm73_vm0, %v66_v62  ;;  %1106 = vmatprep.subr.bf16.mxu0 %v1119_v63 }
  0x1b   :  { %1027 = vmatmul.mubr.msk.f32.vlgmr.msra.gmra.mrb[2].mxu1 %vm69_vm1, %v1229_v31 }
  0x1c   :  { %666 = vmatprep.mubr.f32.mxu1 %v1118_v3 }
  0x1d   :  { %1108 = vmatpush3.bf16.msra.mxu0 %v1107_v0 }
  0x1e   :  { %1061 = vmatprep.subr.mxu0 %v1118_v3 }
  0x21   :  { %1062 = vmatpush3.msk.msra.mxu0 %vm73_vm0, %v68_v1 }
  0x22   :  { %1064 = vmatmul.mubr.msk.f32.vlgmr.msra.gmra.mrb[4].mxu0 %vm69_vm1, %v1229_v31  ;;  %v455_v31 = vld [vmem:[%s1386_s2] sm:$0xf] }
  0x23   :  { %879 = vmatprep.mubr.f32.mxu0 %v1118_v3  ;;  %529 = vperm.xlu1 %1114, %v455_v31  }
  0x27   :  { %543 = vperm.xlu1 %1114, %v456_v32  }
  0xe1   :  { %v167_v2 = vpop.f32.mrb[0].mxu0 }
  0xe2   :  { %v457_v4 = vsel %vm73_vm0, %v167_v2, 0.0  ;;  %v169_v5 = vpop.f32.mrb[1].mxu0 }
  0xe3   :  { %v458_v6 = vsel %vm73_vm0, %v169_v5, 0.0  ;;  %v238_v7 = vpop.f32.mrb[0].mxu1 }
  0xe4   :  { %v459_v8 = vadd.f32 %v458_v6, %v457_v4  ;;  %v460_v9 = vsel %vm73_vm0, %v238_v7, 0.0  ;;  %v240_v10 = vpop.f32.mrb[1].mxu1 }
  0xe5   :  { %v462_v11 = vsel %vm73_vm0, %v240_v10, 0.0 }
  0xe6   :  { %v461_v12 = vadd.f32 %v460_v9, %v459_v8 }
  0xe8   :  { %v463_v13 = vadd.f32 %v462_v11, %v461_v12  ;;  %v530_v11 = vpop.permute.xlu1 %529 }
  0xeb   :  { %v309_v14 = vpop.f32.mrb[2].mxu0 }
  0xec   :  { %v464_v15 = vsel %vm73_vm0, %v309_v14, 0.0  ;;  %v311_v16 = vpop.f32.mrb[3].mxu0 }
  0xed   :  { %v465_v17 = vadd.f32 %v464_v15, %v463_v13  ;;  %v466_v18 = vsel %vm73_vm0, %v311_v16, 0.0 }
  0xee   :  { %v380_v19 = vpop.f32.mrb[2].mxu1 }
  0xef   :  { %v467_v20 = vadd.f32 %v466_v18, %v465_v17  ;;  %v468_v21 = vsel %vm73_vm0, %v380_v19, 0.0  ;;  %v382_v22 = vpop.f32.mrb[3].mxu1 }
  0xf0   :  { %v470_v23 = vsel %vm73_vm0, %v382_v22, 0.0 }
  0xf1   :  { %v469_v24 = vadd.f32 %v468_v21, %v467_v20 }
  0xf3   :  { %v471_v25 = vadd.f32 %v470_v23, %v469_v24 }
  0xf5   :  { %v451_v26 = vpop.f32.mrb[4].mxu0 }
  0xf6   :  { %v1065_v27 = vpop.f32.mrb[5].mxu0  ;;  %v472_v28 = vsel %vm73_vm0, %v451_v26, 0.0 }
  0xf7   :  { %v473_v29 = vadd.f32 %v472_v28, %v471_v25  ;;  %v544_v25 = vpop.permute.xlu1 %543 }
  0xf9   :  { %474 = vadd.xlane.f32.xlu0 %v473_v29 }
 0x186   :  { %v475_v33 = vpop.xlane.xlu0 %474 }
 0x187   :  { %v477_v34 = vmul.f32 0.00086805556, %v475_v33 }
 0x189   :  { %v478_v35 = vsub.f32 %v167_v2, %v477_v34  ;;  %v479_v36 = vsub.f32 %v169_v5, %v477_v34  ;;  %v480_v37 = vsub.f32 %v238_v7, %v477_v34  ;;  %v481_v38 = vsub.f32 %v240_v10, %v477_v34  ;;  %v565_v7 = vld [vmem:[%s1388_s5] sm:$0x3] }
 0x18a   :  { %v482_v39 = vsub.f32 %v309_v14, %v477_v34  ;;  %v483_v43 = vsub.f32 %v311_v16, %v477_v34  ;;  %v484_v48 = vsub.f32 %v380_v19, %v477_v34  ;;  %v485_v52 = vsub.f32 %v382_v22, %v477_v34 }
 0x18b   :  { %v487_v40 = vmul.f32 %v478_v35, %v478_v35  ;;  %v488_v41 = vmul.f32 %v479_v36, %v479_v36  ;;  %v489_v42 = vmul.f32 %v480_v37, %v480_v37  ;;  %v490_v44 = vmul.f32 %v481_v38, %v481_v38 }
 0x18c   :  { %v491_v49 = vmul.f32 %v482_v39, %v482_v39  ;;  %v492_v53 = vmul.f32 %v483_v43, %v483_v43  ;;  %v486_v56 = vsub.f32 %v451_v26, %v477_v34  ;;  %v493_v57 = vmul.f32 %v484_v48, %v484_v48 }
 0x18d   :  { %v496_v45 = vsel %vm73_vm0, %v487_v40, 0.0  ;;  %v497_v46 = vsel %vm73_vm0, %v488_v41, 0.0  ;;  %v499_v50 = vsel %vm73_vm0, %v489_v42, 0.0  ;;  %v501_v54 = vsel %vm73_vm0, %v490_v44, 0.0  ;;  %v564_v41 = vld [vmem:[%s1389_s4] sm:$0x3] }
 0x18e   :  { %v498_v47 = vadd.f32 %v497_v46, %v496_v45  ;;  %v503_v58 = vsel %vm73_vm0, %v491_v49, 0.0  ;;  %v494_v60 = vmul.f32 %v485_v52, %v485_v52  ;;  %v505_v61 = vsel %vm73_vm0, %v492_v53, 0.0 }
 0x18f   :  { %v495_v63 = vmul.f32 %v486_v56, %v486_v56  ;;  %v507_v0 = vsel %vm73_vm0, %v493_v57, 0.0 }
 0x190   :  { %v500_v51 = vadd.f32 %v499_v50, %v498_v47  ;;  %v509_v2 = vsel %vm73_vm0, %v494_v60, 0.0 }
 0x191   :  { %v511_v5 = vsel %vm73_vm0, %v495_v63, 0.0 }
 0x192   :  { %v502_v55 = vadd.f32 %v501_v54, %v500_v51  ;;  %v970_v54 = vlaneseq }
 0x194   :  { %v504_v59 = vadd.f32 %v503_v58, %v502_v55  ;;  %v971_v60 = vshrl.u32 %v970_v54, 7 }
 0x196   :  { %v506_v62 = vadd.f32 %v505_v61, %v504_v59 }
 0x198   :  { %v508_v1 = vadd.f32 %v507_v0, %v506_v62 }
 0x19a   :  { %v510_v4 = vadd.f32 %v509_v2, %v508_v1 }
 0x19c   :  { %v512_v6 = vadd.f32 %v511_v5, %v510_v4 }
 0x19e   :  { %513 = vadd.xlane.f32.xlu0 %v512_v6 }
 0x1b4   :  { %568 = vperm.xlu0 %1115, %v565_v7  }
 0x22b   :  { %v514_v8 = vpop.xlane.xlu0 %513 }
 0x22c   :  { %v515_v9 = vmul.f32 0.00086805556, %v514_v8 }
 0x22e   :  { %v516_v10 = vadd.f32 1e-05, %v515_v9 }
 0x230   :  { %1116 = vrsqrt.f32 %v516_v10 }
 0x233   :  { %v569_v51 = vpop.permute.xlu0 %568 }
 0x23a   :  { %v1117_v12 = vpop.eup %1116 }
 0x23b   :  { %v519_v13 = vmul.f32 %v1117_v12, %v479_v36  ;;  %v525_v14 = vmul.f32 %v1117_v12, %v485_v52  ;;  %v518_v15 = vmul.f32 %v1117_v12, %v478_v35  ;;  %v524_v16 = vmul.f32 %v1117_v12, %v484_v48 }
 0x23c   :  { %v521_v17 = vmul.f32 %v1117_v12, %v481_v38  ;;  %v520_v18 = vmul.f32 %v1117_v12, %v480_v37  ;;  %v523_v19 = vmul.f32 %v1117_v12, %v483_v43  ;;  %v522_v20 = vmul.f32 %v1117_v12, %v482_v39 }
 0x23d   :  { %v533_v21 = vmul.f32 %v530_v11, %v519_v13  ;;  %v539_v22 = vmul.f32 %v530_v11, %v525_v14  ;;  %v532_v23 = vmul.f32 %v530_v11, %v518_v15  ;;  %v538_v24 = vmul.f32 %v530_v11, %v524_v16 }
 0x23e   :  { %v535_v26 = vmul.f32 %v530_v11, %v521_v17  ;;  %v534_v27 = vmul.f32 %v530_v11, %v520_v18  ;;  %v537_v28 = vmul.f32 %v530_v11, %v523_v19  ;;  %v536_v36 = vmul.f32 %v530_v11, %v522_v20 }
 0x23f   :  { %v547_v29 = vadd.f32 %v544_v25, %v533_v21  ;;  %v553_v30 = vadd.f32 %v544_v25, %v539_v22  ;;  %v546_v31 = vadd.f32 %v544_v25, %v532_v23  ;;  %v552_v32 = vadd.f32 %v544_v25, %v538_v24 }
 0x240   :  { %v549_v33 = vadd.f32 %v544_v25, %v535_v26  ;;  %v548_v34 = vadd.f32 %v544_v25, %v534_v27  ;;  %v551_v35 = vadd.f32 %v544_v25, %v537_v28  ;;  %v526_v43 = vmul.f32 %v1117_v12, %v486_v56 }
 0x241   :  { %v556_v38 = vmax.f32 %v547_v29, 0.0  ;;  %v562_v37 = vmax.f32 %v553_v30, 0.0  ;;  %v555_v40 = vmax.f32 %v546_v31, 0.0  ;;  %v561_v39 = vmax.f32 %v552_v32, 0.0 }
 0x242   :  { %v558_v42 = vmax.f32 %v549_v33, 0.0  ;;  %v557_v44 = vmax.f32 %v548_v34, 0.0  ;;  %v550_v45 = vadd.f32 %v544_v25, %v536_v36  ;;  %v560_v46 = vmax.f32 %v551_v35, 0.0 }
 0x243   :  { %1030 = vmatprep.subr.msk.mxu1 %vm73_vm0, %v556_v38  ;;  %1039 = vmatprep.subr.msk.mxu0 %vm73_vm0, %v562_v37  ;;  %v540_v47 = vmul.f32 %v530_v11, %v526_v43  ;;  %v1122_v52 = vmov 1983009808  }
 0x244   :  { %1031 = vmatpush1.msk.msra.mxu1 %vm73_vm0, %v555_v40  ;;  %1040 = vmatpush1.msk.msra.mxu0 %vm73_vm0, %v561_v39  ;;  %v559_v48 = vmax.f32 %v550_v45, 0.0  ;;  %v968_v53 = vunpack.c.l.s4 %v1122_v52 }
 0x245   :  { %1032 = vmatmul.mubr.msk.f32.vlgmr.msra.gmra.mrb[4].mxu1 %vm571_vm3, %v564_v41  ;;  %1033 = vmatprep.subr.msk.mxu1 %vm73_vm0, %v558_v42  ;;  %v554_v49 = vadd.f32 %v544_v25, %v540_v47 }
 0x246   :  { %1034 = vmatpush1.msk.msra.mxu1 %vm73_vm0, %v557_v44  ;;  %737 = vmatprep.mubr.f32.mxu1 %v1118_v3  ;;  %v969_v59 = vunpack.c.0.s8 %v968_v53 }
 0x247   :  { %1036 = vmatprep.subr.msk.mxu1 %vm73_vm0, %v560_v46  ;;  %1041 = vmatmul.mubr.msk.f32.vlgmr.msra.gmra.mrb[6].mxu0 %vm571_vm3, %v564_v41  ;;  %v563_v50 = vmax.f32 %v554_v49, 0.0 }
 0x248   :  { %v972_v6 = vsub.s32 %v969_v59, %v971_v60 }
 0x249   :  { %1035 = vmatmul.mubr.msk.f32.vlgmr.msra.gmra.mrb[6].mxu1 %vm571_vm3, %v564_v41 }
 0x24a   :  { %1037 = vmatpush1.msk.msra.mxu1 %vm73_vm0, %v559_v48  ;;  %808 = vmatprep.mubr.f32.mxu1 %v1118_v3 }
 0x24b   :  { %1066 = vmatprep.subr.mxu1 %v1118_v3 }
 0x24d   :  { %1038 = vmatmul.mubr.msk.f32.vlgmr.msra.gmra.mrb[8].mxu1 %vm571_vm3, %v564_v41 }
 0x24e   :  { %1067 = vmatpush3.msk.msra.mxu1 %vm73_vm0, %v563_v50  ;;  %1068 = vmatprep.mubr.msk.f32.mxu1 %vm1120_vm2, %v1118_v3 }
 0x251   :  { %1069 = vmatmul.mubr.msk.f32.vlgmr.msra.gmra.mrb[10].mxu1 %vm571_vm3, %v564_v41 }
 0x318   :  { %v668_v55 = vpop.f32.mrb[4].mxu1 }
 0x319   :  { %v670_v56 = vpop.f32.mrb[5].mxu1  ;;  %v669_v57 = vadd.f32 %v668_v55, %v569_v51 }
 0x31a   :  { %v671_v58 = vadd.f32 %v670_v56, %v569_v51  ;;  %v881_v61 = vpop.f32.mrb[6].mxu0 }
 0x31b   :  { %v882_v62 = vadd.f32 %v881_v61, %v569_v51  ;;  %v883_v63 = vpop.f32.mrb[7].mxu0 }
 0x31c   :  { %v739_v0 = vpop.f32.mrb[6].mxu1  ;;  %v965_v1 = vcombine.low %v669_v57, %v671_v58  ;;  %v884_v2 = vadd.f32 %v883_v63, %v569_v51 }
 0x31d   :  { %v740_v4 = vadd.f32 %v739_v0, %v569_v51  ;;  %v741_v3 = vpop.f32.mrb[7].mxu1 }
 0x31e   :  { %v742_v5 = vadd.f32 %v741_v3, %v569_v51  ;;  %v983_v7 = vcombine.low %v882_v62, %v884_v2  ;;  %v973_v12 = vrot.slane %v965_v1, %v972_v6 }
 0x320   :  { %v966_v8 = vcombine.low %v740_v4, %v742_v5  ;;  %v810_v9 = vpop.f32.mrb[8].mxu1  ;;  %v997_v17 = vrot.slane %v983_v7, %v972_v6 }
 0x321   :  { %v811_v10 = vadd.f32 %v810_v9, %v569_v51  ;;  %v812_v11 = vpop.f32.mrb[9].mxu1 }
 0x322   :  { %v980_v13 = vrot.slane %v966_v8, %v972_v6  ;;  %v813_v14 = vadd.f32 %v812_v11, %v569_v51 }
 0x324   :  { %v981_v15 = vcombine.low %v973_v12, %v980_v13  ;;  %v982_v16 = vcombine.low %v811_v10, %v813_v14  ;;  %v952_v18 = vpop.f32.mrb[10].mxu1 }
 0x325   :  { %v953_v19 = vadd.f32 %v952_v18, %v569_v51  ;;  %v1070_v20 = vpop.f32.mrb[11].mxu1 }
 0x326   :  { %v990_v21 = vrot.slane %v982_v16, %v972_v6  ;;  %1009 = vst [vmem:[%s1390_s6] sm:$0xff] %v981_v15 }
 0x327   :  { %1044 = vst.sshfl [vmem:[%s1390_s6 + $0x10] sm:$0x3 pattern:$0x76325410] %v953_v19 }
 0x328   :  { %v998_v22 = vcombine.low %v990_v21, %v997_v17 }
 0x32a   :  { %1010 = vst [vmem:[%s1390_s6 + $0x8] sm:$0xff] %v998_v22 }

</bundles_post_ra>
